<compile_context>
chip_gen: v6e
topology: v6e:2x2x1
jax: 0.10.0
libtpu: 0.0.40
codegen_flags: <defaults>
</compile_context>

<pallas_src>
import jax
import jax.numpy as jnp
from jax import lax
from jax.experimental import pallas as pl
from jax.experimental.pallas import tpu as pltpu

# ---- small synthetic sizes consistent with the forward ----
B = 2      # batch
L = 8      # sequence length (tokens)
N = 3      # candidate sentences per example (pred_sent.size(1))
H = 32     # logical BERT hidden size
HP = 128   # lane-padded hidden size (multiple of 128)
V = 64     # vocab size
EPS = 1e-8


# ---------------------------------------------------------------------------
# Single fused Pallas kernel:
#   embeddings + masked mean pooling + linear/tanh encoder stand-in
#   + gram-matrix cosine-similarity epilogue
# ---------------------------------------------------------------------------
def _clf_fused_kernel(tgt_ids_ref, tgt_segs_ref, tgt_mask_ref,      # SMEM int32
                      pred_ids_ref, pred_segs_ref, pred_mask_ref,   # SMEM int32
                      word_emb_ref, seg_emb_ref, pos_emb_ref,       # VMEM f32
                      w_ref, b_ref,                                  # VMEM f32
                      out_ref,                                       # (B, N) f32
                      pooled_ref):                                   # VMEM scratch (ROWS, HP)
    b_sz, l_sz = tgt_ids_ref.shape
    bn = pred_ids_ref.shape[0]
    n_sz = bn // b_sz
    rows = b_sz + bn
    hp = word_emb_ref.shape[1]

    # ---- fused embedding lookup + masked mean pooling (fully unrolled) ----
    # ids/segs/masks are scalar-read from SMEM; embedding rows are dynamic
    # sublane loads from the tiny VMEM tables.  Nothing token-level is ever
    # materialized in HBM, and there is no lane<->sublane mask relayout.
    # TODO(synk): at production L/H this becomes a DMA-gather + MXU pooling.
    def encode_row(row, ids_at, segs_at, mask_at):
        mvals = [mask_at(l).astype(jnp.float32) for l in range(l_sz)]
        denom = mvals[0]
        for l in range(1, l_sz):
            denom = denom + mvals[l]
        inv = 1.0 / jnp.maximum(denom, 1.0)   # fully-masked rows pool to 0
        acc = jnp.zeros((hp,), jnp.float32)
        for l in range(l_sz):
            tok = (word_emb_ref[ids_at(l), :]
                   + seg_emb_ref[segs_at(l), :]
                   + pos_emb_ref[l, :])
            acc = acc + (mvals[l] * inv) * tok
        pooled_ref[row, :] = acc

    # rows [0, B): tgt sequences
    for b in range(b_sz):
        encode_row(b,
                   lambda l, b=b: tgt_ids_ref[b, l],
                   lambda l, b=b: tgt_segs_ref[b, l],
                   lambda l, b=b: tgt_mask_ref[b, l])
    # rows [B, B + B*N): pred sentences, batch-major then sentence index
    for k in range(bn):
        encode_row(b_sz + k,
                   lambda l, k=k: pred_ids_ref[k, l],
                   lambda l, k=k: pred_segs_ref[k, l],
                   lambda l, k=k: pred_mask_ref[k, l])

    # ---- encoder stand-in: linear projection + tanh (MXU dot, f32 acc) ----
    # TODO(synk): the pretrained 12-layer BertModel transformer stack is not
    # reproduced; embeddings + masked mean pooling + linear + tanh stand in.
    pooled = pooled_ref[...]                                          # (ROWS, HP)
    vec = jnp.tanh(jnp.dot(pooled, w_ref[...],
                           preferred_element_type=jnp.float32) + b_ref[...])

    # ---- cosine epilogue via ONE gram matrix on the MXU ----
    # G[r, c] = vec_r . vec_c  gives every dot product and every squared norm;
    # replaces three 128-lane XLU reductions with one tiny matmul.
    g = jnp.dot(vec, vec.T, preferred_element_type=jnp.float32)       # (ROWS, ROWS)
    ri = lax.broadcasted_iota(jnp.int32, (rows, rows), 0)
    ci = lax.broadcasted_iota(jnp.int32, (rows, rows), 1)
    diag = jnp.sum(jnp.where(ri == ci, g, 0.0), axis=0)               # (ROWS,) ||vec_r||^2

    # Select, for every (b, n): sentence row  sr = B + b*N + n  and top row b.
    r3 = lax.broadcasted_iota(jnp.int32, (b_sz, n_sz, rows), 2)
    b3 = lax.broadcasted_iota(jnp.int32, (b_sz, n_sz, rows), 0)
    n3 = lax.broadcasted_iota(jnp.int32, (b_sz, n_sz, rows), 1)
    sent_sel = r3 == (b_sz + b3 * n_sz + n3)
    top_sel = r3 == b3

    g_top = jnp.broadcast_to(g[:b_sz][:, None, :], (b_sz, n_sz, rows))
    diag3 = jnp.broadcast_to(diag[None, None, :], (b_sz, n_sz, rows))

    dots = jnp.sum(jnp.where(sent_sel, g_top, 0.0), axis=-1)          # sent . top
    ns2 = jnp.sum(jnp.where(sent_sel, diag3, 0.0), axis=-1)           # ||sent||^2
    nt2 = jnp.sum(jnp.where(top_sel, diag3, 0.0), axis=-1)            # ||top||^2

    # torch.cosine_similarity: dot / max(||a|| * ||b||, eps)   (product clamp)
    out_ref[...] = dots / jnp.maximum(jnp.sqrt(ns2 * nt2), EPS)       # (B, N)


# ---------------------------------------------------------------------------
# Wrapper — mirrors ClfSummarizer.forward; ZERO XLA compute ops outside the
# kernel (only free contiguous reshapes of the tiny int32 pred tensors).
# ---------------------------------------------------------------------------
def clf_summarizer_forward(params, tgt_ids, tgt_segs, mask,
                           pred_sent, pred_segs, pred_mask,
                           pred_labels, lables_mask):
    b_sz, l_sz = tgt_ids.shape
    n_sz = pred_sent.shape[1]
    rows = b_sz * (n_sz + 1)

    # Contiguous row-major reshapes: (B, N, L) -> (B*N, L).  No data movement.
    pred_ids2 = pred_sent.reshape(b_sz * n_sz, l_sz)
    pred_segs2 = pred_segs.reshape(b_sz * n_sz, l_sz)
    pred_mask2 = pred_mask.reshape(b_sz * n_sz, l_sz)

    smem_specs = [pl.BlockSpec(memory_space=pltpu.MemorySpace.SMEM)
                  for _ in range(6)]

    sent_scores = pl.pallas_call(
        _clf_fused_kernel,
        out_shape=jax.ShapeDtypeStruct((b_sz, n_sz), jnp.float32),
        grid=(1,),
        in_specs=smem_specs + [
            pl.BlockSpec((V, HP), lambda i: (0, 0)),    # word_emb
            pl.BlockSpec((8, HP), lambda i: (0, 0)),    # seg_emb (rows 2..7 zero pad)
            pl.BlockSpec((L, HP), lambda i: (0, 0)),    # pos_emb
            pl.BlockSpec((HP, HP), lambda i: (0, 0)),   # w_proj
            pl.BlockSpec((1, HP), lambda i: (0, 0)),    # b_proj
        ],
        out_specs=pl.BlockSpec((b_sz, n_sz), lambda i: (0, 0)),
        scratch_shapes=[pltpu.VMEM((rows, HP), jnp.float32)],
        compiler_params=pltpu.CompilerParams(
            dimension_semantics=("arbitrary",)),
    )(tgt_ids, tgt_segs, mask, pred_ids2, pred_segs2, pred_mask2,
      params["word_emb"], params["seg_emb"], params["pos_emb"],
      params["w_proj"], params["b_proj"])

    return sent_scores, lables_mask


# ---------------------------------------------------------------------------
# Deterministic parameter init (synthetic, no checkpoint load)
# ---------------------------------------------------------------------------
def init_params(key):
    k1, k2, k3, k4, k5 = jax.random.split(key, 5)
    scale = 0.02

    def pad_lane(x):  # zero-pad hidden dim H -> HP for lane density
        return jnp.pad(x, [(0, 0)] * (x.ndim - 1) + [(0, HP - H)])

    word = scale * jax.random.normal(k1, (V, H), jnp.float32)
    seg = scale * jax.random.normal(k2, (2, H), jnp.float32)
    pos = scale * jax.random.normal(k3, (L, H), jnp.float32)
    w = jax.random.normal(k4, (H, H), jnp.float32) / jnp.sqrt(H)
    b = scale * jax.random.normal(k5, (H,), jnp.float32)
    return {
        "word_emb": pad_lane(word),                               # (V, HP)
        "seg_emb": jnp.pad(pad_lane(seg), ((0, 8 - 2), (0, 0))),  # (8, HP)
        "pos_emb": pad_lane(pos),                                 # (L, HP)
        "w_proj": jnp.pad(w, ((0, HP - H), (0, HP - H))),         # (HP, HP)
        # Bias is exactly zero in padded lanes H..HP-1 so padded lanes of the
        # encoded vectors stay 0 and never leak into the cosine scores.
        "b_proj": pad_lane(b)[None, :],                           # (1, HP)
    }


if __name__ == "__main__":
    params = init_params(jax.random.PRNGKey(42))
    key = jax.random.PRNGKey(0)
    ks = jax.random.split(key, 6)

    tgt_ids = jax.random.randint(ks[0], (B, L), 0, V, jnp.int32)
    tgt_segs = jax.random.randint(ks[1], (B, L), 0, 2, jnp.int32)
    mask = jnp.ones((B, L), jnp.int32)
    pred_sent = jax.random.randint(ks[2], (B, N, L), 0, V, jnp.int32)
    pred_segs = jax.random.randint(ks[3], (B, N, L), 0, 2, jnp.int32)
    pred_mask = jnp.ones((B, N, L), jnp.int32)
    pred_labels = jax.random.randint(ks[4], (B, N), 0, 2, jnp.int32)
    lables_mask = jnp.ones((B, N), jnp.float32)

    fwd = jax.jit(clf_summarizer_forward)
    sent_scores, lm = fwd(params, tgt_ids, tgt_segs, mask,
                          pred_sent, pred_segs, pred_mask,
                          pred_labels, lables_mask)
    jax.block_until_ready((sent_scores, lm))

    assert sent_scores.shape == (B, N)
    assert lm.shape == (B, N)
    assert bool(jnp.all(jnp.isfinite(sent_scores)))
    assert bool(jnp.all(jnp.abs(sent_scores) <= 1.0 + 1e-5))  # cosine range
    print("KERNEL_OK")
</pallas_src>

<mosaic_0001>
module attributes {stable_mosaic.version = 11 : i64} {
  func.func @_clf_fused_kernel(%arg0: i32, %arg1: memref<2x8xi32, #tpu.memory_space<smem>>, %arg2: memref<2x8xi32, #tpu.memory_space<smem>>, %arg3: memref<2x8xi32, #tpu.memory_space<smem>>, %arg4: memref<6x8xi32, #tpu.memory_space<smem>>, %arg5: memref<6x8xi32, #tpu.memory_space<smem>>, %arg6: memref<6x8xi32, #tpu.memory_space<smem>>, %arg7: memref<64x128xf32, #tpu.memory_space<vmem>>, %arg8: memref<8x128xf32, #tpu.memory_space<vmem>>, %arg9: memref<8x128xf32, #tpu.memory_space<vmem>>, %arg10: memref<128x128xf32, #tpu.memory_space<vmem>>, %arg11: memref<1x128xf32, #tpu.memory_space<vmem>>, %arg12: memref<2x3xf32, #tpu.memory_space<vmem>>, %arg13: memref<8x128xf32, #tpu.memory_space<vmem>>) attributes {dimension_semantics = [#tpu.dimension_semantics<arbitrary>], iteration_bounds = array<i64: 1>, scalar_prefetch = 0 : i64, scratch_operands = 1 : i64, tpu.core_type = #tpu.core_type<tc>, window_params = [{transform_indices = @transform_0, window_bounds = array<i64: 2, 8>}, {transform_indices = @transform_1, window_bounds = array<i64: 2, 8>}, {transform_indices = @transform_2, window_bounds = array<i64: 2, 8>}, {transform_indices = @transform_3, window_bounds = array<i64: 6, 8>}, {transform_indices = @transform_4, window_bounds = array<i64: 6, 8>}, {transform_indices = @transform_5, window_bounds = array<i64: 6, 8>}, {pipeline_mode = #tpu.pipeline_mode<synchronous>, transform_indices = @transform_6, window_bounds = array<i64: 64, 128>}, {pipeline_mode = #tpu.pipeline_mode<synchronous>, transform_indices = @transform_7, window_bounds = array<i64: 8, 128>}, {pipeline_mode = #tpu.pipeline_mode<synchronous>, transform_indices = @transform_8, window_bounds = array<i64: 8, 128>}, {pipeline_mode = #tpu.pipeline_mode<synchronous>, transform_indices = @transform_9, window_bounds = array<i64: 128, 128>}, {pipeline_mode = #tpu.pipeline_mode<synchronous>, transform_indices = @transform_10, window_bounds = array<i64: 1, 128>}, {pipeline_mode = #tpu.pipeline_mode<synchronous>, transform_indices = @transform_11, window_bounds = array<i64: 2, 3>}]} {
    %c0 = arith.constant 0 : index
    %c0_0 = arith.constant 0 : index
    %0 = memref.load %arg3[%c0, %c0_0] : memref<2x8xi32, #tpu.memory_space<smem>>
    %1 = arith.sitofp %0 : i32 to f32
    %c0_1 = arith.constant 0 : index
    %c1 = arith.constant 1 : index
    %2 = memref.load %arg3[%c0_1, %c1] : memref<2x8xi32, #tpu.memory_space<smem>>
    %3 = arith.sitofp %2 : i32 to f32
    %c0_2 = arith.constant 0 : index
    %c2 = arith.constant 2 : index
    %4 = memref.load %arg3[%c0_2, %c2] : memref<2x8xi32, #tpu.memory_space<smem>>
    %5 = arith.sitofp %4 : i32 to f32
    %c0_3 = arith.constant 0 : index
    %c3 = arith.constant 3 : index
    %6 = memref.load %arg3[%c0_3, %c3] : memref<2x8xi32, #tpu.memory_space<smem>>
    %7 = arith.sitofp %6 : i32 to f32
    %c0_4 = arith.constant 0 : index
    %c4 = arith.constant 4 : index
    %8 = memref.load %arg3[%c0_4, %c4] : memref<2x8xi32, #tpu.memory_space<smem>>
    %9 = arith.sitofp %8 : i32 to f32
    %c0_5 = arith.constant 0 : index
    %c5 = arith.constant 5 : index
    %10 = memref.load %arg3[%c0_5, %c5] : memref<2x8xi32, #tpu.memory_space<smem>>
    %11 = arith.sitofp %10 : i32 to f32
    %c0_6 = arith.constant 0 : index
    %c6 = arith.constant 6 : index
    %12 = memref.load %arg3[%c0_6, %c6] : memref<2x8xi32, #tpu.memory_space<smem>>
    %13 = arith.sitofp %12 : i32 to f32
    %c0_7 = arith.constant 0 : index
    %c7 = arith.constant 7 : index
    %14 = memref.load %arg3[%c0_7, %c7] : memref<2x8xi32, #tpu.memory_space<smem>>
    %15 = arith.sitofp %14 : i32 to f32
    %16 = arith.addf %1, %3 : f32
    %17 = arith.addf %16, %5 : f32
    %18 = arith.addf %17, %7 : f32
    %19 = arith.addf %18, %9 : f32
    %20 = arith.addf %19, %11 : f32
    %21 = arith.addf %20, %13 : f32
    %22 = arith.addf %21, %15 : f32
    %cst = arith.constant 1.000000e+00 : f32
    %23 = arith.maximumf %22, %cst : f32
    %cst_8 = arith.constant 1.000000e+00 : f32
    %24 = arith.divf %cst_8, %23 : f32
    %cst_9 = arith.constant 0.000000e+00 : f32
    %25 = vector.broadcast %cst_9 : f32 to vector<128xf32>
    %c0_10 = arith.constant 0 : index
    %c0_11 = arith.constant 0 : index
    %26 = memref.load %arg1[%c0_10, %c0_11] : memref<2x8xi32, #tpu.memory_space<smem>>
    %27 = arith.index_cast %26 : i32 to index
    %c0_12 = arith.constant 0 : index
    %28 = vector.load %arg7[%27, %c0_12] : memref<64x128xf32, #tpu.memory_space<vmem>>, vector<1x128xf32>
    %29 = vector.shape_cast %28 : vector<1x128xf32> to vector<128xf32>
    %c0_13 = arith.constant 0 : index
    %c0_14 = arith.constant 0 : index
    %30 = memref.load %arg2[%c0_13, %c0_14] : memref<2x8xi32, #tpu.memory_space<smem>>
    %31 = arith.index_cast %30 : i32 to index
    %c0_15 = arith.constant 0 : index
    %32 = vector.load %arg8[%31, %c0_15] : memref<8x128xf32, #tpu.memory_space<vmem>>, vector<1x128xf32>
    %33 = vector.shape_cast %32 : vector<1x128xf32> to vector<128xf32>
    %34 = arith.addf %29, %33 : vector<128xf32>
    %c0_16 = arith.constant 0 : index
    %c0_17 = arith.constant 0 : index
    %35 = vector.load %arg9[%c0_16, %c0_17] : memref<8x128xf32, #tpu.memory_space<vmem>>, vector<1x128xf32>
    %36 = vector.shape_cast %35 : vector<1x128xf32> to vector<128xf32>
    %37 = arith.addf %34, %36 : vector<128xf32>
    %38 = arith.mulf %1, %24 : f32
    %39 = vector.broadcast %38 : f32 to vector<128xf32>
    %40 = arith.mulf %39, %37 : vector<128xf32>
    %41 = arith.addf %25, %40 : vector<128xf32>
    %c0_18 = arith.constant 0 : index
    %c1_19 = arith.constant 1 : index
    %42 = memref.load %arg1[%c0_18, %c1_19] : memref<2x8xi32, #tpu.memory_space<smem>>
    %43 = arith.index_cast %42 : i32 to index
    %c0_20 = arith.constant 0 : index
    %44 = vector.load %arg7[%43, %c0_20] : memref<64x128xf32, #tpu.memory_space<vmem>>, vector<1x128xf32>
    %45 = vector.shape_cast %44 : vector<1x128xf32> to vector<128xf32>
    %c0_21 = arith.constant 0 : index
    %c1_22 = arith.constant 1 : index
    %46 = memref.load %arg2[%c0_21, %c1_22] : memref<2x8xi32, #tpu.memory_space<smem>>
    %47 = arith.index_cast %46 : i32 to index
    %c0_23 = arith.constant 0 : index
    %48 = vector.load %arg8[%47, %c0_23] : memref<8x128xf32, #tpu.memory_space<vmem>>, vector<1x128xf32>
    %49 = vector.shape_cast %48 : vector<1x128xf32> to vector<128xf32>
    %50 = arith.addf %45, %49 : vector<128xf32>
    %c1_24 = arith.constant 1 : index
    %c0_25 = arith.constant 0 : index
    %51 = vector.load %arg9[%c1_24, %c0_25] : memref<8x128xf32, #tpu.memory_space<vmem>>, vector<1x128xf32>
    %52 = vector.shape_cast %51 : vector<1x128xf32> to vector<128xf32>
    %53 = arith.addf %50, %52 : vector<128xf32>
    %54 = arith.mulf %3, %24 : f32
    %55 = vector.broadcast %54 : f32 to vector<128xf32>
    %56 = arith.mulf %55, %53 : vector<128xf32>
    %57 = arith.addf %41, %56 : vector<128xf32>
    %c0_26 = arith.constant 0 : index
    %c2_27 = arith.constant 2 : index
    %58 = memref.load %arg1[%c0_26, %c2_27] : memref<2x8xi32, #tpu.memory_space<smem>>
    %59 = arith.index_cast %58 : i32 to index
    %c0_28 = arith.constant 0 : index
    %60 = vector.load %arg7[%59, %c0_28] : memref<64x128xf32, #tpu.memory_space<vmem>>, vector<1x128xf32>
    %61 = vector.shape_cast %60 : vector<1x128xf32> to vector<128xf32>
    %c0_29 = arith.constant 0 : index
    %c2_30 = arith.constant 2 : index
    %62 = memref.load %arg2[%c0_29, %c2_30] : memref<2x8xi32, #tpu.memory_space<smem>>
    %63 = arith.index_cast %62 : i32 to index
    %c0_31 = arith.constant 0 : index
    %64 = vector.load %arg8[%63, %c0_31] : memref<8x128xf32, #tpu.memory_space<vmem>>, vector<1x128xf32>
    %65 = vector.shape_cast %64 : vector<1x128xf32> to vector<128xf32>
    %66 = arith.addf %61, %65 : vector<128xf32>
    %c2_32 = arith.constant 2 : index
    %c0_33 = arith.constant 0 : index
    %67 = vector.load %arg9[%c2_32, %c0_33] : memref<8x128xf32, #tpu.memory_space<vmem>>, vector<1x128xf32>
    %68 = vector.shape_cast %67 : vector<1x128xf32> to vector<128xf32>
    %69 = arith.addf %66, %68 : vector<128xf32>
    %70 = arith.mulf %5, %24 : f32
    %71 = vector.broadcast %70 : f32 to vector<128xf32>
    %72 = arith.mulf %71, %69 : vector<128xf32>
    %73 = arith.addf %57, %72 : vector<128xf32>
    %c0_34 = arith.constant 0 : index
    %c3_35 = arith.constant 3 : index
    %74 = memref.load %arg1[%c0_34, %c3_35] : memref<2x8xi32, #tpu.memory_space<smem>>
    %75 = arith.index_cast %74 : i32 to index
    %c0_36 = arith.constant 0 : index
    %76 = vector.load %arg7[%75, %c0_36] : memref<64x128xf32, #tpu.memory_space<vmem>>, vector<1x128xf32>
    %77 = vector.shape_cast %76 : vector<1x128xf32> to vector<128xf32>
    %c0_37 = arith.constant 0 : index
    %c3_38 = arith.constant 3 : index
    %78 = memref.load %arg2[%c0_37, %c3_38] : memref<2x8xi32, #tpu.memory_space<smem>>
    %79 = arith.index_cast %78 : i32 to index
    %c0_39 = arith.constant 0 : index
    %80 = vector.load %arg8[%79, %c0_39] : memref<8x128xf32, #tpu.memory_space<vmem>>, vector<1x128xf32>
    %81 = vector.shape_cast %80 : vector<1x128xf32> to vector<128xf32>
    %82 = arith.addf %77, %81 : vector<128xf32>
    %c3_40 = arith.constant 3 : index
    %c0_41 = arith.constant 0 : index
    %83 = vector.load %arg9[%c3_40, %c0_41] : memref<8x128xf32, #tpu.memory_space<vmem>>, vector<1x128xf32>
    %84 = vector.shape_cast %83 : vector<1x128xf32> to vector<128xf32>
    %85 = arith.addf %82, %84 : vector<128xf32>
    %86 = arith.mulf %7, %24 : f32
    %87 = vector.broadcast %86 : f32 to vector<128xf32>
    %88 = arith.mulf %87, %85 : vector<128xf32>
    %89 = arith.addf %73, %88 : vector<128xf32>
    %c0_42 = arith.constant 0 : index
    %c4_43 = arith.constant 4 : index
    %90 = memref.load %arg1[%c0_42, %c4_43] : memref<2x8xi32, #tpu.memory_space<smem>>
    %91 = arith.index_cast %90 : i32 to index
    %c0_44 = arith.constant 0 : index
    %92 = vector.load %arg7[%91, %c0_44] : memref<64x128xf32, #tpu.memory_space<vmem>>, vector<1x128xf32>
    %93 = vector.shape_cast %92 : vector<1x128xf32> to vector<128xf32>
    %c0_45 = arith.constant 0 : index
    %c4_46 = arith.constant 4 : index
    %94 = memref.load %arg2[%c0_45, %c4_46] : memref<2x8xi32, #tpu.memory_space<smem>>
    %95 = arith.index_cast %94 : i32 to index
    %c0_47 = arith.constant 0 : index
    %96 = vector.load %arg8[%95, %c0_47] : memref<8x128xf32, #tpu.memory_space<vmem>>, vector<1x128xf32>
    %97 = vector.shape_cast %96 : vector<1x128xf32> to vector<128xf32>
    %98 = arith.addf %93, %97 : vector<128xf32>
    %c4_48 = arith.constant 4 : index
    %c0_49 = arith.constant 0 : index
    %99 = vector.load %arg9[%c4_48, %c0_49] : memref<8x128xf32, #tpu.memory_space<vmem>>, vector<1x128xf32>
    %100 = vector.shape_cast %99 : vector<1x128xf32> to vector<128xf32>
    %101 = arith.addf %98, %100 : vector<128xf32>
    %102 = arith.mulf %9, %24 : f32
    %103 = vector.broadcast %102 : f32 to vector<128xf32>
    %104 = arith.mulf %103, %101 : vector<128xf32>
    %105 = arith.addf %89, %104 : vector<128xf32>
    %c0_50 = arith.constant 0 : index
    %c5_51 = arith.constant 5 : index
    %106 = memref.load %arg1[%c0_50, %c5_51] : memref<2x8xi32, #tpu.memory_space<smem>>
    %107 = arith.index_cast %106 : i32 to index
    %c0_52 = arith.constant 0 : index
    %108 = vector.load %arg7[%107, %c0_52] : memref<64x128xf32, #tpu.memory_space<vmem>>, vector<1x128xf32>
    %109 = vector.shape_cast %108 : vector<1x128xf32> to vector<128xf32>
    %c0_53 = arith.constant 0 : index
    %c5_54 = arith.constant 5 : index
    %110 = memref.load %arg2[%c0_53, %c5_54] : memref<2x8xi32, #tpu.memory_space<smem>>
    %111 = arith.index_cast %110 : i32 to index
    %c0_55 = arith.constant 0 : index
    %112 = vector.load %arg8[%111, %c0_55] : memref<8x128xf32, #tpu.memory_space<vmem>>, vector<1x128xf32>
    %113 = vector.shape_cast %112 : vector<1x128xf32> to vector<128xf32>
    %114 = arith.addf %109, %113 : vector<128xf32>
    %c5_56 = arith.constant 5 : index
    %c0_57 = arith.constant 0 : index
    %115 = vector.load %arg9[%c5_56, %c0_57] : memref<8x128xf32, #tpu.memory_space<vmem>>, vector<1x128xf32>
    %116 = vector.shape_cast %115 : vector<1x128xf32> to vector<128xf32>
    %117 = arith.addf %114, %116 : vector<128xf32>
    %118 = arith.mulf %11, %24 : f32
    %119 = vector.broadcast %118 : f32 to vector<128xf32>
    %120 = arith.mulf %119, %117 : vector<128xf32>
    %121 = arith.addf %105, %120 : vector<128xf32>
    %c0_58 = arith.constant 0 : index
    %c6_59 = arith.constant 6 : index
    %122 = memref.load %arg1[%c0_58, %c6_59] : memref<2x8xi32, #tpu.memory_space<smem>>
    %123 = arith.index_cast %122 : i32 to index
    %c0_60 = arith.constant 0 : index
    %124 = vector.load %arg7[%123, %c0_60] : memref<64x128xf32, #tpu.memory_space<vmem>>, vector<1x128xf32>
    %125 = vector.shape_cast %124 : vector<1x128xf32> to vector<128xf32>
    %c0_61 = arith.constant 0 : index
    %c6_62 = arith.constant 6 : index
    %126 = memref.load %arg2[%c0_61, %c6_62] : memref<2x8xi32, #tpu.memory_space<smem>>
    %127 = arith.index_cast %126 : i32 to index
    %c0_63 = arith.constant 0 : index
    %128 = vector.load %arg8[%127, %c0_63] : memref<8x128xf32, #tpu.memory_space<vmem>>, vector<1x128xf32>
    %129 = vector.shape_cast %128 : vector<1x128xf32> to vector<128xf32>
    %130 = arith.addf %125, %129 : vector<128xf32>
    %c6_64 = arith.constant 6 : index
    %c0_65 = arith.constant 0 : index
    %131 = vector.load %arg9[%c6_64, %c0_65] : memref<8x128xf32, #tpu.memory_space<vmem>>, vector<1x128xf32>
    %132 = vector.shape_cast %131 : vector<1x128xf32> to vector<128xf32>
    %133 = arith.addf %130, %132 : vector<128xf32>
    %134 = arith.mulf %13, %24 : f32
    %135 = vector.broadcast %134 : f32 to vector<128xf32>
    %136 = arith.mulf %135, %133 : vector<128xf32>
    %137 = arith.addf %121, %136 : vector<128xf32>
    %c0_66 = arith.constant 0 : index
    %c7_67 = arith.constant 7 : index
    %138 = memref.load %arg1[%c0_66, %c7_67] : memref<2x8xi32, #tpu.memory_space<smem>>
    %139 = arith.index_cast %138 : i32 to index
    %c0_68 = arith.constant 0 : index
    %140 = vector.load %arg7[%139, %c0_68] : memref<64x128xf32, #tpu.memory_space<vmem>>, vector<1x128xf32>
    %141 = vector.shape_cast %140 : vector<1x128xf32> to vector<128xf32>
    %c0_69 = arith.constant 0 : index
    %c7_70 = arith.constant 7 : index
    %142 = memref.load %arg2[%c0_69, %c7_70] : memref<2x8xi32, #tpu.memory_space<smem>>
    %143 = arith.index_cast %142 : i32 to index
    %c0_71 = arith.constant 0 : index
    %144 = vector.load %arg8[%143, %c0_71] : memref<8x128xf32, #tpu.memory_space<vmem>>, vector<1x128xf32>
    %145 = vector.shape_cast %144 : vector<1x128xf32> to vector<128xf32>
    %146 = arith.addf %141, %145 : vector<128xf32>
    %c7_72 = arith.constant 7 : index
    %c0_73 = arith.constant 0 : index
    %147 = vector.load %arg9[%c7_72, %c0_73] : memref<8x128xf32, #tpu.memory_space<vmem>>, vector<1x128xf32>
    %148 = vector.shape_cast %147 : vector<1x128xf32> to vector<128xf32>
    %149 = arith.addf %146, %148 : vector<128xf32>
    %150 = arith.mulf %15, %24 : f32
    %151 = vector.broadcast %150 : f32 to vector<128xf32>
    %152 = arith.mulf %151, %149 : vector<128xf32>
    %153 = arith.addf %137, %152 : vector<128xf32>
    %c0_74 = arith.constant 0 : index
    %c0_75 = arith.constant 0 : index
    %154 = vector.load %arg13[%c0_74, %c0_75] : memref<8x128xf32, #tpu.memory_space<vmem>>, vector<1x128xf32>
    %155 = vector.shape_cast %154 : vector<1x128xf32> to vector<128xf32>
    %156 = vector.shape_cast %153 : vector<128xf32> to vector<1x128xf32>
    tpu.vector_store %arg13[%c0_74, %c0_75], %156 {strides = array<i32>} : memref<8x128xf32, #tpu.memory_space<vmem>>, vector<1x128xf32>,
    %c1_76 = arith.constant 1 : index
    %c0_77 = arith.constant 0 : index
    %157 = memref.load %arg3[%c1_76, %c0_77] : memref<2x8xi32, #tpu.memory_space<smem>>
    %158 = arith.sitofp %157 : i32 to f32
    %c1_78 = arith.constant 1 : index
    %c1_79 = arith.constant 1 : index
    %159 = memref.load %arg3[%c1_78, %c1_79] : memref<2x8xi32, #tpu.memory_space<smem>>
    %160 = arith.sitofp %159 : i32 to f32
    %c1_80 = arith.constant 1 : index
    %c2_81 = arith.constant 2 : index
    %161 = memref.load %arg3[%c1_80, %c2_81] : memref<2x8xi32, #tpu.memory_space<smem>>
    %162 = arith.sitofp %161 : i32 to f32
    %c1_82 = arith.constant 1 : index
    %c3_83 = arith.constant 3 : index
    %163 = memref.load %arg3[%c1_82, %c3_83] : memref<2x8xi32, #tpu.memory_space<smem>>
    %164 = arith.sitofp %163 : i32 to f32
    %c1_84 = arith.constant 1 : index
    %c4_85 = arith.constant 4 : index
    %165 = memref.load %arg3[%c1_84, %c4_85] : memref<2x8xi32, #tpu.memory_space<smem>>
    %166 = arith.sitofp %165 : i32 to f32
    %c1_86 = arith.constant 1 : index
    %c5_87 = arith.constant 5 : index
    %167 = memref.load %arg3[%c1_86, %c5_87] : memref<2x8xi32, #tpu.memory_space<smem>>
    %168 = arith.sitofp %167 : i32 to f32
    %c1_88 = arith.constant 1 : index
    %c6_89 = arith.constant 6 : index
    %169 = memref.load %arg3[%c1_88, %c6_89] : memref<2x8xi32, #tpu.memory_space<smem>>
    %170 = arith.sitofp %169 : i32 to f32
    %c1_90 = arith.constant 1 : index
    %c7_91 = arith.constant 7 : index
    %171 = memref.load %arg3[%c1_90, %c7_91] : memref<2x8xi32, #tpu.memory_space<smem>>
    %172 = arith.sitofp %171 : i32 to f32
    %173 = arith.addf %158, %160 : f32
    %174 = arith.addf %173, %162 : f32
    %175 = arith.addf %174, %164 : f32
    %176 = arith.addf %175, %166 : f32
    %177 = arith.addf %176, %168 : f32
    %178 = arith.addf %177, %170 : f32
    %179 = arith.addf %178, %172 : f32
    %cst_92 = arith.constant 1.000000e+00 : f32
    %180 = arith.maximumf %179, %cst_92 : f32
    %cst_93 = arith.constant 1.000000e+00 : f32
    %181 = arith.divf %cst_93, %180 : f32
    %cst_94 = arith.constant 0.000000e+00 : f32
    %182 = vector.broadcast %cst_94 : f32 to vector<128xf32>
    %c1_95 = arith.constant 1 : index
    %c0_96 = arith.constant 0 : index
    %183 = memref.load %arg1[%c1_95, %c0_96] : memref<2x8xi32, #tpu.memory_space<smem>>
    %184 = arith.index_cast %183 : i32 to index
    %c0_97 = arith.constant 0 : index
    %185 = vector.load %arg7[%184, %c0_97] : memref<64x128xf32, #tpu.memory_space<vmem>>, vector<1x128xf32>
    %186 = vector.shape_cast %185 : vector<1x128xf32> to vector<128xf32>
    %c1_98 = arith.constant 1 : index
    %c0_99 = arith.constant 0 : index
    %187 = memref.load %arg2[%c1_98, %c0_99] : memref<2x8xi32, #tpu.memory_space<smem>>
    %188 = arith.index_cast %187 : i32 to index
    %c0_100 = arith.constant 0 : index
    %189 = vector.load %arg8[%188, %c0_100] : memref<8x128xf32, #tpu.memory_space<vmem>>, vector<1x128xf32>
    %190 = vector.shape_cast %189 : vector<1x128xf32> to vector<128xf32>
    %191 = arith.addf %186, %190 : vector<128xf32>
    %c0_101 = arith.constant 0 : index
    %c0_102 = arith.constant 0 : index
    %192 = vector.load %arg9[%c0_101, %c0_102] : memref<8x128xf32, #tpu.memory_space<vmem>>, vector<1x128xf32>
    %193 = vector.shape_cast %192 : vector<1x128xf32> to vector<128xf32>
    %194 = arith.addf %191, %193 : vector<128xf32>
    %195 = arith.mulf %158, %181 : f32
    %196 = vector.broadcast %195 : f32 to vector<128xf32>
    %197 = arith.mulf %196, %194 : vector<128xf32>
    %198 = arith.addf %182, %197 : vector<128xf32>
    %c1_103 = arith.constant 1 : index
    %c1_104 = arith.constant 1 : index
    %199 = memref.load %arg1[%c1_103, %c1_104] : memref<2x8xi32, #tpu.memory_space<smem>>
    %200 = arith.index_cast %199 : i32 to index
    %c0_105 = arith.constant 0 : index
    %201 = vector.load %arg7[%200, %c0_105] : memref<64x128xf32, #tpu.memory_space<vmem>>, vector<1x128xf32>
    %202 = vector.shape_cast %201 : vector<1x128xf32> to vector<128xf32>
    %c1_106 = arith.constant 1 : index
    %c1_107 = arith.constant 1 : index
    %203 = memref.load %arg2[%c1_106, %c1_107] : memref<2x8xi32, #tpu.memory_space<smem>>
    %204 = arith.index_cast %203 : i32 to index
    %c0_108 = arith.constant 0 : index
    %205 = vector.load %arg8[%204, %c0_108] : memref<8x128xf32, #tpu.memory_space<vmem>>, vector<1x128xf32>
    %206 = vector.shape_cast %205 : vector<1x128xf32> to vector<128xf32>
    %207 = arith.addf %202, %206 : vector<128xf32>
    %c1_109 = arith.constant 1 : index
    %c0_110 = arith.constant 0 : index
    %208 = vector.load %arg9[%c1_109, %c0_110] : memref<8x128xf32, #tpu.memory_space<vmem>>, vector<1x128xf32>
    %209 = vector.shape_cast %208 : vector<1x128xf32> to vector<128xf32>
    %210 = arith.addf %207, %209 : vector<128xf32>
    %211 = arith.mulf %160, %181 : f32
    %212 = vector.broadcast %211 : f32 to vector<128xf32>
    %213 = arith.mulf %212, %210 : vector<128xf32>
    %214 = arith.addf %198, %213 : vector<128xf32>
    %c1_111 = arith.constant 1 : index
    %c2_112 = arith.constant 2 : index
    %215 = memref.load %arg1[%c1_111, %c2_112] : memref<2x8xi32, #tpu.memory_space<smem>>
    %216 = arith.index_cast %215 : i32 to index
    %c0_113 = arith.constant 0 : index
    %217 = vector.load %arg7[%216, %c0_113] : memref<64x128xf32, #tpu.memory_space<vmem>>, vector<1x128xf32>
    %218 = vector.shape_cast %217 : vector<1x128xf32> to vector<128xf32>
    %c1_114 = arith.constant 1 : index
    %c2_115 = arith.constant 2 : index
    %219 = memref.load %arg2[%c1_114, %c2_115] : memref<2x8xi32, #tpu.memory_space<smem>>
    %220 = arith.index_cast %219 : i32 to index
    %c0_116 = arith.constant 0 : index
    %221 = vector.load %arg8[%220, %c0_116] : memref<8x128xf32, #tpu.memory_space<vmem>>, vector<1x128xf32>
    %222 = vector.shape_cast %221 : vector<1x128xf32> to vector<128xf32>
    %223 = arith.addf %218, %222 : vector<128xf32>
    %c2_117 = arith.constant 2 : index
    %c0_118 = arith.constant 0 : index
    %224 = vector.load %arg9[%c2_117, %c0_118] : memref<8x128xf32, #tpu.memory_space<vmem>>, vector<1x128xf32>
    %225 = vector.shape_cast %224 : vector<1x128xf32> to vector<128xf32>
    %226 = arith.addf %223, %225 : vector<128xf32>
    %227 = arith.mulf %162, %181 : f32
    %228 = vector.broadcast %227 : f32 to vector<128xf32>
    %229 = arith.mulf %228, %226 : vector<128xf32>
    %230 = arith.addf %214, %229 : vector<128xf32>
    %c1_119 = arith.constant 1 : index
    %c3_120 = arith.constant 3 : index
    %231 = memref.load %arg1[%c1_119, %c3_120] : memref<2x8xi32, #tpu.memory_space<smem>>
    %232 = arith.index_cast %231 : i32 to index
    %c0_121 = arith.constant 0 : index
    %233 = vector.load %arg7[%232, %c0_121] : memref<64x128xf32, #tpu.memory_space<vmem>>, vector<1x128xf32>
    %234 = vector.shape_cast %233 : vector<1x128xf32> to vector<128xf32>
    %c1_122 = arith.constant 1 : index
    %c3_123 = arith.constant 3 : index
    %235 = memref.load %arg2[%c1_122, %c3_123] : memref<2x8xi32, #tpu.memory_space<smem>>
    %236 = arith.index_cast %235 : i32 to index
    %c0_124 = arith.constant 0 : index
    %237 = vector.load %arg8[%236, %c0_124] : memref<8x128xf32, #tpu.memory_space<vmem>>, vector<1x128xf32>
    %238 = vector.shape_cast %237 : vector<1x128xf32> to vector<128xf32>
    %239 = arith.addf %234, %238 : vector<128xf32>
    %c3_125 = arith.constant 3 : index
    %c0_126 = arith.constant 0 : index
    %240 = vector.load %arg9[%c3_125, %c0_126] : memref<8x128xf32, #tpu.memory_space<vmem>>, vector<1x128xf32>
    %241 = vector.shape_cast %240 : vector<1x128xf32> to vector<128xf32>
    %242 = arith.addf %239, %241 : vector<128xf32>
    %243 = arith.mulf %164, %181 : f32
    %244 = vector.broadcast %243 : f32 to vector<128xf32>
    %245 = arith.mulf %244, %242 : vector<128xf32>
    %246 = arith.addf %230, %245 : vector<128xf32>
    %c1_127 = arith.constant 1 : index
    %c4_128 = arith.constant 4 : index
    %247 = memref.load %arg1[%c1_127, %c4_128] : memref<2x8xi32, #tpu.memory_space<smem>>
    %248 = arith.index_cast %247 : i32 to index
    %c0_129 = arith.constant 0 : index
    %249 = vector.load %arg7[%248, %c0_129] : memref<64x128xf32, #tpu.memory_space<vmem>>, vector<1x128xf32>
    %250 = vector.shape_cast %249 : vector<1x128xf32> to vector<128xf32>
    %c1_130 = arith.constant 1 : index
    %c4_131 = arith.constant 4 : index
    %251 = memref.load %arg2[%c1_130, %c4_131] : memref<2x8xi32, #tpu.memory_space<smem>>
    %252 = arith.index_cast %251 : i32 to index
    %c0_132 = arith.constant 0 : index
    %253 = vector.load %arg8[%252, %c0_132] : memref<8x128xf32, #tpu.memory_space<vmem>>, vector<1x128xf32>
    %254 = vector.shape_cast %253 : vector<1x128xf32> to vector<128xf32>
    %255 = arith.addf %250, %254 : vector<128xf32>
    %c4_133 = arith.constant 4 : index
    %c0_134 = arith.constant 0 : index
    %256 = vector.load %arg9[%c4_133, %c0_134] : memref<8x128xf32, #tpu.memory_space<vmem>>, vector<1x128xf32>
    %257 = vector.shape_cast %256 : vector<1x128xf32> to vector<128xf32>
    %258 = arith.addf %255, %257 : vector<128xf32>
    %259 = arith.mulf %166, %181 : f32
    %260 = vector.broadcast %259 : f32 to vector<128xf32>
    %261 = arith.mulf %260, %258 : vector<128xf32>
    %262 = arith.addf %246, %261 : vector<128xf32>
    %c1_135 = arith.constant 1 : index
    %c5_136 = arith.constant 5 : index
    %263 = memref.load %arg1[%c1_135, %c5_136] : memref<2x8xi32, #tpu.memory_space<smem>>
    %264 = arith.index_cast %263 : i32 to index
    %c0_137 = arith.constant 0 : index
    %265 = vector.load %arg7[%264, %c0_137] : memref<64x128xf32, #tpu.memory_space<vmem>>, vector<1x128xf32>
    %266 = vector.shape_cast %265 : vector<1x128xf32> to vector<128xf32>
    %c1_138 = arith.constant 1 : index
    %c5_139 = arith.constant 5 : index
    %267 = memref.load %arg2[%c1_138, %c5_139] : memref<2x8xi32, #tpu.memory_space<smem>>
    %268 = arith.index_cast %267 : i32 to index
    %c0_140 = arith.constant 0 : index
    %269 = vector.load %arg8[%268, %c0_140] : memref<8x128xf32, #tpu.memory_space<vmem>>, vector<1x128xf32>
    %270 = vector.shape_cast %269 : vector<1x128xf32> to vector<128xf32>
    %271 = arith.addf %266, %270 : vector<128xf32>
    %c5_141 = arith.constant 5 : index
    %c0_142 = arith.constant 0 : index
    %272 = vector.load %arg9[%c5_141, %c0_142] : memref<8x128xf32, #tpu.memory_space<vmem>>, vector<1x128xf32>
    %273 = vector.shape_cast %272 : vector<1x128xf32> to vector<128xf32>
    %274 = arith.addf %271, %273 : vector<128xf32>
    %275 = arith.mulf %168, %181 : f32
    %276 = vector.broadcast %275 : f32 to vector<128xf32>
    %277 = arith.mulf %276, %274 : vector<128xf32>
    %278 = arith.addf %262, %277 : vector<128xf32>
    %c1_143 = arith.constant 1 : index
    %c6_144 = arith.constant 6 : index
    %279 = memref.load %arg1[%c1_143, %c6_144] : memref<2x8xi32, #tpu.memory_space<smem>>
    %280 = arith.index_cast %279 : i32 to index
    %c0_145 = arith.constant 0 : index
    %281 = vector.load %arg7[%280, %c0_145] : memref<64x128xf32, #tpu.memory_space<vmem>>, vector<1x128xf32>
    %282 = vector.shape_cast %281 : vector<1x128xf32> to vector<128xf32>
    %c1_146 = arith.constant 1 : index
    %c6_147 = arith.constant 6 : index
    %283 = memref.load %arg2[%c1_146, %c6_147] : memref<2x8xi32, #tpu.memory_space<smem>>
    %284 = arith.index_cast %283 : i32 to index
    %c0_148 = arith.constant 0 : index
    %285 = vector.load %arg8[%284, %c0_148] : memref<8x128xf32, #tpu.memory_space<vmem>>, vector<1x128xf32>
    %286 = vector.shape_cast %285 : vector<1x128xf32> to vector<128xf32>
    %287 = arith.addf %282, %286 : vector<128xf32>
    %c6_149 = arith.constant 6 : index
    %c0_150 = arith.constant 0 : index
    %288 = vector.load %arg9[%c6_149, %c0_150] : memref<8x128xf32, #tpu.memory_space<vmem>>, vector<1x128xf32>
    %289 = vector.shape_cast %288 : vector<1x128xf32> to vector<128xf32>
    %290 = arith.addf %287, %289 : vector<128xf32>
    %291 = arith.mulf %170, %181 : f32
    %292 = vector.broadcast %291 : f32 to vector<128xf32>
    %293 = arith.mulf %292, %290 : vector<128xf32>
    %294 = arith.addf %278, %293 : vector<128xf32>
    %c1_151 = arith.constant 1 : index
    %c7_152 = arith.constant 7 : index
    %295 = memref.load %arg1[%c1_151, %c7_152] : memref<2x8xi32, #tpu.memory_space<smem>>
    %296 = arith.index_cast %295 : i32 to index
    %c0_153 = arith.constant 0 : index
    %297 = vector.load %arg7[%296, %c0_153] : memref<64x128xf32, #tpu.memory_space<vmem>>, vector<1x128xf32>
    %298 = vector.shape_cast %297 : vector<1x128xf32> to vector<128xf32>
    %c1_154 = arith.constant 1 : index
    %c7_155 = arith.constant 7 : index
    %299 = memref.load %arg2[%c1_154, %c7_155] : memref<2x8xi32, #tpu.memory_space<smem>>
    %300 = arith.index_cast %299 : i32 to index
    %c0_156 = arith.constant 0 : index
    %301 = vector.load %arg8[%300, %c0_156] : memref<8x128xf32, #tpu.memory_space<vmem>>, vector<1x128xf32>
    %302 = vector.shape_cast %301 : vector<1x128xf32> to vector<128xf32>
    %303 = arith.addf %298, %302 : vector<128xf32>
    %c7_157 = arith.constant 7 : index
    %c0_158 = arith.constant 0 : index
    %304 = vector.load %arg9[%c7_157, %c0_158] : memref<8x128xf32, #tpu.memory_space<vmem>>, vector<1x128xf32>
    %305 = vector.shape_cast %304 : vector<1x128xf32> to vector<128xf32>
    %306 = arith.addf %303, %305 : vector<128xf32>
    %307 = arith.mulf %172, %181 : f32
    %308 = vector.broadcast %307 : f32 to vector<128xf32>
    %309 = arith.mulf %308, %306 : vector<128xf32>
    %310 = arith.addf %294, %309 : vector<128xf32>
    %c1_159 = arith.constant 1 : index
    %c0_160 = arith.constant 0 : index
    %311 = vector.load %arg13[%c1_159, %c0_160] : memref<8x128xf32, #tpu.memory_space<vmem>>, vector<1x128xf32>
    %312 = vector.shape_cast %311 : vector<1x128xf32> to vector<128xf32>
    %313 = vector.shape_cast %310 : vector<128xf32> to vector<1x128xf32>
    tpu.vector_store %arg13[%c1_159, %c0_160], %313 {strides = array<i32>} : memref<8x128xf32, #tpu.memory_space<vmem>>, vector<1x128xf32>,
    %c0_161 = arith.constant 0 : index
    %c0_162 = arith.constant 0 : index
    %314 = memref.load %arg6[%c0_161, %c0_162] : memref<6x8xi32, #tpu.memory_space<smem>>
    %315 = arith.sitofp %314 : i32 to f32
    %c0_163 = arith.constant 0 : index
    %c1_164 = arith.constant 1 : index
    %316 = memref.load %arg6[%c0_163, %c1_164] : memref<6x8xi32, #tpu.memory_space<smem>>
    %317 = arith.sitofp %316 : i32 to f32
    %c0_165 = arith.constant 0 : index
    %c2_166 = arith.constant 2 : index
    %318 = memref.load %arg6[%c0_165, %c2_166] : memref<6x8xi32, #tpu.memory_space<smem>>
    %319 = arith.sitofp %318 : i32 to f32
    %c0_167 = arith.constant 0 : index
    %c3_168 = arith.constant 3 : index
    %320 = memref.load %arg6[%c0_167, %c3_168] : memref<6x8xi32, #tpu.memory_space<smem>>
    %321 = arith.sitofp %320 : i32 to f32
    %c0_169 = arith.constant 0 : index
    %c4_170 = arith.constant 4 : index
    %322 = memref.load %arg6[%c0_169, %c4_170] : memref<6x8xi32, #tpu.memory_space<smem>>
    %323 = arith.sitofp %322 : i32 to f32
    %c0_171 = arith.constant 0 : index
    %c5_172 = arith.constant 5 : index
    %324 = memref.load %arg6[%c0_171, %c5_172] : memref<6x8xi32, #tpu.memory_space<smem>>
    %325 = arith.sitofp %324 : i32 to f32
    %c0_173 = arith.constant 0 : index
    %c6_174 = arith.constant 6 : index
    %326 = memref.load %arg6[%c0_173, %c6_174] : memref<6x8xi32, #tpu.memory_space<smem>>
    %327 = arith.sitofp %326 : i32 to f32
    %c0_175 = arith.constant 0 : index
    %c7_176 = arith.constant 7 : index
    %328 = memref.load %arg6[%c0_175, %c7_176] : memref<6x8xi32, #tpu.memory_space<smem>>
    %329 = arith.sitofp %328 : i32 to f32
    %330 = arith.addf %315, %317 : f32
    %331 = arith.addf %330, %319 : f32
    %332 = arith.addf %331, %321 : f32
    %333 = arith.addf %332, %323 : f32
    %334 = arith.addf %333, %325 : f32
    %335 = arith.addf %334, %327 : f32
    %336 = arith.addf %335, %329 : f32
    %cst_177 = arith.constant 1.000000e+00 : f32
    %337 = arith.maximumf %336, %cst_177 : f32
    %cst_178 = arith.constant 1.000000e+00 : f32
    %338 = arith.divf %cst_178, %337 : f32
    %cst_179 = arith.constant 0.000000e+00 : f32
    %339 = vector.broadcast %cst_179 : f32 to vector<128xf32>
    %c0_180 = arith.constant 0 : index
    %c0_181 = arith.constant 0 : index
    %340 = memref.load %arg4[%c0_180, %c0_181] : memref<6x8xi32, #tpu.memory_space<smem>>
    %341 = arith.index_cast %340 : i32 to index
    %c0_182 = arith.constant 0 : index
    %342 = vector.load %arg7[%341, %c0_182] : memref<64x128xf32, #tpu.memory_space<vmem>>, vector<1x128xf32>
    %343 = vector.shape_cast %342 : vector<1x128xf32> to vector<128xf32>
    %c0_183 = arith.constant 0 : index
    %c0_184 = arith.constant 0 : index
    %344 = memref.load %arg5[%c0_183, %c0_184] : memref<6x8xi32, #tpu.memory_space<smem>>
    %345 = arith.index_cast %344 : i32 to index
    %c0_185 = arith.constant 0 : index
    %346 = vector.load %arg8[%345, %c0_185] : memref<8x128xf32, #tpu.memory_space<vmem>>, vector<1x128xf32>
    %347 = vector.shape_cast %346 : vector<1x128xf32> to vector<128xf32>
    %348 = arith.addf %343, %347 : vector<128xf32>
    %c0_186 = arith.constant 0 : index
    %c0_187 = arith.constant 0 : index
    %349 = vector.load %arg9[%c0_186, %c0_187] : memref<8x128xf32, #tpu.memory_space<vmem>>, vector<1x128xf32>
    %350 = vector.shape_cast %349 : vector<1x128xf32> to vector<128xf32>
    %351 = arith.addf %348, %350 : vector<128xf32>
    %352 = arith.mulf %315, %338 : f32
    %353 = vector.broadcast %352 : f32 to vector<128xf32>
    %354 = arith.mulf %353, %351 : vector<128xf32>
    %355 = arith.addf %339, %354 : vector<128xf32>
    %c0_188 = arith.constant 0 : index
    %c1_189 = arith.constant 1 : index
    %356 = memref.load %arg4[%c0_188, %c1_189] : memref<6x8xi32, #tpu.memory_space<smem>>
    %357 = arith.index_cast %356 : i32 to index
    %c0_190 = arith.constant 0 : index
    %358 = vector.load %arg7[%357, %c0_190] : memref<64x128xf32, #tpu.memory_space<vmem>>, vector<1x128xf32>
    %359 = vector.shape_cast %358 : vector<1x128xf32> to vector<128xf32>
    %c0_191 = arith.constant 0 : index
    %c1_192 = arith.constant 1 : index
    %360 = memref.load %arg5[%c0_191, %c1_192] : memref<6x8xi32, #tpu.memory_space<smem>>
    %361 = arith.index_cast %360 : i32 to index
    %c0_193 = arith.constant 0 : index
    %362 = vector.load %arg8[%361, %c0_193] : memref<8x128xf32, #tpu.memory_space<vmem>>, vector<1x128xf32>
    %363 = vector.shape_cast %362 : vector<1x128xf32> to vector<128xf32>
    %364 = arith.addf %359, %363 : vector<128xf32>
    %c1_194 = arith.constant 1 : index
    %c0_195 = arith.constant 0 : index
    %365 = vector.load %arg9[%c1_194, %c0_195] : memref<8x128xf32, #tpu.memory_space<vmem>>, vector<1x128xf32>
    %366 = vector.shape_cast %365 : vector<1x128xf32> to vector<128xf32>
    %367 = arith.addf %364, %366 : vector<128xf32>
    %368 = arith.mulf %317, %338 : f32
    %369 = vector.broadcast %368 : f32 to vector<128xf32>
    %370 = arith.mulf %369, %367 : vector<128xf32>
    %371 = arith.addf %355, %370 : vector<128xf32>
    %c0_196 = arith.constant 0 : index
    %c2_197 = arith.constant 2 : index
    %372 = memref.load %arg4[%c0_196, %c2_197] : memref<6x8xi32, #tpu.memory_space<smem>>
    %373 = arith.index_cast %372 : i32 to index
    %c0_198 = arith.constant 0 : index
    %374 = vector.load %arg7[%373, %c0_198] : memref<64x128xf32, #tpu.memory_space<vmem>>, vector<1x128xf32>
    %375 = vector.shape_cast %374 : vector<1x128xf32> to vector<128xf32>
    %c0_199 = arith.constant 0 : index
    %c2_200 = arith.constant 2 : index
    %376 = memref.load %arg5[%c0_199, %c2_200] : memref<6x8xi32, #tpu.memory_space<smem>>
    %377 = arith.index_cast %376 : i32 to index
    %c0_201 = arith.constant 0 : index
    %378 = vector.load %arg8[%377, %c0_201] : memref<8x128xf32, #tpu.memory_space<vmem>>, vector<1x128xf32>
    %379 = vector.shape_cast %378 : vector<1x128xf32> to vector<128xf32>
    %380 = arith.addf %375, %379 : vector<128xf32>
    %c2_202 = arith.constant 2 : index
    %c0_203 = arith.constant 0 : index
    %381 = vector.load %arg9[%c2_202, %c0_203] : memref<8x128xf32, #tpu.memory_space<vmem>>, vector<1x128xf32>
    %382 = vector.shape_cast %381 : vector<1x128xf32> to vector<128xf32>
    %383 = arith.addf %380, %382 : vector<128xf32>
    %384 = arith.mulf %319, %338 : f32
    %385 = vector.broadcast %384 : f32 to vector<128xf32>
    %386 = arith.mulf %385, %383 : vector<128xf32>
    %387 = arith.addf %371, %386 : vector<128xf32>
    %c0_204 = arith.constant 0 : index
    %c3_205 = arith.constant 3 : index
    %388 = memref.load %arg4[%c0_204, %c3_205] : memref<6x8xi32, #tpu.memory_space<smem>>
    %389 = arith.index_cast %388 : i32 to index
    %c0_206 = arith.constant 0 : index
    %390 = vector.load %arg7[%389, %c0_206] : memref<64x128xf32, #tpu.memory_space<vmem>>, vector<1x128xf32>
    %391 = vector.shape_cast %390 : vector<1x128xf32> to vector<128xf32>
    %c0_207 = arith.constant 0 : index
    %c3_208 = arith.constant 3 : index
    %392 = memref.load %arg5[%c0_207, %c3_208] : memref<6x8xi32, #tpu.memory_space<smem>>
    %393 = arith.index_cast %392 : i32 to index
    %c0_209 = arith.constant 0 : index
    %394 = vector.load %arg8[%393, %c0_209] : memref<8x128xf32, #tpu.memory_space<vmem>>, vector<1x128xf32>
    %395 = vector.shape_cast %394 : vector<1x128xf32> to vector<128xf32>
    %396 = arith.addf %391, %395 : vector<128xf32>
    %c3_210 = arith.constant 3 : index
    %c0_211 = arith.constant 0 : index
    %397 = vector.load %arg9[%c3_210, %c0_211] : memref<8x128xf32, #tpu.memory_space<vmem>>, vector<1x128xf32>
    %398 = vector.shape_cast %397 : vector<1x128xf32> to vector<128xf32>
    %399 = arith.addf %396, %398 : vector<128xf32>
    %400 = arith.mulf %321, %338 : f32
    %401 = vector.broadcast %400 : f32 to vector<128xf32>
    %402 = arith.mulf %401, %399 : vector<128xf32>
    %403 = arith.addf %387, %402 : vector<128xf32>
    %c0_212 = arith.constant 0 : index
    %c4_213 = arith.constant 4 : index
    %404 = memref.load %arg4[%c0_212, %c4_213] : memref<6x8xi32, #tpu.memory_space<smem>>
    %405 = arith.index_cast %404 : i32 to index
    %c0_214 = arith.constant 0 : index
    %406 = vector.load %arg7[%405, %c0_214] : memref<64x128xf32, #tpu.memory_space<vmem>>, vector<1x128xf32>
    %407 = vector.shape_cast %406 : vector<1x128xf32> to vector<128xf32>
    %c0_215 = arith.constant 0 : index
    %c4_216 = arith.constant 4 : index
    %408 = memref.load %arg5[%c0_215, %c4_216] : memref<6x8xi32, #tpu.memory_space<smem>>
    %409 = arith.index_cast %408 : i32 to index
    %c0_217 = arith.constant 0 : index
    %410 = vector.load %arg8[%409, %c0_217] : memref<8x128xf32, #tpu.memory_space<vmem>>, vector<1x128xf32>
    %411 = vector.shape_cast %410 : vector<1x128xf32> to vector<128xf32>
    %412 = arith.addf %407, %411 : vector<128xf32>
    %c4_218 = arith.constant 4 : index
    %c0_219 = arith.constant 0 : index
    %413 = vector.load %arg9[%c4_218, %c0_219] : memref<8x128xf32, #tpu.memory_space<vmem>>, vector<1x128xf32>
    %414 = vector.shape_cast %413 : vector<1x128xf32> to vector<128xf32>
    %415 = arith.addf %412, %414 : vector<128xf32>
    %416 = arith.mulf %323, %338 : f32
    %417 = vector.broadcast %416 : f32 to vector<128xf32>
    %418 = arith.mulf %417, %415 : vector<128xf32>
    %419 = arith.addf %403, %418 : vector<128xf32>
    %c0_220 = arith.constant 0 : index
    %c5_221 = arith.constant 5 : index
    %420 = memref.load %arg4[%c0_220, %c5_221] : memref<6x8xi32, #tpu.memory_space<smem>>
    %421 = arith.index_cast %420 : i32 to index
    %c0_222 = arith.constant 0 : index
    %422 = vector.load %arg7[%421, %c0_222] : memref<64x128xf32, #tpu.memory_space<vmem>>, vector<1x128xf32>
    %423 = vector.shape_cast %422 : vector<1x128xf32> to vector<128xf32>
    %c0_223 = arith.constant 0 : index
    %c5_224 = arith.constant 5 : index
    %424 = memref.load %arg5[%c0_223, %c5_224] : memref<6x8xi32, #tpu.memory_space<smem>>
    %425 = arith.index_cast %424 : i32 to index
    %c0_225 = arith.constant 0 : index
    %426 = vector.load %arg8[%425, %c0_225] : memref<8x128xf32, #tpu.memory_space<vmem>>, vector<1x128xf32>
    %427 = vector.shape_cast %426 : vector<1x128xf32> to vector<128xf32>
    %428 = arith.addf %423, %427 : vector<128xf32>
    %c5_226 = arith.constant 5 : index
    %c0_227 = arith.constant 0 : index
    %429 = vector.load %arg9[%c5_226, %c0_227] : memref<8x128xf32, #tpu.memory_space<vmem>>, vector<1x128xf32>
    %430 = vector.shape_cast %429 : vector<1x128xf32> to vector<128xf32>
    %431 = arith.addf %428, %430 : vector<128xf32>
    %432 = arith.mulf %325, %338 : f32
    %433 = vector.broadcast %432 : f32 to vector<128xf32>
    %434 = arith.mulf %433, %431 : vector<128xf32>
    %435 = arith.addf %419, %434 : vector<128xf32>
    %c0_228 = arith.constant 0 : index
    %c6_229 = arith.constant 6 : index
    %436 = memref.load %arg4[%c0_228, %c6_229] : memref<6x8xi32, #tpu.memory_space<smem>>
    %437 = arith.index_cast %436 : i32 to index
    %c0_230 = arith.constant 0 : index
    %438 = vector.load %arg7[%437, %c0_230] : memref<64x128xf32, #tpu.memory_space<vmem>>, vector<1x128xf32>
    %439 = vector.shape_cast %438 : vector<1x128xf32> to vector<128xf32>
    %c0_231 = arith.constant 0 : index
    %c6_232 = arith.constant 6 : index
    %440 = memref.load %arg5[%c0_231, %c6_232] : memref<6x8xi32, #tpu.memory_space<smem>>
    %441 = arith.index_cast %440 : i32 to index
    %c0_233 = arith.constant 0 : index
    %442 = vector.load %arg8[%441, %c0_233] : memref<8x128xf32, #tpu.memory_space<vmem>>, vector<1x128xf32>
    %443 = vector.shape_cast %442 : vector<1x128xf32> to vector<128xf32>
    %444 = arith.addf %439, %443 : vector<128xf32>
    %c6_234 = arith.constant 6 : index
    %c0_235 = arith.constant 0 : index
    %445 = vector.load %arg9[%c6_234, %c0_235] : memref<8x128xf32, #tpu.memory_space<vmem>>, vector<1x128xf32>
    %446 = vector.shape_cast %445 : vector<1x128xf32> to vector<128xf32>
    %447 = arith.addf %444, %446 : vector<128xf32>
    %448 = arith.mulf %327, %338 : f32
    %449 = vector.broadcast %448 : f32 to vector<128xf32>
    %450 = arith.mulf %449, %447 : vector<128xf32>
    %451 = arith.addf %435, %450 : vector<128xf32>
    %c0_236 = arith.constant 0 : index
    %c7_237 = arith.constant 7 : index
    %452 = memref.load %arg4[%c0_236, %c7_237] : memref<6x8xi32, #tpu.memory_space<smem>>
    %453 = arith.index_cast %452 : i32 to index
    %c0_238 = arith.constant 0 : index
    %454 = vector.load %arg7[%453, %c0_238] : memref<64x128xf32, #tpu.memory_space<vmem>>, vector<1x128xf32>
    %455 = vector.shape_cast %454 : vector<1x128xf32> to vector<128xf32>
    %c0_239 = arith.constant 0 : index
    %c7_240 = arith.constant 7 : index
    %456 = memref.load %arg5[%c0_239, %c7_240] : memref<6x8xi32, #tpu.memory_space<smem>>
    %457 = arith.index_cast %456 : i32 to index
    %c0_241 = arith.constant 0 : index
    %458 = vector.load %arg8[%457, %c0_241] : memref<8x128xf32, #tpu.memory_space<vmem>>, vector<1x128xf32>
    %459 = vector.shape_cast %458 : vector<1x128xf32> to vector<128xf32>
    %460 = arith.addf %455, %459 : vector<128xf32>
    %c7_242 = arith.constant 7 : index
    %c0_243 = arith.constant 0 : index
    %461 = vector.load %arg9[%c7_242, %c0_243] : memref<8x128xf32, #tpu.memory_space<vmem>>, vector<1x128xf32>
    %462 = vector.shape_cast %461 : vector<1x128xf32> to vector<128xf32>
    %463 = arith.addf %460, %462 : vector<128xf32>
    %464 = arith.mulf %329, %338 : f32
    %465 = vector.broadcast %464 : f32 to vector<128xf32>
    %466 = arith.mulf %465, %463 : vector<128xf32>
    %467 = arith.addf %451, %466 : vector<128xf32>
    %c2_244 = arith.constant 2 : index
    %c0_245 = arith.constant 0 : index
    %468 = vector.load %arg13[%c2_244, %c0_245] : memref<8x128xf32, #tpu.memory_space<vmem>>, vector<1x128xf32>
    %469 = vector.shape_cast %468 : vector<1x128xf32> to vector<128xf32>
    %470 = vector.shape_cast %467 : vector<128xf32> to vector<1x128xf32>
    tpu.vector_store %arg13[%c2_244, %c0_245], %470 {strides = array<i32>} : memref<8x128xf32, #tpu.memory_space<vmem>>, vector<1x128xf32>,
    %c1_246 = arith.constant 1 : index
    %c0_247 = arith.constant 0 : index
    %471 = memref.load %arg6[%c1_246, %c0_247] : memref<6x8xi32, #tpu.memory_space<smem>>
    %472 = arith.sitofp %471 : i32 to f32
    %c1_248 = arith.constant 1 : index
    %c1_249 = arith.constant 1 : index
    %473 = memref.load %arg6[%c1_248, %c1_249] : memref<6x8xi32, #tpu.memory_space<smem>>
    %474 = arith.sitofp %473 : i32 to f32
    %c1_250 = arith.constant 1 : index
    %c2_251 = arith.constant 2 : index
    %475 = memref.load %arg6[%c1_250, %c2_251] : memref<6x8xi32, #tpu.memory_space<smem>>
    %476 = arith.sitofp %475 : i32 to f32
    %c1_252 = arith.constant 1 : index
    %c3_253 = arith.constant 3 : index
    %477 = memref.load %arg6[%c1_252, %c3_253] : memref<6x8xi32, #tpu.memory_space<smem>>
    %478 = arith.sitofp %477 : i32 to f32
    %c1_254 = arith.constant 1 : index
    %c4_255 = arith.constant 4 : index
    %479 = memref.load %arg6[%c1_254, %c4_255] : memref<6x8xi32, #tpu.memory_space<smem>>
    %480 = arith.sitofp %479 : i32 to f32
    %c1_256 = arith.constant 1 : index
    %c5_257 = arith.constant 5 : index
    %481 = memref.load %arg6[%c1_256, %c5_257] : memref<6x8xi32, #tpu.memory_space<smem>>
    %482 = arith.sitofp %481 : i32 to f32
    %c1_258 = arith.constant 1 : index
    %c6_259 = arith.constant 6 : index
    %483 = memref.load %arg6[%c1_258, %c6_259] : memref<6x8xi32, #tpu.memory_space<smem>>
    %484 = arith.sitofp %483 : i32 to f32
    %c1_260 = arith.constant 1 : index
    %c7_261 = arith.constant 7 : index
    %485 = memref.load %arg6[%c1_260, %c7_261] : memref<6x8xi32, #tpu.memory_space<smem>>
    %486 = arith.sitofp %485 : i32 to f32
    %487 = arith.addf %472, %474 : f32
    %488 = arith.addf %487, %476 : f32
    %489 = arith.addf %488, %478 : f32
    %490 = arith.addf %489, %480 : f32
    %491 = arith.addf %490, %482 : f32
    %492 = arith.addf %491, %484 : f32
    %493 = arith.addf %492, %486 : f32
    %cst_262 = arith.constant 1.000000e+00 : f32
    %494 = arith.maximumf %493, %cst_262 : f32
    %cst_263 = arith.constant 1.000000e+00 : f32
    %495 = arith.divf %cst_263, %494 : f32
    %cst_264 = arith.constant 0.000000e+00 : f32
    %496 = vector.broadcast %cst_264 : f32 to vector<128xf32>
    %c1_265 = arith.constant 1 : index
    %c0_266 = arith.constant 0 : index
    %497 = memref.load %arg4[%c1_265, %c0_266] : memref<6x8xi32, #tpu.memory_space<smem>>
    %498 = arith.index_cast %497 : i32 to index
    %c0_267 = arith.constant 0 : index
    %499 = vector.load %arg7[%498, %c0_267] : memref<64x128xf32, #tpu.memory_space<vmem>>, vector<1x128xf32>
    %500 = vector.shape_cast %499 : vector<1x128xf32> to vector<128xf32>
    %c1_268 = arith.constant 1 : index
    %c0_269 = arith.constant 0 : index
    %501 = memref.load %arg5[%c1_268, %c0_269] : memref<6x8xi32, #tpu.memory_space<smem>>
    %502 = arith.index_cast %501 : i32 to index
    %c0_270 = arith.constant 0 : index
    %503 = vector.load %arg8[%502, %c0_270] : memref<8x128xf32, #tpu.memory_space<vmem>>, vector<1x128xf32>
    %504 = vector.shape_cast %503 : vector<1x128xf32> to vector<128xf32>
    %505 = arith.addf %500, %504 : vector<128xf32>
    %c0_271 = arith.constant 0 : index
    %c0_272 = arith.constant 0 : index
    %506 = vector.load %arg9[%c0_271, %c0_272] : memref<8x128xf32, #tpu.memory_space<vmem>>, vector<1x128xf32>
    %507 = vector.shape_cast %506 : vector<1x128xf32> to vector<128xf32>
    %508 = arith.addf %505, %507 : vector<128xf32>
    %509 = arith.mulf %472, %495 : f32
    %510 = vector.broadcast %509 : f32 to vector<128xf32>
    %511 = arith.mulf %510, %508 : vector<128xf32>
    %512 = arith.addf %496, %511 : vector<128xf32>
    %c1_273 = arith.constant 1 : index
    %c1_274 = arith.constant 1 : index
    %513 = memref.load %arg4[%c1_273, %c1_274] : memref<6x8xi32, #tpu.memory_space<smem>>
    %514 = arith.index_cast %513 : i32 to index
    %c0_275 = arith.constant 0 : index
    %515 = vector.load %arg7[%514, %c0_275] : memref<64x128xf32, #tpu.memory_space<vmem>>, vector<1x128xf32>
    %516 = vector.shape_cast %515 : vector<1x128xf32> to vector<128xf32>
    %c1_276 = arith.constant 1 : index
    %c1_277 = arith.constant 1 : index
    %517 = memref.load %arg5[%c1_276, %c1_277] : memref<6x8xi32, #tpu.memory_space<smem>>
    %518 = arith.index_cast %517 : i32 to index
    %c0_278 = arith.constant 0 : index
    %519 = vector.load %arg8[%518, %c0_278] : memref<8x128xf32, #tpu.memory_space<vmem>>, vector<1x128xf32>
    %520 = vector.shape_cast %519 : vector<1x128xf32> to vector<128xf32>
    %521 = arith.addf %516, %520 : vector<128xf32>
    %c1_279 = arith.constant 1 : index
    %c0_280 = arith.constant 0 : index
    %522 = vector.load %arg9[%c1_279, %c0_280] : memref<8x128xf32, #tpu.memory_space<vmem>>, vector<1x128xf32>
    %523 = vector.shape_cast %522 : vector<1x128xf32> to vector<128xf32>
    %524 = arith.addf %521, %523 : vector<128xf32>
    %525 = arith.mulf %474, %495 : f32
    %526 = vector.broadcast %525 : f32 to vector<128xf32>
    %527 = arith.mulf %526, %524 : vector<128xf32>
    %528 = arith.addf %512, %527 : vector<128xf32>
    %c1_281 = arith.constant 1 : index
    %c2_282 = arith.constant 2 : index
    %529 = memref.load %arg4[%c1_281, %c2_282] : memref<6x8xi32, #tpu.memory_space<smem>>
    %530 = arith.index_cast %529 : i32 to index
    %c0_283 = arith.constant 0 : index
    %531 = vector.load %arg7[%530, %c0_283] : memref<64x128xf32, #tpu.memory_space<vmem>>, vector<1x128xf32>
    %532 = vector.shape_cast %531 : vector<1x128xf32> to vector<128xf32>
    %c1_284 = arith.constant 1 : index
    %c2_285 = arith.constant 2 : index
    %533 = memref.load %arg5[%c1_284, %c2_285] : memref<6x8xi32, #tpu.memory_space<smem>>
    %534 = arith.index_cast %533 : i32 to index
    %c0_286 = arith.constant 0 : index
    %535 = vector.load %arg8[%534, %c0_286] : memref<8x128xf32, #tpu.memory_space<vmem>>, vector<1x128xf32>
    %536 = vector.shape_cast %535 : vector<1x128xf32> to vector<128xf32>
    %537 = arith.addf %532, %536 : vector<128xf32>
    %c2_287 = arith.constant 2 : index
    %c0_288 = arith.constant 0 : index
    %538 = vector.load %arg9[%c2_287, %c0_288] : memref<8x128xf32, #tpu.memory_space<vmem>>, vector<1x128xf32>
    %539 = vector.shape_cast %538 : vector<1x128xf32> to vector<128xf32>
    %540 = arith.addf %537, %539 : vector<128xf32>
    %541 = arith.mulf %476, %495 : f32
    %542 = vector.broadcast %541 : f32 to vector<128xf32>
    %543 = arith.mulf %542, %540 : vector<128xf32>
    %544 = arith.addf %528, %543 : vector<128xf32>
    %c1_289 = arith.constant 1 : index
    %c3_290 = arith.constant 3 : index
    %545 = memref.load %arg4[%c1_289, %c3_290] : memref<6x8xi32, #tpu.memory_space<smem>>
    %546 = arith.index_cast %545 : i32 to index
    %c0_291 = arith.constant 0 : index
    %547 = vector.load %arg7[%546, %c0_291] : memref<64x128xf32, #tpu.memory_space<vmem>>, vector<1x128xf32>
    %548 = vector.shape_cast %547 : vector<1x128xf32> to vector<128xf32>
    %c1_292 = arith.constant 1 : index
    %c3_293 = arith.constant 3 : index
    %549 = memref.load %arg5[%c1_292, %c3_293] : memref<6x8xi32, #tpu.memory_space<smem>>
    %550 = arith.index_cast %549 : i32 to index
    %c0_294 = arith.constant 0 : index
    %551 = vector.load %arg8[%550, %c0_294] : memref<8x128xf32, #tpu.memory_space<vmem>>, vector<1x128xf32>
    %552 = vector.shape_cast %551 : vector<1x128xf32> to vector<128xf32>
    %553 = arith.addf %548, %552 : vector<128xf32>
    %c3_295 = arith.constant 3 : index
    %c0_296 = arith.constant 0 : index
    %554 = vector.load %arg9[%c3_295, %c0_296] : memref<8x128xf32, #tpu.memory_space<vmem>>, vector<1x128xf32>
    %555 = vector.shape_cast %554 : vector<1x128xf32> to vector<128xf32>
    %556 = arith.addf %553, %555 : vector<128xf32>
    %557 = arith.mulf %478, %495 : f32
    %558 = vector.broadcast %557 : f32 to vector<128xf32>
    %559 = arith.mulf %558, %556 : vector<128xf32>
    %560 = arith.addf %544, %559 : vector<128xf32>
    %c1_297 = arith.constant 1 : index
    %c4_298 = arith.constant 4 : index
    %561 = memref.load %arg4[%c1_297, %c4_298] : memref<6x8xi32, #tpu.memory_space<smem>>
    %562 = arith.index_cast %561 : i32 to index
    %c0_299 = arith.constant 0 : index
    %563 = vector.load %arg7[%562, %c0_299] : memref<64x128xf32, #tpu.memory_space<vmem>>, vector<1x128xf32>
    %564 = vector.shape_cast %563 : vector<1x128xf32> to vector<128xf32>
    %c1_300 = arith.constant 1 : index
    %c4_301 = arith.constant 4 : index
    %565 = memref.load %arg5[%c1_300, %c4_301] : memref<6x8xi32, #tpu.memory_space<smem>>
    %566 = arith.index_cast %565 : i32 to index
    %c0_302 = arith.constant 0 : index
    %567 = vector.load %arg8[%566, %c0_302] : memref<8x128xf32, #tpu.memory_space<vmem>>, vector<1x128xf32>
    %568 = vector.shape_cast %567 : vector<1x128xf32> to vector<128xf32>
    %569 = arith.addf %564, %568 : vector<128xf32>
    %c4_303 = arith.constant 4 : index
    %c0_304 = arith.constant 0 : index
    %570 = vector.load %arg9[%c4_303, %c0_304] : memref<8x128xf32, #tpu.memory_space<vmem>>, vector<1x128xf32>
    %571 = vector.shape_cast %570 : vector<1x128xf32> to vector<128xf32>
    %572 = arith.addf %569, %571 : vector<128xf32>
    %573 = arith.mulf %480, %495 : f32
    %574 = vector.broadcast %573 : f32 to vector<128xf32>
    %575 = arith.mulf %574, %572 : vector<128xf32>
    %576 = arith.addf %560, %575 : vector<128xf32>
    %c1_305 = arith.constant 1 : index
    %c5_306 = arith.constant 5 : index
    %577 = memref.load %arg4[%c1_305, %c5_306] : memref<6x8xi32, #tpu.memory_space<smem>>
    %578 = arith.index_cast %577 : i32 to index
    %c0_307 = arith.constant 0 : index
    %579 = vector.load %arg7[%578, %c0_307] : memref<64x128xf32, #tpu.memory_space<vmem>>, vector<1x128xf32>
    %580 = vector.shape_cast %579 : vector<1x128xf32> to vector<128xf32>
    %c1_308 = arith.constant 1 : index
    %c5_309 = arith.constant 5 : index
    %581 = memref.load %arg5[%c1_308, %c5_309] : memref<6x8xi32, #tpu.memory_space<smem>>
    %582 = arith.index_cast %581 : i32 to index
    %c0_310 = arith.constant 0 : index
    %583 = vector.load %arg8[%582, %c0_310] : memref<8x128xf32, #tpu.memory_space<vmem>>, vector<1x128xf32>
    %584 = vector.shape_cast %583 : vector<1x128xf32> to vector<128xf32>
    %585 = arith.addf %580, %584 : vector<128xf32>
    %c5_311 = arith.constant 5 : index
    %c0_312 = arith.constant 0 : index
    %586 = vector.load %arg9[%c5_311, %c0_312] : memref<8x128xf32, #tpu.memory_space<vmem>>, vector<1x128xf32>
    %587 = vector.shape_cast %586 : vector<1x128xf32> to vector<128xf32>
    %588 = arith.addf %585, %587 : vector<128xf32>
    %589 = arith.mulf %482, %495 : f32
    %590 = vector.broadcast %589 : f32 to vector<128xf32>
    %591 = arith.mulf %590, %588 : vector<128xf32>
    %592 = arith.addf %576, %591 : vector<128xf32>
    %c1_313 = arith.constant 1 : index
    %c6_314 = arith.constant 6 : index
    %593 = memref.load %arg4[%c1_313, %c6_314] : memref<6x8xi32, #tpu.memory_space<smem>>
    %594 = arith.index_cast %593 : i32 to index
    %c0_315 = arith.constant 0 : index
    %595 = vector.load %arg7[%594, %c0_315] : memref<64x128xf32, #tpu.memory_space<vmem>>, vector<1x128xf32>
    %596 = vector.shape_cast %595 : vector<1x128xf32> to vector<128xf32>
    %c1_316 = arith.constant 1 : index
    %c6_317 = arith.constant 6 : index
    %597 = memref.load %arg5[%c1_316, %c6_317] : memref<6x8xi32, #tpu.memory_space<smem>>
    %598 = arith.index_cast %597 : i32 to index
    %c0_318 = arith.constant 0 : index
    %599 = vector.load %arg8[%598, %c0_318] : memref<8x128xf32, #tpu.memory_space<vmem>>, vector<1x128xf32>
    %600 = vector.shape_cast %599 : vector<1x128xf32> to vector<128xf32>
    %601 = arith.addf %596, %600 : vector<128xf32>
    %c6_319 = arith.constant 6 : index
    %c0_320 = arith.constant 0 : index
    %602 = vector.load %arg9[%c6_319, %c0_320] : memref<8x128xf32, #tpu.memory_space<vmem>>, vector<1x128xf32>
    %603 = vector.shape_cast %602 : vector<1x128xf32> to vector<128xf32>
    %604 = arith.addf %601, %603 : vector<128xf32>
    %605 = arith.mulf %484, %495 : f32
    %606 = vector.broadcast %605 : f32 to vector<128xf32>
    %607 = arith.mulf %606, %604 : vector<128xf32>
    %608 = arith.addf %592, %607 : vector<128xf32>
    %c1_321 = arith.constant 1 : index
    %c7_322 = arith.constant 7 : index
    %609 = memref.load %arg4[%c1_321, %c7_322] : memref<6x8xi32, #tpu.memory_space<smem>>
    %610 = arith.index_cast %609 : i32 to index
    %c0_323 = arith.constant 0 : index
    %611 = vector.load %arg7[%610, %c0_323] : memref<64x128xf32, #tpu.memory_space<vmem>>, vector<1x128xf32>
    %612 = vector.shape_cast %611 : vector<1x128xf32> to vector<128xf32>
    %c1_324 = arith.constant 1 : index
    %c7_325 = arith.constant 7 : index
    %613 = memref.load %arg5[%c1_324, %c7_325] : memref<6x8xi32, #tpu.memory_space<smem>>
    %614 = arith.index_cast %613 : i32 to index
    %c0_326 = arith.constant 0 : index
    %615 = vector.load %arg8[%614, %c0_326] : memref<8x128xf32, #tpu.memory_space<vmem>>, vector<1x128xf32>
    %616 = vector.shape_cast %615 : vector<1x128xf32> to vector<128xf32>
    %617 = arith.addf %612, %616 : vector<128xf32>
    %c7_327 = arith.constant 7 : index
    %c0_328 = arith.constant 0 : index
    %618 = vector.load %arg9[%c7_327, %c0_328] : memref<8x128xf32, #tpu.memory_space<vmem>>, vector<1x128xf32>
    %619 = vector.shape_cast %618 : vector<1x128xf32> to vector<128xf32>
    %620 = arith.addf %617, %619 : vector<128xf32>
    %621 = arith.mulf %486, %495 : f32
    %622 = vector.broadcast %621 : f32 to vector<128xf32>
    %623 = arith.mulf %622, %620 : vector<128xf32>
    %624 = arith.addf %608, %623 : vector<128xf32>
    %c3_329 = arith.constant 3 : index
    %c0_330 = arith.constant 0 : index
    %625 = vector.load %arg13[%c3_329, %c0_330] : memref<8x128xf32, #tpu.memory_space<vmem>>, vector<1x128xf32>
    %626 = vector.shape_cast %625 : vector<1x128xf32> to vector<128xf32>
    %627 = vector.shape_cast %624 : vector<128xf32> to vector<1x128xf32>
    tpu.vector_store %arg13[%c3_329, %c0_330], %627 {strides = array<i32>} : memref<8x128xf32, #tpu.memory_space<vmem>>, vector<1x128xf32>,
    %c2_331 = arith.constant 2 : index
    %c0_332 = arith.constant 0 : index
    %628 = memref.load %arg6[%c2_331, %c0_332] : memref<6x8xi32, #tpu.memory_space<smem>>
    %629 = arith.sitofp %628 : i32 to f32
    %c2_333 = arith.constant 2 : index
    %c1_334 = arith.constant 1 : index
    %630 = memref.load %arg6[%c2_333, %c1_334] : memref<6x8xi32, #tpu.memory_space<smem>>
    %631 = arith.sitofp %630 : i32 to f32
    %c2_335 = arith.constant 2 : index
    %c2_336 = arith.constant 2 : index
    %632 = memref.load %arg6[%c2_335, %c2_336] : memref<6x8xi32, #tpu.memory_space<smem>>
    %633 = arith.sitofp %632 : i32 to f32
    %c2_337 = arith.constant 2 : index
    %c3_338 = arith.constant 3 : index
    %634 = memref.load %arg6[%c2_337, %c3_338] : memref<6x8xi32, #tpu.memory_space<smem>>
    %635 = arith.sitofp %634 : i32 to f32
    %c2_339 = arith.constant 2 : index
    %c4_340 = arith.constant 4 : index
    %636 = memref.load %arg6[%c2_339, %c4_340] : memref<6x8xi32, #tpu.memory_space<smem>>
    %637 = arith.sitofp %636 : i32 to f32
    %c2_341 = arith.constant 2 : index
    %c5_342 = arith.constant 5 : index
    %638 = memref.load %arg6[%c2_341, %c5_342] : memref<6x8xi32, #tpu.memory_space<smem>>
    %639 = arith.sitofp %638 : i32 to f32
    %c2_343 = arith.constant 2 : index
    %c6_344 = arith.constant 6 : index
    %640 = memref.load %arg6[%c2_343, %c6_344] : memref<6x8xi32, #tpu.memory_space<smem>>
    %641 = arith.sitofp %640 : i32 to f32
    %c2_345 = arith.constant 2 : index
    %c7_346 = arith.constant 7 : index
    %642 = memref.load %arg6[%c2_345, %c7_346] : memref<6x8xi32, #tpu.memory_space<smem>>
    %643 = arith.sitofp %642 : i32 to f32
    %644 = arith.addf %629, %631 : f32
    %645 = arith.addf %644, %633 : f32
    %646 = arith.addf %645, %635 : f32
    %647 = arith.addf %646, %637 : f32
    %648 = arith.addf %647, %639 : f32
    %649 = arith.addf %648, %641 : f32
    %650 = arith.addf %649, %643 : f32
    %cst_347 = arith.constant 1.000000e+00 : f32
    %651 = arith.maximumf %650, %cst_347 : f32
    %cst_348 = arith.constant 1.000000e+00 : f32
    %652 = arith.divf %cst_348, %651 : f32
    %cst_349 = arith.constant 0.000000e+00 : f32
    %653 = vector.broadcast %cst_349 : f32 to vector<128xf32>
    %c2_350 = arith.constant 2 : index
    %c0_351 = arith.constant 0 : index
    %654 = memref.load %arg4[%c2_350, %c0_351] : memref<6x8xi32, #tpu.memory_space<smem>>
    %655 = arith.index_cast %654 : i32 to index
    %c0_352 = arith.constant 0 : index
    %656 = vector.load %arg7[%655, %c0_352] : memref<64x128xf32, #tpu.memory_space<vmem>>, vector<1x128xf32>
    %657 = vector.shape_cast %656 : vector<1x128xf32> to vector<128xf32>
    %c2_353 = arith.constant 2 : index
    %c0_354 = arith.constant 0 : index
    %658 = memref.load %arg5[%c2_353, %c0_354] : memref<6x8xi32, #tpu.memory_space<smem>>
    %659 = arith.index_cast %658 : i32 to index
    %c0_355 = arith.constant 0 : index
    %660 = vector.load %arg8[%659, %c0_355] : memref<8x128xf32, #tpu.memory_space<vmem>>, vector<1x128xf32>
    %661 = vector.shape_cast %660 : vector<1x128xf32> to vector<128xf32>
    %662 = arith.addf %657, %661 : vector<128xf32>
    %c0_356 = arith.constant 0 : index
    %c0_357 = arith.constant 0 : index
    %663 = vector.load %arg9[%c0_356, %c0_357] : memref<8x128xf32, #tpu.memory_space<vmem>>, vector<1x128xf32>
    %664 = vector.shape_cast %663 : vector<1x128xf32> to vector<128xf32>
    %665 = arith.addf %662, %664 : vector<128xf32>
    %666 = arith.mulf %629, %652 : f32
    %667 = vector.broadcast %666 : f32 to vector<128xf32>
    %668 = arith.mulf %667, %665 : vector<128xf32>
    %669 = arith.addf %653, %668 : vector<128xf32>
    %c2_358 = arith.constant 2 : index
    %c1_359 = arith.constant 1 : index
    %670 = memref.load %arg4[%c2_358, %c1_359] : memref<6x8xi32, #tpu.memory_space<smem>>
    %671 = arith.index_cast %670 : i32 to index
    %c0_360 = arith.constant 0 : index
    %672 = vector.load %arg7[%671, %c0_360] : memref<64x128xf32, #tpu.memory_space<vmem>>, vector<1x128xf32>
    %673 = vector.shape_cast %672 : vector<1x128xf32> to vector<128xf32>
    %c2_361 = arith.constant 2 : index
    %c1_362 = arith.constant 1 : index
    %674 = memref.load %arg5[%c2_361, %c1_362] : memref<6x8xi32, #tpu.memory_space<smem>>
    %675 = arith.index_cast %674 : i32 to index
    %c0_363 = arith.constant 0 : index
    %676 = vector.load %arg8[%675, %c0_363] : memref<8x128xf32, #tpu.memory_space<vmem>>, vector<1x128xf32>
    %677 = vector.shape_cast %676 : vector<1x128xf32> to vector<128xf32>
    %678 = arith.addf %673, %677 : vector<128xf32>
    %c1_364 = arith.constant 1 : index
    %c0_365 = arith.constant 0 : index
    %679 = vector.load %arg9[%c1_364, %c0_365] : memref<8x128xf32, #tpu.memory_space<vmem>>, vector<1x128xf32>
    %680 = vector.shape_cast %679 : vector<1x128xf32> to vector<128xf32>
    %681 = arith.addf %678, %680 : vector<128xf32>
    %682 = arith.mulf %631, %652 : f32
    %683 = vector.broadcast %682 : f32 to vector<128xf32>
    %684 = arith.mulf %683, %681 : vector<128xf32>
    %685 = arith.addf %669, %684 : vector<128xf32>
    %c2_366 = arith.constant 2 : index
    %c2_367 = arith.constant 2 : index
    %686 = memref.load %arg4[%c2_366, %c2_367] : memref<6x8xi32, #tpu.memory_space<smem>>
    %687 = arith.index_cast %686 : i32 to index
    %c0_368 = arith.constant 0 : index
    %688 = vector.load %arg7[%687, %c0_368] : memref<64x128xf32, #tpu.memory_space<vmem>>, vector<1x128xf32>
    %689 = vector.shape_cast %688 : vector<1x128xf32> to vector<128xf32>
    %c2_369 = arith.constant 2 : index
    %c2_370 = arith.constant 2 : index
    %690 = memref.load %arg5[%c2_369, %c2_370] : memref<6x8xi32, #tpu.memory_space<smem>>
    %691 = arith.index_cast %690 : i32 to index
    %c0_371 = arith.constant 0 : index
    %692 = vector.load %arg8[%691, %c0_371] : memref<8x128xf32, #tpu.memory_space<vmem>>, vector<1x128xf32>
    %693 = vector.shape_cast %692 : vector<1x128xf32> to vector<128xf32>
    %694 = arith.addf %689, %693 : vector<128xf32>
    %c2_372 = arith.constant 2 : index
    %c0_373 = arith.constant 0 : index
    %695 = vector.load %arg9[%c2_372, %c0_373] : memref<8x128xf32, #tpu.memory_space<vmem>>, vector<1x128xf32>
    %696 = vector.shape_cast %695 : vector<1x128xf32> to vector<128xf32>
    %697 = arith.addf %694, %696 : vector<128xf32>
    %698 = arith.mulf %633, %652 : f32
    %699 = vector.broadcast %698 : f32 to vector<128xf32>
    %700 = arith.mulf %699, %697 : vector<128xf32>
    %701 = arith.addf %685, %700 : vector<128xf32>
    %c2_374 = arith.constant 2 : index
    %c3_375 = arith.constant 3 : index
    %702 = memref.load %arg4[%c2_374, %c3_375] : memref<6x8xi32, #tpu.memory_space<smem>>
    %703 = arith.index_cast %702 : i32 to index
    %c0_376 = arith.constant 0 : index
    %704 = vector.load %arg7[%703, %c0_376] : memref<64x128xf32, #tpu.memory_space<vmem>>, vector<1x128xf32>
    %705 = vector.shape_cast %704 : vector<1x128xf32> to vector<128xf32>
    %c2_377 = arith.constant 2 : index
    %c3_378 = arith.constant 3 : index
    %706 = memref.load %arg5[%c2_377, %c3_378] : memref<6x8xi32, #tpu.memory_space<smem>>
    %707 = arith.index_cast %706 : i32 to index
    %c0_379 = arith.constant 0 : index
    %708 = vector.load %arg8[%707, %c0_379] : memref<8x128xf32, #tpu.memory_space<vmem>>, vector<1x128xf32>
    %709 = vector.shape_cast %708 : vector<1x128xf32> to vector<128xf32>
    %710 = arith.addf %705, %709 : vector<128xf32>
    %c3_380 = arith.constant 3 : index
    %c0_381 = arith.constant 0 : index
    %711 = vector.load %arg9[%c3_380, %c0_381] : memref<8x128xf32, #tpu.memory_space<vmem>>, vector<1x128xf32>
    %712 = vector.shape_cast %711 : vector<1x128xf32> to vector<128xf32>
    %713 = arith.addf %710, %712 : vector<128xf32>
    %714 = arith.mulf %635, %652 : f32
    %715 = vector.broadcast %714 : f32 to vector<128xf32>
    %716 = arith.mulf %715, %713 : vector<128xf32>
    %717 = arith.addf %701, %716 : vector<128xf32>
    %c2_382 = arith.constant 2 : index
    %c4_383 = arith.constant 4 : index
    %718 = memref.load %arg4[%c2_382, %c4_383] : memref<6x8xi32, #tpu.memory_space<smem>>
    %719 = arith.index_cast %718 : i32 to index
    %c0_384 = arith.constant 0 : index
    %720 = vector.load %arg7[%719, %c0_384] : memref<64x128xf32, #tpu.memory_space<vmem>>, vector<1x128xf32>
    %721 = vector.shape_cast %720 : vector<1x128xf32> to vector<128xf32>
    %c2_385 = arith.constant 2 : index
    %c4_386 = arith.constant 4 : index
    %722 = memref.load %arg5[%c2_385, %c4_386] : memref<6x8xi32, #tpu.memory_space<smem>>
    %723 = arith.index_cast %722 : i32 to index
    %c0_387 = arith.constant 0 : index
    %724 = vector.load %arg8[%723, %c0_387] : memref<8x128xf32, #tpu.memory_space<vmem>>, vector<1x128xf32>
    %725 = vector.shape_cast %724 : vector<1x128xf32> to vector<128xf32>
    %726 = arith.addf %721, %725 : vector<128xf32>
    %c4_388 = arith.constant 4 : index
    %c0_389 = arith.constant 0 : index
    %727 = vector.load %arg9[%c4_388, %c0_389] : memref<8x128xf32, #tpu.memory_space<vmem>>, vector<1x128xf32>
    %728 = vector.shape_cast %727 : vector<1x128xf32> to vector<128xf32>
    %729 = arith.addf %726, %728 : vector<128xf32>
    %730 = arith.mulf %637, %652 : f32
    %731 = vector.broadcast %730 : f32 to vector<128xf32>
    %732 = arith.mulf %731, %729 : vector<128xf32>
    %733 = arith.addf %717, %732 : vector<128xf32>
    %c2_390 = arith.constant 2 : index
    %c5_391 = arith.constant 5 : index
    %734 = memref.load %arg4[%c2_390, %c5_391] : memref<6x8xi32, #tpu.memory_space<smem>>
    %735 = arith.index_cast %734 : i32 to index
    %c0_392 = arith.constant 0 : index
    %736 = vector.load %arg7[%735, %c0_392] : memref<64x128xf32, #tpu.memory_space<vmem>>, vector<1x128xf32>
    %737 = vector.shape_cast %736 : vector<1x128xf32> to vector<128xf32>
    %c2_393 = arith.constant 2 : index
    %c5_394 = arith.constant 5 : index
    %738 = memref.load %arg5[%c2_393, %c5_394] : memref<6x8xi32, #tpu.memory_space<smem>>
    %739 = arith.index_cast %738 : i32 to index
    %c0_395 = arith.constant 0 : index
    %740 = vector.load %arg8[%739, %c0_395] : memref<8x128xf32, #tpu.memory_space<vmem>>, vector<1x128xf32>
    %741 = vector.shape_cast %740 : vector<1x128xf32> to vector<128xf32>
    %742 = arith.addf %737, %741 : vector<128xf32>
    %c5_396 = arith.constant 5 : index
    %c0_397 = arith.constant 0 : index
    %743 = vector.load %arg9[%c5_396, %c0_397] : memref<8x128xf32, #tpu.memory_space<vmem>>, vector<1x128xf32>
    %744 = vector.shape_cast %743 : vector<1x128xf32> to vector<128xf32>
    %745 = arith.addf %742, %744 : vector<128xf32>
    %746 = arith.mulf %639, %652 : f32
    %747 = vector.broadcast %746 : f32 to vector<128xf32>
    %748 = arith.mulf %747, %745 : vector<128xf32>
    %749 = arith.addf %733, %748 : vector<128xf32>
    %c2_398 = arith.constant 2 : index
    %c6_399 = arith.constant 6 : index
    %750 = memref.load %arg4[%c2_398, %c6_399] : memref<6x8xi32, #tpu.memory_space<smem>>
    %751 = arith.index_cast %750 : i32 to index
    %c0_400 = arith.constant 0 : index
    %752 = vector.load %arg7[%751, %c0_400] : memref<64x128xf32, #tpu.memory_space<vmem>>, vector<1x128xf32>
    %753 = vector.shape_cast %752 : vector<1x128xf32> to vector<128xf32>
    %c2_401 = arith.constant 2 : index
    %c6_402 = arith.constant 6 : index
    %754 = memref.load %arg5[%c2_401, %c6_402] : memref<6x8xi32, #tpu.memory_space<smem>>
    %755 = arith.index_cast %754 : i32 to index
    %c0_403 = arith.constant 0 : index
    %756 = vector.load %arg8[%755, %c0_403] : memref<8x128xf32, #tpu.memory_space<vmem>>, vector<1x128xf32>
    %757 = vector.shape_cast %756 : vector<1x128xf32> to vector<128xf32>
    %758 = arith.addf %753, %757 : vector<128xf32>
    %c6_404 = arith.constant 6 : index
    %c0_405 = arith.constant 0 : index
    %759 = vector.load %arg9[%c6_404, %c0_405] : memref<8x128xf32, #tpu.memory_space<vmem>>, vector<1x128xf32>
    %760 = vector.shape_cast %759 : vector<1x128xf32> to vector<128xf32>
    %761 = arith.addf %758, %760 : vector<128xf32>
    %762 = arith.mulf %641, %652 : f32
    %763 = vector.broadcast %762 : f32 to vector<128xf32>
    %764 = arith.mulf %763, %761 : vector<128xf32>
    %765 = arith.addf %749, %764 : vector<128xf32>
    %c2_406 = arith.constant 2 : index
    %c7_407 = arith.constant 7 : index
    %766 = memref.load %arg4[%c2_406, %c7_407] : memref<6x8xi32, #tpu.memory_space<smem>>
    %767 = arith.index_cast %766 : i32 to index
    %c0_408 = arith.constant 0 : index
    %768 = vector.load %arg7[%767, %c0_408] : memref<64x128xf32, #tpu.memory_space<vmem>>, vector<1x128xf32>
    %769 = vector.shape_cast %768 : vector<1x128xf32> to vector<128xf32>
    %c2_409 = arith.constant 2 : index
    %c7_410 = arith.constant 7 : index
    %770 = memref.load %arg5[%c2_409, %c7_410] : memref<6x8xi32, #tpu.memory_space<smem>>
    %771 = arith.index_cast %770 : i32 to index
    %c0_411 = arith.constant 0 : index
    %772 = vector.load %arg8[%771, %c0_411] : memref<8x128xf32, #tpu.memory_space<vmem>>, vector<1x128xf32>
    %773 = vector.shape_cast %772 : vector<1x128xf32> to vector<128xf32>
    %774 = arith.addf %769, %773 : vector<128xf32>
    %c7_412 = arith.constant 7 : index
    %c0_413 = arith.constant 0 : index
    %775 = vector.load %arg9[%c7_412, %c0_413] : memref<8x128xf32, #tpu.memory_space<vmem>>, vector<1x128xf32>
    %776 = vector.shape_cast %775 : vector<1x128xf32> to vector<128xf32>
    %777 = arith.addf %774, %776 : vector<128xf32>
    %778 = arith.mulf %643, %652 : f32
    %779 = vector.broadcast %778 : f32 to vector<128xf32>
    %780 = arith.mulf %779, %777 : vector<128xf32>
    %781 = arith.addf %765, %780 : vector<128xf32>
    %c4_414 = arith.constant 4 : index
    %c0_415 = arith.constant 0 : index
    %782 = vector.load %arg13[%c4_414, %c0_415] : memref<8x128xf32, #tpu.memory_space<vmem>>, vector<1x128xf32>
    %783 = vector.shape_cast %782 : vector<1x128xf32> to vector<128xf32>
    %784 = vector.shape_cast %781 : vector<128xf32> to vector<1x128xf32>
    tpu.vector_store %arg13[%c4_414, %c0_415], %784 {strides = array<i32>} : memref<8x128xf32, #tpu.memory_space<vmem>>, vector<1x128xf32>,
    %c3_416 = arith.constant 3 : index
    %c0_417 = arith.constant 0 : index
    %785 = memref.load %arg6[%c3_416, %c0_417] : memref<6x8xi32, #tpu.memory_space<smem>>
    %786 = arith.sitofp %785 : i32 to f32
    %c3_418 = arith.constant 3 : index
    %c1_419 = arith.constant 1 : index
    %787 = memref.load %arg6[%c3_418, %c1_419] : memref<6x8xi32, #tpu.memory_space<smem>>
    %788 = arith.sitofp %787 : i32 to f32
    %c3_420 = arith.constant 3 : index
    %c2_421 = arith.constant 2 : index
    %789 = memref.load %arg6[%c3_420, %c2_421] : memref<6x8xi32, #tpu.memory_space<smem>>
    %790 = arith.sitofp %789 : i32 to f32
    %c3_422 = arith.constant 3 : index
    %c3_423 = arith.constant 3 : index
    %791 = memref.load %arg6[%c3_422, %c3_423] : memref<6x8xi32, #tpu.memory_space<smem>>
    %792 = arith.sitofp %791 : i32 to f32
    %c3_424 = arith.constant 3 : index
    %c4_425 = arith.constant 4 : index
    %793 = memref.load %arg6[%c3_424, %c4_425] : memref<6x8xi32, #tpu.memory_space<smem>>
    %794 = arith.sitofp %793 : i32 to f32
    %c3_426 = arith.constant 3 : index
    %c5_427 = arith.constant 5 : index
    %795 = memref.load %arg6[%c3_426, %c5_427] : memref<6x8xi32, #tpu.memory_space<smem>>
    %796 = arith.sitofp %795 : i32 to f32
    %c3_428 = arith.constant 3 : index
    %c6_429 = arith.constant 6 : index
    %797 = memref.load %arg6[%c3_428, %c6_429] : memref<6x8xi32, #tpu.memory_space<smem>>
    %798 = arith.sitofp %797 : i32 to f32
    %c3_430 = arith.constant 3 : index
    %c7_431 = arith.constant 7 : index
    %799 = memref.load %arg6[%c3_430, %c7_431] : memref<6x8xi32, #tpu.memory_space<smem>>
    %800 = arith.sitofp %799 : i32 to f32
    %801 = arith.addf %786, %788 : f32
    %802 = arith.addf %801, %790 : f32
    %803 = arith.addf %802, %792 : f32
    %804 = arith.addf %803, %794 : f32
    %805 = arith.addf %804, %796 : f32
    %806 = arith.addf %805, %798 : f32
    %807 = arith.addf %806, %800 : f32
    %cst_432 = arith.constant 1.000000e+00 : f32
    %808 = arith.maximumf %807, %cst_432 : f32
    %cst_433 = arith.constant 1.000000e+00 : f32
    %809 = arith.divf %cst_433, %808 : f32
    %cst_434 = arith.constant 0.000000e+00 : f32
    %810 = vector.broadcast %cst_434 : f32 to vector<128xf32>
    %c3_435 = arith.constant 3 : index
    %c0_436 = arith.constant 0 : index
    %811 = memref.load %arg4[%c3_435, %c0_436] : memref<6x8xi32, #tpu.memory_space<smem>>
    %812 = arith.index_cast %811 : i32 to index
    %c0_437 = arith.constant 0 : index
    %813 = vector.load %arg7[%812, %c0_437] : memref<64x128xf32, #tpu.memory_space<vmem>>, vector<1x128xf32>
    %814 = vector.shape_cast %813 : vector<1x128xf32> to vector<128xf32>
    %c3_438 = arith.constant 3 : index
    %c0_439 = arith.constant 0 : index
    %815 = memref.load %arg5[%c3_438, %c0_439] : memref<6x8xi32, #tpu.memory_space<smem>>
    %816 = arith.index_cast %815 : i32 to index
    %c0_440 = arith.constant 0 : index
    %817 = vector.load %arg8[%816, %c0_440] : memref<8x128xf32, #tpu.memory_space<vmem>>, vector<1x128xf32>
    %818 = vector.shape_cast %817 : vector<1x128xf32> to vector<128xf32>
    %819 = arith.addf %814, %818 : vector<128xf32>
    %c0_441 = arith.constant 0 : index
    %c0_442 = arith.constant 0 : index
    %820 = vector.load %arg9[%c0_441, %c0_442] : memref<8x128xf32, #tpu.memory_space<vmem>>, vector<1x128xf32>
    %821 = vector.shape_cast %820 : vector<1x128xf32> to vector<128xf32>
    %822 = arith.addf %819, %821 : vector<128xf32>
    %823 = arith.mulf %786, %809 : f32
    %824 = vector.broadcast %823 : f32 to vector<128xf32>
    %825 = arith.mulf %824, %822 : vector<128xf32>
    %826 = arith.addf %810, %825 : vector<128xf32>
    %c3_443 = arith.constant 3 : index
    %c1_444 = arith.constant 1 : index
    %827 = memref.load %arg4[%c3_443, %c1_444] : memref<6x8xi32, #tpu.memory_space<smem>>
    %828 = arith.index_cast %827 : i32 to index
    %c0_445 = arith.constant 0 : index
    %829 = vector.load %arg7[%828, %c0_445] : memref<64x128xf32, #tpu.memory_space<vmem>>, vector<1x128xf32>
    %830 = vector.shape_cast %829 : vector<1x128xf32> to vector<128xf32>
    %c3_446 = arith.constant 3 : index
    %c1_447 = arith.constant 1 : index
    %831 = memref.load %arg5[%c3_446, %c1_447] : memref<6x8xi32, #tpu.memory_space<smem>>
    %832 = arith.index_cast %831 : i32 to index
    %c0_448 = arith.constant 0 : index
    %833 = vector.load %arg8[%832, %c0_448] : memref<8x128xf32, #tpu.memory_space<vmem>>, vector<1x128xf32>
    %834 = vector.shape_cast %833 : vector<1x128xf32> to vector<128xf32>
    %835 = arith.addf %830, %834 : vector<128xf32>
    %c1_449 = arith.constant 1 : index
    %c0_450 = arith.constant 0 : index
    %836 = vector.load %arg9[%c1_449, %c0_450] : memref<8x128xf32, #tpu.memory_space<vmem>>, vector<1x128xf32>
    %837 = vector.shape_cast %836 : vector<1x128xf32> to vector<128xf32>
    %838 = arith.addf %835, %837 : vector<128xf32>
    %839 = arith.mulf %788, %809 : f32
    %840 = vector.broadcast %839 : f32 to vector<128xf32>
    %841 = arith.mulf %840, %838 : vector<128xf32>
    %842 = arith.addf %826, %841 : vector<128xf32>
    %c3_451 = arith.constant 3 : index
    %c2_452 = arith.constant 2 : index
    %843 = memref.load %arg4[%c3_451, %c2_452] : memref<6x8xi32, #tpu.memory_space<smem>>
    %844 = arith.index_cast %843 : i32 to index
    %c0_453 = arith.constant 0 : index
    %845 = vector.load %arg7[%844, %c0_453] : memref<64x128xf32, #tpu.memory_space<vmem>>, vector<1x128xf32>
    %846 = vector.shape_cast %845 : vector<1x128xf32> to vector<128xf32>
    %c3_454 = arith.constant 3 : index
    %c2_455 = arith.constant 2 : index
    %847 = memref.load %arg5[%c3_454, %c2_455] : memref<6x8xi32, #tpu.memory_space<smem>>
    %848 = arith.index_cast %847 : i32 to index
    %c0_456 = arith.constant 0 : index
    %849 = vector.load %arg8[%848, %c0_456] : memref<8x128xf32, #tpu.memory_space<vmem>>, vector<1x128xf32>
    %850 = vector.shape_cast %849 : vector<1x128xf32> to vector<128xf32>
    %851 = arith.addf %846, %850 : vector<128xf32>
    %c2_457 = arith.constant 2 : index
    %c0_458 = arith.constant 0 : index
    %852 = vector.load %arg9[%c2_457, %c0_458] : memref<8x128xf32, #tpu.memory_space<vmem>>, vector<1x128xf32>
    %853 = vector.shape_cast %852 : vector<1x128xf32> to vector<128xf32>
    %854 = arith.addf %851, %853 : vector<128xf32>
    %855 = arith.mulf %790, %809 : f32
    %856 = vector.broadcast %855 : f32 to vector<128xf32>
    %857 = arith.mulf %856, %854 : vector<128xf32>
    %858 = arith.addf %842, %857 : vector<128xf32>
    %c3_459 = arith.constant 3 : index
    %c3_460 = arith.constant 3 : index
    %859 = memref.load %arg4[%c3_459, %c3_460] : memref<6x8xi32, #tpu.memory_space<smem>>
    %860 = arith.index_cast %859 : i32 to index
    %c0_461 = arith.constant 0 : index
    %861 = vector.load %arg7[%860, %c0_461] : memref<64x128xf32, #tpu.memory_space<vmem>>, vector<1x128xf32>
    %862 = vector.shape_cast %861 : vector<1x128xf32> to vector<128xf32>
    %c3_462 = arith.constant 3 : index
    %c3_463 = arith.constant 3 : index
    %863 = memref.load %arg5[%c3_462, %c3_463] : memref<6x8xi32, #tpu.memory_space<smem>>
    %864 = arith.index_cast %863 : i32 to index
    %c0_464 = arith.constant 0 : index
    %865 = vector.load %arg8[%864, %c0_464] : memref<8x128xf32, #tpu.memory_space<vmem>>, vector<1x128xf32>
    %866 = vector.shape_cast %865 : vector<1x128xf32> to vector<128xf32>
    %867 = arith.addf %862, %866 : vector<128xf32>
    %c3_465 = arith.constant 3 : index
    %c0_466 = arith.constant 0 : index
    %868 = vector.load %arg9[%c3_465, %c0_466] : memref<8x128xf32, #tpu.memory_space<vmem>>, vector<1x128xf32>
    %869 = vector.shape_cast %868 : vector<1x128xf32> to vector<128xf32>
    %870 = arith.addf %867, %869 : vector<128xf32>
    %871 = arith.mulf %792, %809 : f32
    %872 = vector.broadcast %871 : f32 to vector<128xf32>
    %873 = arith.mulf %872, %870 : vector<128xf32>
    %874 = arith.addf %858, %873 : vector<128xf32>
    %c3_467 = arith.constant 3 : index
    %c4_468 = arith.constant 4 : index
    %875 = memref.load %arg4[%c3_467, %c4_468] : memref<6x8xi32, #tpu.memory_space<smem>>
    %876 = arith.index_cast %875 : i32 to index
    %c0_469 = arith.constant 0 : index
    %877 = vector.load %arg7[%876, %c0_469] : memref<64x128xf32, #tpu.memory_space<vmem>>, vector<1x128xf32>
    %878 = vector.shape_cast %877 : vector<1x128xf32> to vector<128xf32>
    %c3_470 = arith.constant 3 : index
    %c4_471 = arith.constant 4 : index
    %879 = memref.load %arg5[%c3_470, %c4_471] : memref<6x8xi32, #tpu.memory_space<smem>>
    %880 = arith.index_cast %879 : i32 to index
    %c0_472 = arith.constant 0 : index
    %881 = vector.load %arg8[%880, %c0_472] : memref<8x128xf32, #tpu.memory_space<vmem>>, vector<1x128xf32>
    %882 = vector.shape_cast %881 : vector<1x128xf32> to vector<128xf32>
    %883 = arith.addf %878, %882 : vector<128xf32>
    %c4_473 = arith.constant 4 : index
    %c0_474 = arith.constant 0 : index
    %884 = vector.load %arg9[%c4_473, %c0_474] : memref<8x128xf32, #tpu.memory_space<vmem>>, vector<1x128xf32>
    %885 = vector.shape_cast %884 : vector<1x128xf32> to vector<128xf32>
    %886 = arith.addf %883, %885 : vector<128xf32>
    %887 = arith.mulf %794, %809 : f32
    %888 = vector.broadcast %887 : f32 to vector<128xf32>
    %889 = arith.mulf %888, %886 : vector<128xf32>
    %890 = arith.addf %874, %889 : vector<128xf32>
    %c3_475 = arith.constant 3 : index
    %c5_476 = arith.constant 5 : index
    %891 = memref.load %arg4[%c3_475, %c5_476] : memref<6x8xi32, #tpu.memory_space<smem>>
    %892 = arith.index_cast %891 : i32 to index
    %c0_477 = arith.constant 0 : index
    %893 = vector.load %arg7[%892, %c0_477] : memref<64x128xf32, #tpu.memory_space<vmem>>, vector<1x128xf32>
    %894 = vector.shape_cast %893 : vector<1x128xf32> to vector<128xf32>
    %c3_478 = arith.constant 3 : index
    %c5_479 = arith.constant 5 : index
    %895 = memref.load %arg5[%c3_478, %c5_479] : memref<6x8xi32, #tpu.memory_space<smem>>
    %896 = arith.index_cast %895 : i32 to index
    %c0_480 = arith.constant 0 : index
    %897 = vector.load %arg8[%896, %c0_480] : memref<8x128xf32, #tpu.memory_space<vmem>>, vector<1x128xf32>
    %898 = vector.shape_cast %897 : vector<1x128xf32> to vector<128xf32>
    %899 = arith.addf %894, %898 : vector<128xf32>
    %c5_481 = arith.constant 5 : index
    %c0_482 = arith.constant 0 : index
    %900 = vector.load %arg9[%c5_481, %c0_482] : memref<8x128xf32, #tpu.memory_space<vmem>>, vector<1x128xf32>
    %901 = vector.shape_cast %900 : vector<1x128xf32> to vector<128xf32>
    %902 = arith.addf %899, %901 : vector<128xf32>
    %903 = arith.mulf %796, %809 : f32
    %904 = vector.broadcast %903 : f32 to vector<128xf32>
    %905 = arith.mulf %904, %902 : vector<128xf32>
    %906 = arith.addf %890, %905 : vector<128xf32>
    %c3_483 = arith.constant 3 : index
    %c6_484 = arith.constant 6 : index
    %907 = memref.load %arg4[%c3_483, %c6_484] : memref<6x8xi32, #tpu.memory_space<smem>>
    %908 = arith.index_cast %907 : i32 to index
    %c0_485 = arith.constant 0 : index
    %909 = vector.load %arg7[%908, %c0_485] : memref<64x128xf32, #tpu.memory_space<vmem>>, vector<1x128xf32>
    %910 = vector.shape_cast %909 : vector<1x128xf32> to vector<128xf32>
    %c3_486 = arith.constant 3 : index
    %c6_487 = arith.constant 6 : index
    %911 = memref.load %arg5[%c3_486, %c6_487] : memref<6x8xi32, #tpu.memory_space<smem>>
    %912 = arith.index_cast %911 : i32 to index
    %c0_488 = arith.constant 0 : index
    %913 = vector.load %arg8[%912, %c0_488] : memref<8x128xf32, #tpu.memory_space<vmem>>, vector<1x128xf32>
    %914 = vector.shape_cast %913 : vector<1x128xf32> to vector<128xf32>
    %915 = arith.addf %910, %914 : vector<128xf32>
    %c6_489 = arith.constant 6 : index
    %c0_490 = arith.constant 0 : index
    %916 = vector.load %arg9[%c6_489, %c0_490] : memref<8x128xf32, #tpu.memory_space<vmem>>, vector<1x128xf32>
    %917 = vector.shape_cast %916 : vector<1x128xf32> to vector<128xf32>
    %918 = arith.addf %915, %917 : vector<128xf32>
    %919 = arith.mulf %798, %809 : f32
    %920 = vector.broadcast %919 : f32 to vector<128xf32>
    %921 = arith.mulf %920, %918 : vector<128xf32>
    %922 = arith.addf %906, %921 : vector<128xf32>
    %c3_491 = arith.constant 3 : index
    %c7_492 = arith.constant 7 : index
    %923 = memref.load %arg4[%c3_491, %c7_492] : memref<6x8xi32, #tpu.memory_space<smem>>
    %924 = arith.index_cast %923 : i32 to index
    %c0_493 = arith.constant 0 : index
    %925 = vector.load %arg7[%924, %c0_493] : memref<64x128xf32, #tpu.memory_space<vmem>>, vector<1x128xf32>
    %926 = vector.shape_cast %925 : vector<1x128xf32> to vector<128xf32>
    %c3_494 = arith.constant 3 : index
    %c7_495 = arith.constant 7 : index
    %927 = memref.load %arg5[%c3_494, %c7_495] : memref<6x8xi32, #tpu.memory_space<smem>>
    %928 = arith.index_cast %927 : i32 to index
    %c0_496 = arith.constant 0 : index
    %929 = vector.load %arg8[%928, %c0_496] : memref<8x128xf32, #tpu.memory_space<vmem>>, vector<1x128xf32>
    %930 = vector.shape_cast %929 : vector<1x128xf32> to vector<128xf32>
    %931 = arith.addf %926, %930 : vector<128xf32>
    %c7_497 = arith.constant 7 : index
    %c0_498 = arith.constant 0 : index
    %932 = vector.load %arg9[%c7_497, %c0_498] : memref<8x128xf32, #tpu.memory_space<vmem>>, vector<1x128xf32>
    %933 = vector.shape_cast %932 : vector<1x128xf32> to vector<128xf32>
    %934 = arith.addf %931, %933 : vector<128xf32>
    %935 = arith.mulf %800, %809 : f32
    %936 = vector.broadcast %935 : f32 to vector<128xf32>
    %937 = arith.mulf %936, %934 : vector<128xf32>
    %938 = arith.addf %922, %937 : vector<128xf32>
    %c5_499 = arith.constant 5 : index
    %c0_500 = arith.constant 0 : index
    %939 = vector.load %arg13[%c5_499, %c0_500] : memref<8x128xf32, #tpu.memory_space<vmem>>, vector<1x128xf32>
    %940 = vector.shape_cast %939 : vector<1x128xf32> to vector<128xf32>
    %941 = vector.shape_cast %938 : vector<128xf32> to vector<1x128xf32>
    tpu.vector_store %arg13[%c5_499, %c0_500], %941 {strides = array<i32>} : memref<8x128xf32, #tpu.memory_space<vmem>>, vector<1x128xf32>,
    %c4_501 = arith.constant 4 : index
    %c0_502 = arith.constant 0 : index
    %942 = memref.load %arg6[%c4_501, %c0_502] : memref<6x8xi32, #tpu.memory_space<smem>>
    %943 = arith.sitofp %942 : i32 to f32
    %c4_503 = arith.constant 4 : index
    %c1_504 = arith.constant 1 : index
    %944 = memref.load %arg6[%c4_503, %c1_504] : memref<6x8xi32, #tpu.memory_space<smem>>
    %945 = arith.sitofp %944 : i32 to f32
    %c4_505 = arith.constant 4 : index
    %c2_506 = arith.constant 2 : index
    %946 = memref.load %arg6[%c4_505, %c2_506] : memref<6x8xi32, #tpu.memory_space<smem>>
    %947 = arith.sitofp %946 : i32 to f32
    %c4_507 = arith.constant 4 : index
    %c3_508 = arith.constant 3 : index
    %948 = memref.load %arg6[%c4_507, %c3_508] : memref<6x8xi32, #tpu.memory_space<smem>>
    %949 = arith.sitofp %948 : i32 to f32
    %c4_509 = arith.constant 4 : index
    %c4_510 = arith.constant 4 : index
    %950 = memref.load %arg6[%c4_509, %c4_510] : memref<6x8xi32, #tpu.memory_space<smem>>
    %951 = arith.sitofp %950 : i32 to f32
    %c4_511 = arith.constant 4 : index
    %c5_512 = arith.constant 5 : index
    %952 = memref.load %arg6[%c4_511, %c5_512] : memref<6x8xi32, #tpu.memory_space<smem>>
    %953 = arith.sitofp %952 : i32 to f32
    %c4_513 = arith.constant 4 : index
    %c6_514 = arith.constant 6 : index
    %954 = memref.load %arg6[%c4_513, %c6_514] : memref<6x8xi32, #tpu.memory_space<smem>>
    %955 = arith.sitofp %954 : i32 to f32
    %c4_515 = arith.constant 4 : index
    %c7_516 = arith.constant 7 : index
    %956 = memref.load %arg6[%c4_515, %c7_516] : memref<6x8xi32, #tpu.memory_space<smem>>
    %957 = arith.sitofp %956 : i32 to f32
    %958 = arith.addf %943, %945 : f32
    %959 = arith.addf %958, %947 : f32
    %960 = arith.addf %959, %949 : f32
    %961 = arith.addf %960, %951 : f32
    %962 = arith.addf %961, %953 : f32
    %963 = arith.addf %962, %955 : f32
    %964 = arith.addf %963, %957 : f32
    %cst_517 = arith.constant 1.000000e+00 : f32
    %965 = arith.maximumf %964, %cst_517 : f32
    %cst_518 = arith.constant 1.000000e+00 : f32
    %966 = arith.divf %cst_518, %965 : f32
    %cst_519 = arith.constant 0.000000e+00 : f32
    %967 = vector.broadcast %cst_519 : f32 to vector<128xf32>
    %c4_520 = arith.constant 4 : index
    %c0_521 = arith.constant 0 : index
    %968 = memref.load %arg4[%c4_520, %c0_521] : memref<6x8xi32, #tpu.memory_space<smem>>
    %969 = arith.index_cast %968 : i32 to index
    %c0_522 = arith.constant 0 : index
    %970 = vector.load %arg7[%969, %c0_522] : memref<64x128xf32, #tpu.memory_space<vmem>>, vector<1x128xf32>
    %971 = vector.shape_cast %970 : vector<1x128xf32> to vector<128xf32>
    %c4_523 = arith.constant 4 : index
    %c0_524 = arith.constant 0 : index
    %972 = memref.load %arg5[%c4_523, %c0_524] : memref<6x8xi32, #tpu.memory_space<smem>>
    %973 = arith.index_cast %972 : i32 to index
    %c0_525 = arith.constant 0 : index
    %974 = vector.load %arg8[%973, %c0_525] : memref<8x128xf32, #tpu.memory_space<vmem>>, vector<1x128xf32>
    %975 = vector.shape_cast %974 : vector<1x128xf32> to vector<128xf32>
    %976 = arith.addf %971, %975 : vector<128xf32>
    %c0_526 = arith.constant 0 : index
    %c0_527 = arith.constant 0 : index
    %977 = vector.load %arg9[%c0_526, %c0_527] : memref<8x128xf32, #tpu.memory_space<vmem>>, vector<1x128xf32>
    %978 = vector.shape_cast %977 : vector<1x128xf32> to vector<128xf32>
    %979 = arith.addf %976, %978 : vector<128xf32>
    %980 = arith.mulf %943, %966 : f32
    %981 = vector.broadcast %980 : f32 to vector<128xf32>
    %982 = arith.mulf %981, %979 : vector<128xf32>
    %983 = arith.addf %967, %982 : vector<128xf32>
    %c4_528 = arith.constant 4 : index
    %c1_529 = arith.constant 1 : index
    %984 = memref.load %arg4[%c4_528, %c1_529] : memref<6x8xi32, #tpu.memory_space<smem>>
    %985 = arith.index_cast %984 : i32 to index
    %c0_530 = arith.constant 0 : index
    %986 = vector.load %arg7[%985, %c0_530] : memref<64x128xf32, #tpu.memory_space<vmem>>, vector<1x128xf32>
    %987 = vector.shape_cast %986 : vector<1x128xf32> to vector<128xf32>
    %c4_531 = arith.constant 4 : index
    %c1_532 = arith.constant 1 : index
    %988 = memref.load %arg5[%c4_531, %c1_532] : memref<6x8xi32, #tpu.memory_space<smem>>
    %989 = arith.index_cast %988 : i32 to index
    %c0_533 = arith.constant 0 : index
    %990 = vector.load %arg8[%989, %c0_533] : memref<8x128xf32, #tpu.memory_space<vmem>>, vector<1x128xf32>
    %991 = vector.shape_cast %990 : vector<1x128xf32> to vector<128xf32>
    %992 = arith.addf %987, %991 : vector<128xf32>
    %c1_534 = arith.constant 1 : index
    %c0_535 = arith.constant 0 : index
    %993 = vector.load %arg9[%c1_534, %c0_535] : memref<8x128xf32, #tpu.memory_space<vmem>>, vector<1x128xf32>
    %994 = vector.shape_cast %993 : vector<1x128xf32> to vector<128xf32>
    %995 = arith.addf %992, %994 : vector<128xf32>
    %996 = arith.mulf %945, %966 : f32
    %997 = vector.broadcast %996 : f32 to vector<128xf32>
    %998 = arith.mulf %997, %995 : vector<128xf32>
    %999 = arith.addf %983, %998 : vector<128xf32>
    %c4_536 = arith.constant 4 : index
    %c2_537 = arith.constant 2 : index
    %1000 = memref.load %arg4[%c4_536, %c2_537] : memref<6x8xi32, #tpu.memory_space<smem>>
    %1001 = arith.index_cast %1000 : i32 to index
    %c0_538 = arith.constant 0 : index
    %1002 = vector.load %arg7[%1001, %c0_538] : memref<64x128xf32, #tpu.memory_space<vmem>>, vector<1x128xf32>
    %1003 = vector.shape_cast %1002 : vector<1x128xf32> to vector<128xf32>
    %c4_539 = arith.constant 4 : index
    %c2_540 = arith.constant 2 : index
    %1004 = memref.load %arg5[%c4_539, %c2_540] : memref<6x8xi32, #tpu.memory_space<smem>>
    %1005 = arith.index_cast %1004 : i32 to index
    %c0_541 = arith.constant 0 : index
    %1006 = vector.load %arg8[%1005, %c0_541] : memref<8x128xf32, #tpu.memory_space<vmem>>, vector<1x128xf32>
    %1007 = vector.shape_cast %1006 : vector<1x128xf32> to vector<128xf32>
    %1008 = arith.addf %1003, %1007 : vector<128xf32>
    %c2_542 = arith.constant 2 : index
    %c0_543 = arith.constant 0 : index
    %1009 = vector.load %arg9[%c2_542, %c0_543] : memref<8x128xf32, #tpu.memory_space<vmem>>, vector<1x128xf32>
    %1010 = vector.shape_cast %1009 : vector<1x128xf32> to vector<128xf32>
    %1011 = arith.addf %1008, %1010 : vector<128xf32>
    %1012 = arith.mulf %947, %966 : f32
    %1013 = vector.broadcast %1012 : f32 to vector<128xf32>
    %1014 = arith.mulf %1013, %1011 : vector<128xf32>
    %1015 = arith.addf %999, %1014 : vector<128xf32>
    %c4_544 = arith.constant 4 : index
    %c3_545 = arith.constant 3 : index
    %1016 = memref.load %arg4[%c4_544, %c3_545] : memref<6x8xi32, #tpu.memory_space<smem>>
    %1017 = arith.index_cast %1016 : i32 to index
    %c0_546 = arith.constant 0 : index
    %1018 = vector.load %arg7[%1017, %c0_546] : memref<64x128xf32, #tpu.memory_space<vmem>>, vector<1x128xf32>
    %1019 = vector.shape_cast %1018 : vector<1x128xf32> to vector<128xf32>
    %c4_547 = arith.constant 4 : index
    %c3_548 = arith.constant 3 : index
    %1020 = memref.load %arg5[%c4_547, %c3_548] : memref<6x8xi32, #tpu.memory_space<smem>>
    %1021 = arith.index_cast %1020 : i32 to index
    %c0_549 = arith.constant 0 : index
    %1022 = vector.load %arg8[%1021, %c0_549] : memref<8x128xf32, #tpu.memory_space<vmem>>, vector<1x128xf32>
    %1023 = vector.shape_cast %1022 : vector<1x128xf32> to vector<128xf32>
    %1024 = arith.addf %1019, %1023 : vector<128xf32>
    %c3_550 = arith.constant 3 : index
    %c0_551 = arith.constant 0 : index
    %1025 = vector.load %arg9[%c3_550, %c0_551] : memref<8x128xf32, #tpu.memory_space<vmem>>, vector<1x128xf32>
    %1026 = vector.shape_cast %1025 : vector<1x128xf32> to vector<128xf32>
    %1027 = arith.addf %1024, %1026 : vector<128xf32>
    %1028 = arith.mulf %949, %966 : f32
    %1029 = vector.broadcast %1028 : f32 to vector<128xf32>
    %1030 = arith.mulf %1029, %1027 : vector<128xf32>
    %1031 = arith.addf %1015, %1030 : vector<128xf32>
    %c4_552 = arith.constant 4 : index
    %c4_553 = arith.constant 4 : index
    %1032 = memref.load %arg4[%c4_552, %c4_553] : memref<6x8xi32, #tpu.memory_space<smem>>
    %1033 = arith.index_cast %1032 : i32 to index
    %c0_554 = arith.constant 0 : index
    %1034 = vector.load %arg7[%1033, %c0_554] : memref<64x128xf32, #tpu.memory_space<vmem>>, vector<1x128xf32>
    %1035 = vector.shape_cast %1034 : vector<1x128xf32> to vector<128xf32>
    %c4_555 = arith.constant 4 : index
    %c4_556 = arith.constant 4 : index
    %1036 = memref.load %arg5[%c4_555, %c4_556] : memref<6x8xi32, #tpu.memory_space<smem>>
    %1037 = arith.index_cast %1036 : i32 to index
    %c0_557 = arith.constant 0 : index
    %1038 = vector.load %arg8[%1037, %c0_557] : memref<8x128xf32, #tpu.memory_space<vmem>>, vector<1x128xf32>
    %1039 = vector.shape_cast %1038 : vector<1x128xf32> to vector<128xf32>
    %1040 = arith.addf %1035, %1039 : vector<128xf32>
    %c4_558 = arith.constant 4 : index
    %c0_559 = arith.constant 0 : index
    %1041 = vector.load %arg9[%c4_558, %c0_559] : memref<8x128xf32, #tpu.memory_space<vmem>>, vector<1x128xf32>
    %1042 = vector.shape_cast %1041 : vector<1x128xf32> to vector<128xf32>
    %1043 = arith.addf %1040, %1042 : vector<128xf32>
    %1044 = arith.mulf %951, %966 : f32
    %1045 = vector.broadcast %1044 : f32 to vector<128xf32>
    %1046 = arith.mulf %1045, %1043 : vector<128xf32>
    %1047 = arith.addf %1031, %1046 : vector<128xf32>
    %c4_560 = arith.constant 4 : index
    %c5_561 = arith.constant 5 : index
    %1048 = memref.load %arg4[%c4_560, %c5_561] : memref<6x8xi32, #tpu.memory_space<smem>>
    %1049 = arith.index_cast %1048 : i32 to index
    %c0_562 = arith.constant 0 : index
    %1050 = vector.load %arg7[%1049, %c0_562] : memref<64x128xf32, #tpu.memory_space<vmem>>, vector<1x128xf32>
    %1051 = vector.shape_cast %1050 : vector<1x128xf32> to vector<128xf32>
    %c4_563 = arith.constant 4 : index
    %c5_564 = arith.constant 5 : index
    %1052 = memref.load %arg5[%c4_563, %c5_564] : memref<6x8xi32, #tpu.memory_space<smem>>
    %1053 = arith.index_cast %1052 : i32 to index
    %c0_565 = arith.constant 0 : index
    %1054 = vector.load %arg8[%1053, %c0_565] : memref<8x128xf32, #tpu.memory_space<vmem>>, vector<1x128xf32>
    %1055 = vector.shape_cast %1054 : vector<1x128xf32> to vector<128xf32>
    %1056 = arith.addf %1051, %1055 : vector<128xf32>
    %c5_566 = arith.constant 5 : index
    %c0_567 = arith.constant 0 : index
    %1057 = vector.load %arg9[%c5_566, %c0_567] : memref<8x128xf32, #tpu.memory_space<vmem>>, vector<1x128xf32>
    %1058 = vector.shape_cast %1057 : vector<1x128xf32> to vector<128xf32>
    %1059 = arith.addf %1056, %1058 : vector<128xf32>
    %1060 = arith.mulf %953, %966 : f32
    %1061 = vector.broadcast %1060 : f32 to vector<128xf32>
    %1062 = arith.mulf %1061, %1059 : vector<128xf32>
    %1063 = arith.addf %1047, %1062 : vector<128xf32>
    %c4_568 = arith.constant 4 : index
    %c6_569 = arith.constant 6 : index
    %1064 = memref.load %arg4[%c4_568, %c6_569] : memref<6x8xi32, #tpu.memory_space<smem>>
    %1065 = arith.index_cast %1064 : i32 to index
    %c0_570 = arith.constant 0 : index
    %1066 = vector.load %arg7[%1065, %c0_570] : memref<64x128xf32, #tpu.memory_space<vmem>>, vector<1x128xf32>
    %1067 = vector.shape_cast %1066 : vector<1x128xf32> to vector<128xf32>
    %c4_571 = arith.constant 4 : index
    %c6_572 = arith.constant 6 : index
    %1068 = memref.load %arg5[%c4_571, %c6_572] : memref<6x8xi32, #tpu.memory_space<smem>>
    %1069 = arith.index_cast %1068 : i32 to index
    %c0_573 = arith.constant 0 : index
    %1070 = vector.load %arg8[%1069, %c0_573] : memref<8x128xf32, #tpu.memory_space<vmem>>, vector<1x128xf32>
    %1071 = vector.shape_cast %1070 : vector<1x128xf32> to vector<128xf32>
    %1072 = arith.addf %1067, %1071 : vector<128xf32>
    %c6_574 = arith.constant 6 : index
    %c0_575 = arith.constant 0 : index
    %1073 = vector.load %arg9[%c6_574, %c0_575] : memref<8x128xf32, #tpu.memory_space<vmem>>, vector<1x128xf32>
    %1074 = vector.shape_cast %1073 : vector<1x128xf32> to vector<128xf32>
    %1075 = arith.addf %1072, %1074 : vector<128xf32>
    %1076 = arith.mulf %955, %966 : f32
    %1077 = vector.broadcast %1076 : f32 to vector<128xf32>
    %1078 = arith.mulf %1077, %1075 : vector<128xf32>
    %1079 = arith.addf %1063, %1078 : vector<128xf32>
    %c4_576 = arith.constant 4 : index
    %c7_577 = arith.constant 7 : index
    %1080 = memref.load %arg4[%c4_576, %c7_577] : memref<6x8xi32, #tpu.memory_space<smem>>
    %1081 = arith.index_cast %1080 : i32 to index
    %c0_578 = arith.constant 0 : index
    %1082 = vector.load %arg7[%1081, %c0_578] : memref<64x128xf32, #tpu.memory_space<vmem>>, vector<1x128xf32>
    %1083 = vector.shape_cast %1082 : vector<1x128xf32> to vector<128xf32>
    %c4_579 = arith.constant 4 : index
    %c7_580 = arith.constant 7 : index
    %1084 = memref.load %arg5[%c4_579, %c7_580] : memref<6x8xi32, #tpu.memory_space<smem>>
    %1085 = arith.index_cast %1084 : i32 to index
    %c0_581 = arith.constant 0 : index
    %1086 = vector.load %arg8[%1085, %c0_581] : memref<8x128xf32, #tpu.memory_space<vmem>>, vector<1x128xf32>
    %1087 = vector.shape_cast %1086 : vector<1x128xf32> to vector<128xf32>
    %1088 = arith.addf %1083, %1087 : vector<128xf32>
    %c7_582 = arith.constant 7 : index
    %c0_583 = arith.constant 0 : index
    %1089 = vector.load %arg9[%c7_582, %c0_583] : memref<8x128xf32, #tpu.memory_space<vmem>>, vector<1x128xf32>
    %1090 = vector.shape_cast %1089 : vector<1x128xf32> to vector<128xf32>
    %1091 = arith.addf %1088, %1090 : vector<128xf32>
    %1092 = arith.mulf %957, %966 : f32
    %1093 = vector.broadcast %1092 : f32 to vector<128xf32>
    %1094 = arith.mulf %1093, %1091 : vector<128xf32>
    %1095 = arith.addf %1079, %1094 : vector<128xf32>
    %c6_584 = arith.constant 6 : index
    %c0_585 = arith.constant 0 : index
    %1096 = vector.load %arg13[%c6_584, %c0_585] : memref<8x128xf32, #tpu.memory_space<vmem>>, vector<1x128xf32>
    %1097 = vector.shape_cast %1096 : vector<1x128xf32> to vector<128xf32>
    %1098 = vector.shape_cast %1095 : vector<128xf32> to vector<1x128xf32>
    tpu.vector_store %arg13[%c6_584, %c0_585], %1098 {strides = array<i32>} : memref<8x128xf32, #tpu.memory_space<vmem>>, vector<1x128xf32>,
    %c5_586 = arith.constant 5 : index
    %c0_587 = arith.constant 0 : index
    %1099 = memref.load %arg6[%c5_586, %c0_587] : memref<6x8xi32, #tpu.memory_space<smem>>
    %1100 = arith.sitofp %1099 : i32 to f32
    %c5_588 = arith.constant 5 : index
    %c1_589 = arith.constant 1 : index
    %1101 = memref.load %arg6[%c5_588, %c1_589] : memref<6x8xi32, #tpu.memory_space<smem>>
    %1102 = arith.sitofp %1101 : i32 to f32
    %c5_590 = arith.constant 5 : index
    %c2_591 = arith.constant 2 : index
    %1103 = memref.load %arg6[%c5_590, %c2_591] : memref<6x8xi32, #tpu.memory_space<smem>>
    %1104 = arith.sitofp %1103 : i32 to f32
    %c5_592 = arith.constant 5 : index
    %c3_593 = arith.constant 3 : index
    %1105 = memref.load %arg6[%c5_592, %c3_593] : memref<6x8xi32, #tpu.memory_space<smem>>
    %1106 = arith.sitofp %1105 : i32 to f32
    %c5_594 = arith.constant 5 : index
    %c4_595 = arith.constant 4 : index
    %1107 = memref.load %arg6[%c5_594, %c4_595] : memref<6x8xi32, #tpu.memory_space<smem>>
    %1108 = arith.sitofp %1107 : i32 to f32
    %c5_596 = arith.constant 5 : index
    %c5_597 = arith.constant 5 : index
    %1109 = memref.load %arg6[%c5_596, %c5_597] : memref<6x8xi32, #tpu.memory_space<smem>>
    %1110 = arith.sitofp %1109 : i32 to f32
    %c5_598 = arith.constant 5 : index
    %c6_599 = arith.constant 6 : index
    %1111 = memref.load %arg6[%c5_598, %c6_599] : memref<6x8xi32, #tpu.memory_space<smem>>
    %1112 = arith.sitofp %1111 : i32 to f32
    %c5_600 = arith.constant 5 : index
    %c7_601 = arith.constant 7 : index
    %1113 = memref.load %arg6[%c5_600, %c7_601] : memref<6x8xi32, #tpu.memory_space<smem>>
    %1114 = arith.sitofp %1113 : i32 to f32
    %1115 = arith.addf %1100, %1102 : f32
    %1116 = arith.addf %1115, %1104 : f32
    %1117 = arith.addf %1116, %1106 : f32
    %1118 = arith.addf %1117, %1108 : f32
    %1119 = arith.addf %1118, %1110 : f32
    %1120 = arith.addf %1119, %1112 : f32
    %1121 = arith.addf %1120, %1114 : f32
    %cst_602 = arith.constant 1.000000e+00 : f32
    %1122 = arith.maximumf %1121, %cst_602 : f32
    %cst_603 = arith.constant 1.000000e+00 : f32
    %1123 = arith.divf %cst_603, %1122 : f32
    %cst_604 = arith.constant 0.000000e+00 : f32
    %1124 = vector.broadcast %cst_604 : f32 to vector<128xf32>
    %c5_605 = arith.constant 5 : index
    %c0_606 = arith.constant 0 : index
    %1125 = memref.load %arg4[%c5_605, %c0_606] : memref<6x8xi32, #tpu.memory_space<smem>>
    %1126 = arith.index_cast %1125 : i32 to index
    %c0_607 = arith.constant 0 : index
    %1127 = vector.load %arg7[%1126, %c0_607] : memref<64x128xf32, #tpu.memory_space<vmem>>, vector<1x128xf32>
    %1128 = vector.shape_cast %1127 : vector<1x128xf32> to vector<128xf32>
    %c5_608 = arith.constant 5 : index
    %c0_609 = arith.constant 0 : index
    %1129 = memref.load %arg5[%c5_608, %c0_609] : memref<6x8xi32, #tpu.memory_space<smem>>
    %1130 = arith.index_cast %1129 : i32 to index
    %c0_610 = arith.constant 0 : index
    %1131 = vector.load %arg8[%1130, %c0_610] : memref<8x128xf32, #tpu.memory_space<vmem>>, vector<1x128xf32>
    %1132 = vector.shape_cast %1131 : vector<1x128xf32> to vector<128xf32>
    %1133 = arith.addf %1128, %1132 : vector<128xf32>
    %c0_611 = arith.constant 0 : index
    %c0_612 = arith.constant 0 : index
    %1134 = vector.load %arg9[%c0_611, %c0_612] : memref<8x128xf32, #tpu.memory_space<vmem>>, vector<1x128xf32>
    %1135 = vector.shape_cast %1134 : vector<1x128xf32> to vector<128xf32>
    %1136 = arith.addf %1133, %1135 : vector<128xf32>
    %1137 = arith.mulf %1100, %1123 : f32
    %1138 = vector.broadcast %1137 : f32 to vector<128xf32>
    %1139 = arith.mulf %1138, %1136 : vector<128xf32>
    %1140 = arith.addf %1124, %1139 : vector<128xf32>
    %c5_613 = arith.constant 5 : index
    %c1_614 = arith.constant 1 : index
    %1141 = memref.load %arg4[%c5_613, %c1_614] : memref<6x8xi32, #tpu.memory_space<smem>>
    %1142 = arith.index_cast %1141 : i32 to index
    %c0_615 = arith.constant 0 : index
    %1143 = vector.load %arg7[%1142, %c0_615] : memref<64x128xf32, #tpu.memory_space<vmem>>, vector<1x128xf32>
    %1144 = vector.shape_cast %1143 : vector<1x128xf32> to vector<128xf32>
    %c5_616 = arith.constant 5 : index
    %c1_617 = arith.constant 1 : index
    %1145 = memref.load %arg5[%c5_616, %c1_617] : memref<6x8xi32, #tpu.memory_space<smem>>
    %1146 = arith.index_cast %1145 : i32 to index
    %c0_618 = arith.constant 0 : index
    %1147 = vector.load %arg8[%1146, %c0_618] : memref<8x128xf32, #tpu.memory_space<vmem>>, vector<1x128xf32>
    %1148 = vector.shape_cast %1147 : vector<1x128xf32> to vector<128xf32>
    %1149 = arith.addf %1144, %1148 : vector<128xf32>
    %c1_619 = arith.constant 1 : index
    %c0_620 = arith.constant 0 : index
    %1150 = vector.load %arg9[%c1_619, %c0_620] : memref<8x128xf32, #tpu.memory_space<vmem>>, vector<1x128xf32>
    %1151 = vector.shape_cast %1150 : vector<1x128xf32> to vector<128xf32>
    %1152 = arith.addf %1149, %1151 : vector<128xf32>
    %1153 = arith.mulf %1102, %1123 : f32
    %1154 = vector.broadcast %1153 : f32 to vector<128xf32>
    %1155 = arith.mulf %1154, %1152 : vector<128xf32>
    %1156 = arith.addf %1140, %1155 : vector<128xf32>
    %c5_621 = arith.constant 5 : index
    %c2_622 = arith.constant 2 : index
    %1157 = memref.load %arg4[%c5_621, %c2_622] : memref<6x8xi32, #tpu.memory_space<smem>>
    %1158 = arith.index_cast %1157 : i32 to index
    %c0_623 = arith.constant 0 : index
    %1159 = vector.load %arg7[%1158, %c0_623] : memref<64x128xf32, #tpu.memory_space<vmem>>, vector<1x128xf32>
    %1160 = vector.shape_cast %1159 : vector<1x128xf32> to vector<128xf32>
    %c5_624 = arith.constant 5 : index
    %c2_625 = arith.constant 2 : index
    %1161 = memref.load %arg5[%c5_624, %c2_625] : memref<6x8xi32, #tpu.memory_space<smem>>
    %1162 = arith.index_cast %1161 : i32 to index
    %c0_626 = arith.constant 0 : index
    %1163 = vector.load %arg8[%1162, %c0_626] : memref<8x128xf32, #tpu.memory_space<vmem>>, vector<1x128xf32>
    %1164 = vector.shape_cast %1163 : vector<1x128xf32> to vector<128xf32>
    %1165 = arith.addf %1160, %1164 : vector<128xf32>
    %c2_627 = arith.constant 2 : index
    %c0_628 = arith.constant 0 : index
    %1166 = vector.load %arg9[%c2_627, %c0_628] : memref<8x128xf32, #tpu.memory_space<vmem>>, vector<1x128xf32>
    %1167 = vector.shape_cast %1166 : vector<1x128xf32> to vector<128xf32>
    %1168 = arith.addf %1165, %1167 : vector<128xf32>
    %1169 = arith.mulf %1104, %1123 : f32
    %1170 = vector.broadcast %1169 : f32 to vector<128xf32>
    %1171 = arith.mulf %1170, %1168 : vector<128xf32>
    %1172 = arith.addf %1156, %1171 : vector<128xf32>
    %c5_629 = arith.constant 5 : index
    %c3_630 = arith.constant 3 : index
    %1173 = memref.load %arg4[%c5_629, %c3_630] : memref<6x8xi32, #tpu.memory_space<smem>>
    %1174 = arith.index_cast %1173 : i32 to index
    %c0_631 = arith.constant 0 : index
    %1175 = vector.load %arg7[%1174, %c0_631] : memref<64x128xf32, #tpu.memory_space<vmem>>, vector<1x128xf32>
    %1176 = vector.shape_cast %1175 : vector<1x128xf32> to vector<128xf32>
    %c5_632 = arith.constant 5 : index
    %c3_633 = arith.constant 3 : index
    %1177 = memref.load %arg5[%c5_632, %c3_633] : memref<6x8xi32, #tpu.memory_space<smem>>
    %1178 = arith.index_cast %1177 : i32 to index
    %c0_634 = arith.constant 0 : index
    %1179 = vector.load %arg8[%1178, %c0_634] : memref<8x128xf32, #tpu.memory_space<vmem>>, vector<1x128xf32>
    %1180 = vector.shape_cast %1179 : vector<1x128xf32> to vector<128xf32>
    %1181 = arith.addf %1176, %1180 : vector<128xf32>
    %c3_635 = arith.constant 3 : index
    %c0_636 = arith.constant 0 : index
    %1182 = vector.load %arg9[%c3_635, %c0_636] : memref<8x128xf32, #tpu.memory_space<vmem>>, vector<1x128xf32>
    %1183 = vector.shape_cast %1182 : vector<1x128xf32> to vector<128xf32>
    %1184 = arith.addf %1181, %1183 : vector<128xf32>
    %1185 = arith.mulf %1106, %1123 : f32
    %1186 = vector.broadcast %1185 : f32 to vector<128xf32>
    %1187 = arith.mulf %1186, %1184 : vector<128xf32>
    %1188 = arith.addf %1172, %1187 : vector<128xf32>
    %c5_637 = arith.constant 5 : index
    %c4_638 = arith.constant 4 : index
    %1189 = memref.load %arg4[%c5_637, %c4_638] : memref<6x8xi32, #tpu.memory_space<smem>>
    %1190 = arith.index_cast %1189 : i32 to index
    %c0_639 = arith.constant 0 : index
    %1191 = vector.load %arg7[%1190, %c0_639] : memref<64x128xf32, #tpu.memory_space<vmem>>, vector<1x128xf32>
    %1192 = vector.shape_cast %1191 : vector<1x128xf32> to vector<128xf32>
    %c5_640 = arith.constant 5 : index
    %c4_641 = arith.constant 4 : index
    %1193 = memref.load %arg5[%c5_640, %c4_641] : memref<6x8xi32, #tpu.memory_space<smem>>
    %1194 = arith.index_cast %1193 : i32 to index
    %c0_642 = arith.constant 0 : index
    %1195 = vector.load %arg8[%1194, %c0_642] : memref<8x128xf32, #tpu.memory_space<vmem>>, vector<1x128xf32>
    %1196 = vector.shape_cast %1195 : vector<1x128xf32> to vector<128xf32>
    %1197 = arith.addf %1192, %1196 : vector<128xf32>
    %c4_643 = arith.constant 4 : index
    %c0_644 = arith.constant 0 : index
    %1198 = vector.load %arg9[%c4_643, %c0_644] : memref<8x128xf32, #tpu.memory_space<vmem>>, vector<1x128xf32>
    %1199 = vector.shape_cast %1198 : vector<1x128xf32> to vector<128xf32>
    %1200 = arith.addf %1197, %1199 : vector<128xf32>
    %1201 = arith.mulf %1108, %1123 : f32
    %1202 = vector.broadcast %1201 : f32 to vector<128xf32>
    %1203 = arith.mulf %1202, %1200 : vector<128xf32>
    %1204 = arith.addf %1188, %1203 : vector<128xf32>
    %c5_645 = arith.constant 5 : index
    %c5_646 = arith.constant 5 : index
    %1205 = memref.load %arg4[%c5_645, %c5_646] : memref<6x8xi32, #tpu.memory_space<smem>>
    %1206 = arith.index_cast %1205 : i32 to index
    %c0_647 = arith.constant 0 : index
    %1207 = vector.load %arg7[%1206, %c0_647] : memref<64x128xf32, #tpu.memory_space<vmem>>, vector<1x128xf32>
    %1208 = vector.shape_cast %1207 : vector<1x128xf32> to vector<128xf32>
    %c5_648 = arith.constant 5 : index
    %c5_649 = arith.constant 5 : index
    %1209 = memref.load %arg5[%c5_648, %c5_649] : memref<6x8xi32, #tpu.memory_space<smem>>
    %1210 = arith.index_cast %1209 : i32 to index
    %c0_650 = arith.constant 0 : index
    %1211 = vector.load %arg8[%1210, %c0_650] : memref<8x128xf32, #tpu.memory_space<vmem>>, vector<1x128xf32>
    %1212 = vector.shape_cast %1211 : vector<1x128xf32> to vector<128xf32>
    %1213 = arith.addf %1208, %1212 : vector<128xf32>
    %c5_651 = arith.constant 5 : index
    %c0_652 = arith.constant 0 : index
    %1214 = vector.load %arg9[%c5_651, %c0_652] : memref<8x128xf32, #tpu.memory_space<vmem>>, vector<1x128xf32>
    %1215 = vector.shape_cast %1214 : vector<1x128xf32> to vector<128xf32>
    %1216 = arith.addf %1213, %1215 : vector<128xf32>
    %1217 = arith.mulf %1110, %1123 : f32
    %1218 = vector.broadcast %1217 : f32 to vector<128xf32>
    %1219 = arith.mulf %1218, %1216 : vector<128xf32>
    %1220 = arith.addf %1204, %1219 : vector<128xf32>
    %c5_653 = arith.constant 5 : index
    %c6_654 = arith.constant 6 : index
    %1221 = memref.load %arg4[%c5_653, %c6_654] : memref<6x8xi32, #tpu.memory_space<smem>>
    %1222 = arith.index_cast %1221 : i32 to index
    %c0_655 = arith.constant 0 : index
    %1223 = vector.load %arg7[%1222, %c0_655] : memref<64x128xf32, #tpu.memory_space<vmem>>, vector<1x128xf32>
    %1224 = vector.shape_cast %1223 : vector<1x128xf32> to vector<128xf32>
    %c5_656 = arith.constant 5 : index
    %c6_657 = arith.constant 6 : index
    %1225 = memref.load %arg5[%c5_656, %c6_657] : memref<6x8xi32, #tpu.memory_space<smem>>
    %1226 = arith.index_cast %1225 : i32 to index
    %c0_658 = arith.constant 0 : index
    %1227 = vector.load %arg8[%1226, %c0_658] : memref<8x128xf32, #tpu.memory_space<vmem>>, vector<1x128xf32>
    %1228 = vector.shape_cast %1227 : vector<1x128xf32> to vector<128xf32>
    %1229 = arith.addf %1224, %1228 : vector<128xf32>
    %c6_659 = arith.constant 6 : index
    %c0_660 = arith.constant 0 : index
    %1230 = vector.load %arg9[%c6_659, %c0_660] : memref<8x128xf32, #tpu.memory_space<vmem>>, vector<1x128xf32>
    %1231 = vector.shape_cast %1230 : vector<1x128xf32> to vector<128xf32>
    %1232 = arith.addf %1229, %1231 : vector<128xf32>
    %1233 = arith.mulf %1112, %1123 : f32
    %1234 = vector.broadcast %1233 : f32 to vector<128xf32>
    %1235 = arith.mulf %1234, %1232 : vector<128xf32>
    %1236 = arith.addf %1220, %1235 : vector<128xf32>
    %c5_661 = arith.constant 5 : index
    %c7_662 = arith.constant 7 : index
    %1237 = memref.load %arg4[%c5_661, %c7_662] : memref<6x8xi32, #tpu.memory_space<smem>>
    %1238 = arith.index_cast %1237 : i32 to index
    %c0_663 = arith.constant 0 : index
    %1239 = vector.load %arg7[%1238, %c0_663] : memref<64x128xf32, #tpu.memory_space<vmem>>, vector<1x128xf32>
    %1240 = vector.shape_cast %1239 : vector<1x128xf32> to vector<128xf32>
    %c5_664 = arith.constant 5 : index
    %c7_665 = arith.constant 7 : index
    %1241 = memref.load %arg5[%c5_664, %c7_665] : memref<6x8xi32, #tpu.memory_space<smem>>
    %1242 = arith.index_cast %1241 : i32 to index
    %c0_666 = arith.constant 0 : index
    %1243 = vector.load %arg8[%1242, %c0_666] : memref<8x128xf32, #tpu.memory_space<vmem>>, vector<1x128xf32>
    %1244 = vector.shape_cast %1243 : vector<1x128xf32> to vector<128xf32>
    %1245 = arith.addf %1240, %1244 : vector<128xf32>
    %c7_667 = arith.constant 7 : index
    %c0_668 = arith.constant 0 : index
    %1246 = vector.load %arg9[%c7_667, %c0_668] : memref<8x128xf32, #tpu.memory_space<vmem>>, vector<1x128xf32>
    %1247 = vector.shape_cast %1246 : vector<1x128xf32> to vector<128xf32>
    %1248 = arith.addf %1245, %1247 : vector<128xf32>
    %1249 = arith.mulf %1114, %1123 : f32
    %1250 = vector.broadcast %1249 : f32 to vector<128xf32>
    %1251 = arith.mulf %1250, %1248 : vector<128xf32>
    %1252 = arith.addf %1236, %1251 : vector<128xf32>
    %c7_669 = arith.constant 7 : index
    %c0_670 = arith.constant 0 : index
    %1253 = vector.load %arg13[%c7_669, %c0_670] : memref<8x128xf32, #tpu.memory_space<vmem>>, vector<1x128xf32>
    %1254 = vector.shape_cast %1253 : vector<1x128xf32> to vector<128xf32>
    %1255 = vector.shape_cast %1252 : vector<128xf32> to vector<1x128xf32>
    tpu.vector_store %arg13[%c7_669, %c0_670], %1255 {strides = array<i32>} : memref<8x128xf32, #tpu.memory_space<vmem>>, vector<1x128xf32>,
    %c0_671 = arith.constant 0 : index
    %c0_672 = arith.constant 0 : index
    %1256 = vector.load %arg13[%c0_671, %c0_672] : memref<8x128xf32, #tpu.memory_space<vmem>>, vector<8x128xf32>
    %c0_673 = arith.constant 0 : index
    %c0_674 = arith.constant 0 : index
    %1257 = vector.load %arg10[%c0_673, %c0_674] : memref<128x128xf32, #tpu.memory_space<vmem>>, vector<128x128xf32>
    %cst_675 = arith.constant dense<0.000000e+00> : vector<8x128xf32>
    %1258 = tpu.matmul %1256, %1257, %cst_675 {dimension_numbers = #tpu.dot_dimension_numbers<[1], [0], [0], [1], [0, 0, 1, 1], [], []>} : vector<8x128xf32>, vector<128x128xf32>, vector<8x128xf32> -> vector<8x128xf32>
    %c0_676 = arith.constant 0 : index
    %c0_677 = arith.constant 0 : index
    %1259 = vector.load %arg11[%c0_676, %c0_677] : memref<1x128xf32, #tpu.memory_space<vmem>>, vector<1x128xf32>
    %1260 = vector.broadcast %1259 : vector<1x128xf32> to vector<8x128xf32>
    %1261 = arith.addf %1258, %1260 : vector<8x128xf32>
    %1262 = math.tanh %1261 : vector<8x128xf32>
    %1263 = tpu.transpose %1262, [1, 0] : vector<8x128xf32> -> vector<128x8xf32>
    %cst_678 = arith.constant dense<0.000000e+00> : vector<8x8xf32>
    %1264 = tpu.matmul %1262, %1263, %cst_678 {dimension_numbers = #tpu.dot_dimension_numbers<[1], [0], [0], [1], [0, 0, 1, 1], [], []>} : vector<8x128xf32>, vector<128x8xf32>, vector<8x8xf32> -> vector<8x8xf32>
    %1265 = tpu.iota {dimensions = array<i32: 0>} : vector<8x8xi32>
    %1266 = tpu.iota {dimensions = array<i32: 1>} : vector<8x8xi32>
    %1267 = arith.cmpi eq, %1265, %1266 : vector<8x8xi32>
    %cst_679 = arith.constant 0.000000e+00 : f32
    %1268 = vector.broadcast %cst_679 : f32 to vector<8x8xf32>
    %1269 = arith.select %1267, %1264, %1268 : vector<8x8xi1>, vector<8x8xf32>
    %cst_680 = arith.constant dense<0.000000e+00> : vector<8xf32>
    %1270 = vector.multi_reduction <add>, %1269, %cst_680 [0] : vector<8x8xf32> to vector<8xf32>
    %1271 = tpu.iota {dimensions = array<i32: 2>} : vector<2x3x8xi32>
    %1272 = tpu.iota {dimensions = array<i32: 0>} : vector<2x3x8xi32>
    %1273 = tpu.iota {dimensions = array<i32: 1>} : vector<2x3x8xi32>
    %c3_i32 = arith.constant 3 : i32
    %1274 = vector.broadcast %c3_i32 : i32 to vector<2x3x8xi32>
    %1275 = arith.muli %1272, %1274 : vector<2x3x8xi32>
    %c2_i32 = arith.constant 2 : i32
    %1276 = vector.broadcast %c2_i32 : i32 to vector<2x3x8xi32>
    %1277 = arith.addi %1276, %1275 : vector<2x3x8xi32>
    %1278 = arith.addi %1277, %1273 : vector<2x3x8xi32>
    %1279 = arith.cmpi eq, %1271, %1278 : vector<2x3x8xi32>
    %1280 = arith.cmpi eq, %1271, %1272 : vector<2x3x8xi32>
    %1281 = vector.extract_strided_slice %1264 {offsets = [0, 0], sizes = [2, 8], strides = [1, 1]} : vector<8x8xf32> to vector<2x8xf32>
    %1282 = vector.shape_cast %1281 : vector<2x8xf32> to vector<2x1x8xf32>
    %1283 = vector.shape_cast %1282 : vector<2x1x8xf32> to vector<2x1x8xf32>
    %1284 = vector.broadcast %1283 : vector<2x1x8xf32> to vector<2x3x8xf32>
    %1285 = vector.shape_cast %1270 : vector<8xf32> to vector<1x1x8xf32>
    %1286 = vector.shape_cast %1285 : vector<1x1x8xf32> to vector<1x1x8xf32>
    %1287 = vector.broadcast %1286 : vector<1x1x8xf32> to vector<2x3x8xf32>
    %cst_681 = arith.constant 0.000000e+00 : f32
    %1288 = vector.broadcast %cst_681 : f32 to vector<2x3x8xf32>
    %1289 = arith.select %1279, %1284, %1288 : vector<2x3x8xi1>, vector<2x3x8xf32>
    %cst_682 = arith.constant dense<0.000000e+00> : vector<2x3xf32>
    %1290 = vector.multi_reduction <add>, %1289, %cst_682 [2] : vector<2x3x8xf32> to vector<2x3xf32>
    %cst_683 = arith.constant 0.000000e+00 : f32
    %1291 = vector.broadcast %cst_683 : f32 to vector<2x3x8xf32>
    %1292 = arith.select %1279, %1287, %1291 : vector<2x3x8xi1>, vector<2x3x8xf32>
    %cst_684 = arith.constant dense<0.000000e+00> : vector<2x3xf32>
    %1293 = vector.multi_reduction <add>, %1292, %cst_684 [2] : vector<2x3x8xf32> to vector<2x3xf32>
    %cst_685 = arith.constant 0.000000e+00 : f32
    %1294 = vector.broadcast %cst_685 : f32 to vector<2x3x8xf32>
    %1295 = arith.select %1280, %1287, %1294 : vector<2x3x8xi1>, vector<2x3x8xf32>
    %cst_686 = arith.constant dense<0.000000e+00> : vector<2x3xf32>
    %1296 = vector.multi_reduction <add>, %1295, %cst_686 [2] : vector<2x3x8xf32> to vector<2x3xf32>
    %1297 = arith.mulf %1293, %1296 : vector<2x3xf32>
    %1298 = math.sqrt %1297 : vector<2x3xf32>
    %cst_687 = arith.constant 9.99999993E-9 : f32
    %1299 = vector.broadcast %cst_687 : f32 to vector<2x3xf32>
    %1300 = arith.maximumf %1298, %1299 : vector<2x3xf32>
    %1301 = arith.divf %1290, %1300 : vector<2x3xf32>
    %c0_688 = arith.constant 0 : index
    %c0_689 = arith.constant 0 : index
    %1302 = vector.load %arg12[%c0_688, %c0_689] : memref<2x3xf32, #tpu.memory_space<vmem>>, vector<2x3xf32>
    tpu.vector_store %arg12[%c0_688, %c0_689], %1301 {strides = array<i32>} : memref<2x3xf32, #tpu.memory_space<vmem>>, vector<2x3xf32>,
    return
  }
  func.func @transform_0(%arg0: i32) -> (i32, i32) {
    %c0_i32 = arith.constant 0 : i32
    %c0_i32_0 = arith.constant 0 : i32
    %c0_i32_1 = arith.constant 0 : i32
    return %c0_i32, %c0_i32_0 : i32, i32
  }
  func.func @transform_1(%arg0: i32) -> (i32, i32) {
    %c0_i32 = arith.constant 0 : i32
    %c0_i32_0 = arith.constant 0 : i32
    %c0_i32_1 = arith.constant 0 : i32
    return %c0_i32, %c0_i32_0 : i32, i32
  }
  func.func @transform_2(%arg0: i32) -> (i32, i32) {
    %c0_i32 = arith.constant 0 : i32
    %c0_i32_0 = arith.constant 0 : i32
    %c0_i32_1 = arith.constant 0 : i32
    return %c0_i32, %c0_i32_0 : i32, i32
  }
  func.func @transform_3(%arg0: i32) -> (i32, i32) {
    %c0_i32 = arith.constant 0 : i32
    %c0_i32_0 = arith.constant 0 : i32
    %c0_i32_1 = arith.constant 0 : i32
    return %c0_i32, %c0_i32_0 : i32, i32
  }
  func.func @transform_4(%arg0: i32) -> (i32, i32) {
    %c0_i32 = arith.constant 0 : i32
    %c0_i32_0 = arith.constant 0 : i32
    %c0_i32_1 = arith.constant 0 : i32
    return %c0_i32, %c0_i32_0 : i32, i32
  }
  func.func @transform_5(%arg0: i32) -> (i32, i32) {
    %c0_i32 = arith.constant 0 : i32
    %c0_i32_0 = arith.constant 0 : i32
    %c0_i32_1 = arith.constant 0 : i32
    return %c0_i32, %c0_i32_0 : i32, i32
  }
  func.func @transform_6(%arg0: i32) -> (i32, i32) {
    %c0_i32 = arith.constant 0 : i32
    %c0_i32_0 = arith.constant 0 : i32
    %c0_i32_1 = arith.constant 0 : i32
    return %c0_i32, %c0_i32_0 : i32, i32
  }
  func.func @transform_7(%arg0: i32) -> (i32, i32) {
    %c0_i32 = arith.constant 0 : i32
    %c0_i32_0 = arith.constant 0 : i32
    %c0_i32_1 = arith.constant 0 : i32
    return %c0_i32, %c0_i32_0 : i32, i32
  }
  func.func @transform_8(%arg0: i32) -> (i32, i32) {
    %c0_i32 = arith.constant 0 : i32
    %c0_i32_0 = arith.constant 0 : i32
    %c0_i32_1 = arith.constant 0 : i32
    return %c0_i32, %c0_i32_0 : i32, i32
  }
  func.func @transform_9(%arg0: i32) -> (i32, i32) {
    %c0_i32 = arith.constant 0 : i32
    %c0_i32_0 = arith.constant 0 : i32
    %c0_i32_1 = arith.constant 0 : i32
    return %c0_i32, %c0_i32_0 : i32, i32
  }
  func.func @transform_10(%arg0: i32) -> (i32, i32) {
    %c0_i32 = arith.constant 0 : i32
    %c0_i32_0 = arith.constant 0 : i32
    %c0_i32_1 = arith.constant 0 : i32
    return %c0_i32, %c0_i32_0 : i32, i32
  }
  func.func @transform_11(%arg0: i32) -> (i32, i32) {
    %c0_i32 = arith.constant 0 : i32
    %c0_i32_0 = arith.constant 0 : i32
    %c0_i32_1 = arith.constant 0 : i32
    return %c0_i32, %c0_i32_0 : i32, i32
  }
}

</mosaic_0001>

<bundles_post_ra>
// kernel: clf_summarizer_forward.1
= control target key start
LH: loop header
LB: loop body
LE: loop exit
PB: predicated region body
PF: predicated region fallthrough
CT: control target
= control target key end

     0   :  { %s3881_s0 = inlined_call_operand.vmem [shape: s32[2,8], index: 0, kind: input, shape index: {}]   ;;  %s3882_s1 = inlined_call_operand.vmem [shape: s32[2,8], index: 1, kind: input, shape index: {}]   ;;  %s3883_s2 = inlined_call_operand.vmem [shape: s32[2,8], index: 2, kind: input, shape index: {}]   ;;  %s3884_s3 = inlined_call_operand.vmem [shape: s32[6,8], index: 3, kind: input, shape index: {}]   ;;  %s3885_s4 = inlined_call_operand.vmem [shape: s32[6,8], index: 4, kind: input, shape index: {}]   ;;  %s3886_s5 = inlined_call_operand.vmem [shape: s32[6,8], index: 5, kind: input, shape index: {}]   ;;  %s3887_s6 = inlined_call_operand.vmem [shape: f32[64,128], index: 6, kind: input, shape index: {}]   ;;  %s3888_s7 = inlined_call_operand.vmem [shape: f32[8,128], index: 7, kind: input, shape index: {}]   ;;  %s3889_s8 = inlined_call_operand.vmem [shape: f32[8,128], index: 8, kind: input, shape index: {}]   ;;  %s3890_s9 = inlined_call_operand.hbm [shape: f32[128,128], index: 9, kind: input, shape index: {}]   ;;  %s3891_s10 = inlined_call_operand.hbm [shape: f32[1,128], index: 10, kind: input, shape index: {}]   ;;  %s3892_s11 = inlined_call_operand.hbm [shape: f32[2,3], index: 11, kind: output, shape index: {}]  }
   0x1   :  { %4003 = sst [smem:[#allocation85_spill]] %s3887_s6 }
   0x2   :  { %4004 = sst [smem:[#allocation86_spill]] %s3888_s7 }
   0x3   :  { %4005 = sst [smem:[#allocation87_spill]] %s3889_s8 }
   0x4   :  { %4006 = sst [smem:[#allocation88_spill]] %s3892_s11 }
   0x5   :  { %16 = vsyncpa [#allocation6], 0 }
   0x6   :  { %17 = vsyncpa [#allocation8], 0 }
   0x7   :  { %18 = vsyncpa [#allocation11], 0 }
   0x8   :  { %19 = vsyncpa [#allocation14], 0 }
   0x9   :  { %20 = vsyncpa [#allocation4], 0 }
   0xa   :  { %21 = vsyncpa [#allocation17], 0  ;;  %s39_s19 = sshll.u32 %s3882_s1, 4  ;;  %s40_s19 = int_to_ptr.vmem [resolvable:$true] %s39_s19 }
   0xb   :  { %22 = vsyncpa [#allocation5], 0  ;;  %s59_s22 = sshll.u32 %s3884_s3, 4  ;;  %s1923_s23 = scalar_lea.vmem %s40_s19, 32  ;;  %s60_s22 = int_to_ptr.vmem [resolvable:$true] %s59_s22 }
   0xc   :  { %p1924_p0 = scmp.ne.s32.totalorder %s40_s19, %s1923_s23  ;;  %p1928_p1 = scmp.lt.s32.totalorder %s40_s19, %s40_s19 }
   0xd   :  { %p1929_p2 = scmp.lt.s32.totalorder %s1923_s23, %s1923_s23 }
   0xf   :  { %p1930_p3 = por %p1929_p2, %p1928_p1 }
  0x11   :  { %p1931_p4 = pnand %p1930_p3, %p1924_p0 }
  0x13   :  { %1934 = shalt.err (!%p1931_p4)
}
  0x14   :  { %s2069_s24 = smov [#allocation7]   ;;  %s1935_s25 = scalar_lea.vmem %s60_s22, 128 }
  0x15   :  { %42 = dma.vmem_to_smem %s40_s19, 32, %s2069_s24, [#allocation8]  }
  0x16   :  { %p1936_p5 = scmp.ne.s32.totalorder %s60_s22, %s1935_s25  ;;  %p1940_p6 = scmp.lt.s32.totalorder %s60_s22, %s60_s22 }
  0x17   :  { %p1941_p7 = scmp.lt.s32.totalorder %s1935_s25, %s1935_s25 }
  0x19   :  { %p1942_p8 = por %p1941_p7, %p1940_p6 }
  0x1b   :  { %p1943_p9 = pnand %p1942_p8, %p1936_p5 }
  0x1d   :  { %1946 = shalt.err (!%p1943_p9)
}
  0x1e   :  { %s2070_s1 = smov [#allocation10]   ;;  %s29_s27 = sshll.u32 %s3881_s0, 4  ;;  %s30_s27 = int_to_ptr.vmem [resolvable:$true] %s29_s27 }
  0x1f   :  { %62 = dma.vmem_to_smem %s60_s22, 128, %s2070_s1, [#allocation11]  }
  0x20   :  { %s49_s30 = sshll.u32 %s3883_s2, 4  ;;  %s1947_s12 = scalar_lea.vmem %s30_s27, 32  ;;  %s50_s30 = int_to_ptr.vmem [resolvable:$true] %s49_s30 }
  0x21   :  { %p1948_p10 = scmp.ne.s32.totalorder %s30_s27, %s1947_s12  ;;  %p1952_p11 = scmp.lt.s32.totalorder %s30_s27, %s30_s27 }
  0x22   :  { %p1953_p12 = scmp.lt.s32.totalorder %s1947_s12, %s1947_s12 }
  0x24   :  { %p1954_p13 = por %p1953_p12, %p1952_p11 }
  0x26   :  { %p1955_p0 = pnand %p1954_p13, %p1948_p10 }
  0x28   :  { %1958 = shalt.err (!%p1955_p0)
}
  0x29   :  { %s2071_s13 = smov [#allocation3]   ;;  %s1959_s14 = scalar_lea.vmem %s50_s30, 32 }
  0x2a   :  { %32 = dma.vmem_to_smem %s30_s27, 32, %s2071_s13, [#allocation6]  }
  0x2b   :  { %p1960_p1 = scmp.ne.s32.totalorder %s50_s30, %s1959_s14  ;;  %p1964_p2 = scmp.lt.s32.totalorder %s50_s30, %s50_s30 }
  0x2c   :  { %p1965_p3 = scmp.lt.s32.totalorder %s1959_s14, %s1959_s14 }
  0x2e   :  { %p1966_p4 = por %p1965_p3, %p1964_p2 }
  0x30   :  { %p1967_p5 = pnand %p1966_p4, %p1960_p1 }
  0x32   :  { %1970 = shalt.err (!%p1967_p5)
}
  0x33   :  { %s2072_s0 = smov [#allocation9]   ;;  %s69_s16 = sshll.u32 %s3885_s4, 4  ;;  %s70_s16 = int_to_ptr.vmem [resolvable:$true] %s69_s16 }
  0x34   :  { %52 = dma.vmem_to_smem %s50_s30, 32, %s2072_s0, [#allocation8]  }
  0x35   :  { %s79_s19 = sshll.u32 %s3886_s5, 4  ;;  %s1971_s20 = scalar_lea.vmem %s70_s16, 128  ;;  %s80_s19 = int_to_ptr.vmem [resolvable:$true] %s79_s19 }
  0x36   :  { %p1972_p6 = scmp.ne.s32.totalorder %s70_s16, %s1971_s20  ;;  %p1976_p7 = scmp.lt.s32.totalorder %s70_s16, %s70_s16 }
  0x37   :  { %p1977_p8 = scmp.lt.s32.totalorder %s1971_s20, %s1971_s20 }
  0x39   :  { %p1978_p9 = por %p1977_p8, %p1976_p7 }
  0x3b   :  { %p1979_p10 = pnand %p1978_p9, %p1972_p6 }
  0x3d   :  { %1982 = shalt.err (!%p1979_p10)
}
  0x3e   :  { %s2073_s21 = smov [#allocation12]   ;;  %s1983_s22 = scalar_lea.vmem %s80_s19, 128 }
  0x3f   :  { %72 = dma.vmem_to_smem %s70_s16, 128, %s2073_s21, [#allocation11]  }
  0x40   :  { %p1984_p11 = scmp.ne.s32.totalorder %s80_s19, %s1983_s22  ;;  %p1988_p12 = scmp.lt.s32.totalorder %s80_s19, %s80_s19 }
  0x41   :  { %p1989_p13 = scmp.lt.s32.totalorder %s1983_s22, %s1983_s22 }
  0x43   :  { %p1990_p0 = por %p1989_p13, %p1988_p12 }
  0x45   :  { %p1991_p1 = pnand %p1990_p0, %p1984_p11 }
  0x47   :  { %1994 = shalt.err (!%p1991_p1)
}
  0x48   :  { %s2074_s4 = smov [#allocation13]   ;;  %s2075_s5 = smov [#allocation15]  }
  0x49   :  { %82 = dma.vmem_to_smem %s80_s19, 128, %s2074_s4, [#allocation14]  }
  0x4a   :  { %s94_s23 = sshll.u32 %s2075_s5, 4  ;;  %s95_s23 = int_to_ptr.vmem [resolvable:$true] %s94_s23 }
  0x4b   :  { %s2003_s24 = scalar_lea.vmem %s95_s23, 2048  ;;  %p2008_p3 = scmp.lt.s32.totalorder %s95_s23, %s95_s23 }
  0x4c   :  { %p2004_p2 = scmp.ne.s32.totalorder %s95_s23, %s2003_s24  ;;  %p2009_p4 = scmp.lt.s32.totalorder %s2003_s24, %s2003_s24 }
  0x4e   :  { %p2010_p5 = por %p2009_p4, %p2008_p3 }
  0x50   :  { %p2011_p6 = pnand %p2010_p5, %p2004_p2 }
  0x52   :  { %2014 = shalt.err (!%p2011_p6)
}
  0x53   :  { %s2076_s25 = smov 128   ;;  %s2077_s1 = smov 8  }
  0x54   :  { %100 = dma.hbm_to_vmem [thread:$0]  %s3890_s9, 2048, %s95_s23, [#allocation4], %s2076_s25, %s2076_s25, %s2077_s1  }
  0x55   :  { %s2078_s27 = smov [#allocation16]  }
  0x56   :  { %s107_s28 = sshll.u32 %s2078_s27, 4  ;;  %s108_s28 = int_to_ptr.vmem [resolvable:$true] %s107_s28 }
  0x57   :  { %s2023_s29 = scalar_lea.vmem %s108_s28, 16  ;;  %s2027_s30 = scalar_lea.vmem %s108_s28, 32 }
  0x58   :  { %p2024_p7 = scmp.ne.s32.totalorder %s108_s28, %s2023_s29  ;;  %p2028_p8 = scmp.lt.s32.totalorder %s108_s28, %s108_s28 }
  0x59   :  { %p2029_p9 = scmp.lt.s32.totalorder %s2027_s30, %s2023_s29 }
  0x5b   :  { %p2030_p10 = por %p2029_p9, %p2028_p8 }
  0x5d   :  { %p2031_p11 = pnand %p2030_p10, %p2024_p7 }
  0x5f   :  { %2034 = shalt.err (!%p2031_p11)
}
  0x60   :  { %110 = dma.hbm_to_vmem [thread:$0]  %s3891_s10, 16, %s108_s28, [#allocation17]  }
  0x61   :  { %2055 = dma.done.wait [#allocation6], 32  }
  0x62   :  { %2056 = vsyncadd [#allocation6], 4294967264 }
  0x63   :  { %2057 = dma.done.wait [#allocation8], 64  }
  0x64   :  { %2058 = vsyncadd [#allocation8], 4294967232 }
  0x65   :  { %2059 = dma.done.wait [#allocation11], 256  }
  0x66   :  { %2060 = vsyncadd [#allocation11], 4294967040 }
  0x67   :  { %2061 = dma.done.wait [#allocation14], 128  }
  0x68   :  { %2062 = vsyncadd [#allocation14], 4294967168 }
  0x69   :  { %2063 = dma.done.wait [#allocation4], 2048  }
  0x6a   :  { %2064 = vsyncadd [#allocation4], 4294965248 }
  0x6b   :  { %2065 = dma.done.wait [#allocation17], 16  }
  0x6c   :  { %2066 = vsyncadd [#allocation17], 4294967280 }
  0x6d   :  { %135 = sfence }
  0x6e   :  { %s2168_s9 = sld [smem:[#allocation9]]  ;;  %v1208_v0 = vld [vmem:[#allocation15 + $0x78] sm:$0xff]  ;;  %v2079_v1 = vmov 0.0   ;;  %v1207_v2 = vld [vmem:[#allocation15 + $0x70] sm:$0xff]  ;;  %vm2081_vm0 = vmmov 0   ;;  %vm1363_vm2 = vcmask 64512  }
  0x6f   :  { %s2170_s14 = sld [smem:[#allocation9 + $0x1]]  ;;  %1826 = vmatprep.subr.mxu0 %v2079_v1  ;;  %1861 = vmatprep.subr.mxu1 %v2079_v1  ;;  %vm1412_vm6 = vcmask 59392   ;;  %vm1467_vm12 = vcmask 1041409   ;;  %vm1470_vm13 = vcmask 17408  }
  0x70   :  { %s2172_s10 = sld [smem:[#allocation9 + $0x2]]  ;;  %1827 = vmatpush3.msra.mxu0 %v1208_v0  ;;  %1858 = vmatprep.mubr.msk.f32.mxu0 %vm2081_vm0, %v2079_v1 }
  0x71   :  { %s2174_s0 = sld [smem:[#allocation9 + $0x3]]  ;;  %1828 = vmatprep.subr.mxu0 %v2079_v1  ;;  %1863 = vmatprep.mubr.msk.f32.mxu1 %vm2081_vm0, %v2079_v1 }
  0x72   :  { %s2176_s2 = sld [smem:[#allocation9 + $0x4]]  ;;  %1829 = vmatpush3.msra.mxu0 %v1207_v2 }
  0x73   :  { %s2178_s15 = sld [smem:[#allocation9 + $0x5]]  ;;  %1830 = vmatprep.subr.mxu0 %v2079_v1 }
  0x74   :  { %s3899_s16 = scvt.s32.f32 %s2168_s9  ;;  %s2181_s17 = sld [smem:[#allocation9 + $0x6]] }
  0x75   :  { %s3897_s18 = scvt.s32.f32 %s2170_s14  ;;  %s2184_s19 = sld [smem:[#allocation9 + $0x7]] }
  0x76   :  { %s3896_s20 = scvt.s32.f32 %s2172_s10  ;;  %s2187_s21 = sld [smem:[#allocation9 + $0x80]] }
  0x77   :  { %s3895_s22 = scvt.s32.f32 %s2174_s0  ;;  %s152_s4 = sadd.f32 %s3897_s18, %s3899_s16 }
  0x78   :  { %s2194_s5 = sld [smem:[#allocation9 + $0x81]]  ;;  %s3893_s23 = scvt.s32.f32 %s2176_s2 }
  0x79   :  { %s153_s24 = sadd.f32 %s152_s4, %s3896_s20  ;;  %s3894_s1 = scvt.s32.f32 %s2178_s15 }
  0x7a   :  { %s2199_s25 = sld [smem:[#allocation9 + $0x82]]  ;;  %s3898_s27 = scvt.s32.f32 %s2181_s17 }
  0x7b   :  { %s154_s3 = sadd.f32 %s153_s24, %s3895_s22  ;;  %s3900_s30 = scvt.s32.f32 %s2184_s19 }
  0x7c   :  { %s2204_s26 = sld [smem:[#allocation9 + $0x83]]  ;;  %s3904_s13 = scvt.s32.f32 %s2187_s21 }
  0x7d   :  { %s155_s28 = sadd.f32 %s154_s3, %s3893_s23  ;;  %s3905_s18 = smov 1.0  }
  0x7e   :  { %4007 = sst [smem:[#allocation26_spill]] %s2194_s5  ;;  %s3903_s3 = scvt.s32.f32 %s2194_s5 }
  0x7f   :  { %s2209_s29 = sld [smem:[#allocation9 + $0x84]] }
  0x80   :  { %4008 = sst [smem:[#allocation27_spill]] %s2199_s25 }
  0x81   :  { %s156_s12 = sadd.f32 %s155_s28, %s3894_s1  ;;  %s3907_s1 = scvt.s32.f32 %s2199_s25 }
  0x82   :  { %4009 = sst [smem:[#allocation28_spill]] %s2204_s26  ;;  %s4016_s8 = scvt.s32.f32 %s2204_s26 }
  0x83   :  { %s2217_s4 = sld [smem:[#allocation9 + $0x85]]  ;;  %s4022_s25 = smov 1.0  }
  0x84   :  { %s157_s24 = sadd.f32 %s156_s12, %s3898_s27 }
  0x85   :  { %4010 = sst [smem:[#allocation29_spill]] %s2209_s29 }
  0x86   :  { %s2223_s23 = sld [smem:[#allocation9 + $0x86]] }
  0x87   :  { %s158_s28 = sadd.f32 %s157_s24, %s3900_s30  ;;  %s3910_s24 = scvt.s32.f32 %s2209_s29 }
  0x88   :  { %s2230_s20 = sld [smem:[#allocation9 + $0x87]] }
  0x89   :  { %4011 = sst [smem:[#allocation30_spill]] %s2217_s4  ;;  %s159_s12 = smax.f32 %s3905_s18, %s158_s28 }
  0x8a   :  { %s284_s27 = sadd.f32 %s3903_s3, %s3904_s13  ;;  %v160_v3 = vstv %s159_s12  ;;  %s3913_s11 = scvt.s32.f32 %s2217_s4 }
  0x8b   :  { %s2237_s16 = sld [smem:[#allocation13]]  ;;  %1897 = vrcp.f32 %v160_v3 }
  0x8c   :  { %4012 = sst [smem:[#allocation31_spill]] %s2223_s23  ;;  %s3914_s3 = scvt.s32.f32 %s2223_s23 }
  0x8d   :  { %s285_s30 = sadd.f32 %s284_s27, %s3907_s1 }
  0x8e   :  { %4013 = sst [smem:[#allocation32_spill]] %s2230_s20  ;;  %s3915_s18 = scvt.s32.f32 %s2230_s20 }
  0x8f   :  { %s2242_s22 = sld [smem:[#allocation13 + $0x1]] }
  0x90   :  { %s286_s7 = sadd.f32 %s285_s30, %s4016_s8 }
  0x91   :  { %4014 = sst [smem:[#allocation33_spill]] %s2237_s16  ;;  %s3920_s8 = scvt.s32.f32 %s2237_s16 }
  0x92   :  { %s2247_s28 = sld [smem:[#allocation13 + $0x2]] }
  0x93   :  { %s287_s12 = sadd.f32 %s286_s7, %s3910_s24 }
  0x94   :  { %s2252_s13 = sld [smem:[#allocation13 + $0x3]] }
  0x95   :  { %4015 = sst [smem:[#allocation34_spill]] %s2242_s22  ;;  %s3919_s30 = scvt.s32.f32 %s2242_s22 }
  0x96   :  { %s288_s27 = sadd.f32 %s287_s12, %s3913_s11 }
  0x97   :  { %s2257_s1 = sld [smem:[#allocation13 + $0x4]] }
  0x98   :  { %4017 = sst [smem:[#allocation35_spill]] %s2247_s28  ;;  %s3923_s24 = scvt.s32.f32 %s2247_s28  ;;  %v1898_v4 = vpop.eup %1897 }
  0x99   :  { %s289_s6 = sadd.f32 %s288_s27, %s3914_s3  ;;  %1866 = vpush %v1898_v4 }
  0x9a   :  { %4018 = sst [smem:[#allocation36_spill]] %s2252_s13  ;;  %s3925_s27 = scvt.s32.f32 %s2252_s13 }
  0x9b   :  { %s2263_s26 = sld [smem:[#allocation13 + $0x5]] }
  0x9c   :  { %s290_s7 = sadd.f32 %s289_s6, %s3915_s18 }
  0x9d   :  { %4019 = sst [smem:[#allocation37_spill]] %s2257_s1  ;;  %s3927_s18 = scvt.s32.f32 %s2257_s1 }
  0x9e   :  { %s2268_s29 = sld [smem:[#allocation13 + $0x6]]  ;;  %s291_s12 = smax.f32 %s4022_s25, %s290_s7 }
  0x9f   :  { %s2271_s11 = sld [smem:[#allocation13 + $0x7]]  ;;  %v292_v5 = vstv %s291_s12 }
  0xa0   :  { %s416_s3 = sadd.f32 %s3919_s30, %s3920_s8  ;;  %1899 = vrcp.f32 %v292_v5 }
  0xa1   :  { %4020 = sst [smem:[#allocation38_spill]] %s2263_s26  ;;  %s3929_s23 = scvt.s32.f32 %s2263_s26 }
  0xa2   :  { %s2278_s6 = sld [smem:[#allocation13 + $0x80]] }
  0xa3   :  { %s417_s7 = sadd.f32 %s416_s3, %s3923_s24 }
  0xa4   :  { %4021 = sst [smem:[#allocation39_spill]] %s2268_s29  ;;  %s3931_s30 = scvt.s32.f32 %s2268_s29 }
  0xa5   :  { %4023 = sst [smem:[#allocation40_spill]] %s2271_s11  ;;  %s3930_s16 = scvt.s32.f32 %s2271_s11 }
  0xa6   :  { %s2283_s20 = sld [smem:[#allocation13 + $0x81]] }
  0xa7   :  { %s418_s12 = sadd.f32 %s417_s7, %s3925_s27 }
  0xa8   :  { %4024 = sst [smem:[#allocation41_spill]] %s2278_s6  ;;  %s3937_s7 = scvt.s32.f32 %s2278_s6 }
  0xa9   :  { %s2288_s4 = sld [smem:[#allocation13 + $0x82]] }
  0xaa   :  { %s419_s8 = sadd.f32 %s418_s12, %s3927_s18 }
  0xab   :  { %s2293_s22 = sld [smem:[#allocation13 + $0x83]] }
  0xac   :  { %4025 = sst [smem:[#allocation42_spill]] %s2283_s20  ;;  %s3936_s27 = scvt.s32.f32 %s2283_s20 }
  0xad   :  { %s420_s3 = sadd.f32 %s419_s8, %s3929_s23  ;;  %v1900_v6 = vpop.eup %1899 }
  0xae   :  { %s2298_s24 = sld [smem:[#allocation13 + $0x84]]  ;;  %1868 = vpush %v1900_v6 }
  0xaf   :  { %4026 = sst [smem:[#allocation43_spill]] %s2288_s4  ;;  %s3939_s18 = scvt.s32.f32 %s2288_s4 }
  0xb0   :  { %s421_s28 = sadd.f32 %s420_s3, %s3931_s30 }
  0xb1   :  { %4027 = sst [smem:[#allocation44_spill]] %s2293_s22  ;;  %s3941_s3 = scvt.s32.f32 %s2293_s22 }
  0xb2   :  { %s2304_s13 = sld [smem:[#allocation13 + $0x85]] }
  0xb3   :  { %s422_s12 = sadd.f32 %s421_s28, %s3930_s16 }
  0xb4   :  { %4028 = sst [smem:[#allocation45_spill]] %s2298_s24  ;;  %s3943_s30 = scvt.s32.f32 %s2298_s24 }
  0xb5   :  { %s2309_s1 = sld [smem:[#allocation13 + $0x86]]  ;;  %s423_s8 = smax.f32 %s4022_s25, %s422_s12 }
  0xb6   :  { %s2312_s23 = sld [smem:[#allocation13 + $0x87]]  ;;  %v424_v7 = vstv %s423_s8 }
  0xb7   :  { %s548_s28 = sadd.f32 %s3936_s27, %s3937_s7  ;;  %1901 = vrcp.f32 %v424_v7 }
  0xb8   :  { %4029 = sst [smem:[#allocation46_spill]] %s2304_s13  ;;  %s3945_s29 = scvt.s32.f32 %s2304_s13 }
  0xb9   :  { %s2319_s16 = sld [smem:[#allocation13 + $0x100]] }
  0xba   :  { %s549_s11 = sadd.f32 %s548_s28, %s3939_s18 }
  0xbb   :  { %4030 = sst [smem:[#allocation47_spill]] %s2309_s1  ;;  %s3947_s20 = scvt.s32.f32 %s2309_s1 }
  0xbc   :  { %4031 = sst [smem:[#allocation48_spill]] %s2312_s23  ;;  %s3946_s6 = scvt.s32.f32 %s2312_s23 }
  0xbd   :  { %s2324_s12 = sld [smem:[#allocation13 + $0x101]] }
  0xbe   :  { %s550_s26 = sadd.f32 %s549_s11, %s3941_s3 }
  0xbf   :  { %4032 = sst [smem:[#allocation49_spill]] %s2319_s16  ;;  %s3953_s11 = scvt.s32.f32 %s2319_s16 }
  0xc0   :  { %s2329_s8 = sld [smem:[#allocation13 + $0x102]] }
  0xc1   :  { %s551_s27 = sadd.f32 %s550_s26, %s3943_s30 }
  0xc2   :  { %s2334_s7 = sld [smem:[#allocation13 + $0x103]] }
  0xc3   :  { %4033 = sst [smem:[#allocation50_spill]] %s2324_s12  ;;  %s3952_s3 = scvt.s32.f32 %s2324_s12 }
  0xc4   :  { %s552_s28 = sadd.f32 %s551_s27, %s3945_s29  ;;  %v1902_v8 = vpop.eup %1901 }
  0xc5   :  { %s2339_s18 = sld [smem:[#allocation13 + $0x104]]  ;;  %1870 = vpush %v1902_v8 }
  0xc6   :  { %4034 = sst [smem:[#allocation51_spill]] %s2329_s8  ;;  %s3955_s30 = scvt.s32.f32 %s2329_s8 }
  0xc7   :  { %s553_s4 = sadd.f32 %s552_s28, %s3947_s20 }
  0xc8   :  { %4035 = sst [smem:[#allocation52_spill]] %s2334_s7  ;;  %s3957_s28 = scvt.s32.f32 %s2334_s7 }
  0xc9   :  { %s2345_s22 = sld [smem:[#allocation13 + $0x105]] }
  0xca   :  { %s554_s26 = sadd.f32 %s553_s4, %s3946_s6 }
  0xcb   :  { %4036 = sst [smem:[#allocation53_spill]] %s2339_s18  ;;  %s3959_s20 = scvt.s32.f32 %s2339_s18 }
  0xcc   :  { %s2350_s24 = sld [smem:[#allocation13 + $0x106]]  ;;  %s555_s27 = smax.f32 %s4022_s25, %s554_s26 }
  0xcd   :  { %s2353_s29 = sld [smem:[#allocation13 + $0x107]]  ;;  %v556_v9 = vstv %s555_s27 }
  0xce   :  { %s680_s4 = sadd.f32 %s3952_s3, %s3953_s11  ;;  %1903 = vrcp.f32 %v556_v9 }
  0xcf   :  { %4037 = sst [smem:[#allocation54_spill]] %s2345_s22  ;;  %s3961_s1 = scvt.s32.f32 %s2345_s22 }
  0xd0   :  { %s2360_s6 = sld [smem:[#allocation13 + $0x180]] }
  0xd1   :  { %s681_s23 = sadd.f32 %s680_s4, %s3955_s30 }
  0xd2   :  { %4038 = sst [smem:[#allocation55_spill]] %s2350_s24  ;;  %s3962_s12 = scvt.s32.f32 %s2350_s24 }
  0xd3   :  { %4039 = sst [smem:[#allocation56_spill]] %s2353_s29  ;;  %s3963_s16 = scvt.s32.f32 %s2353_s29 }
  0xd4   :  { %s2365_s26 = sld [smem:[#allocation13 + $0x181]] }
  0xd5   :  { %s682_s13 = sadd.f32 %s681_s23, %s3957_s28 }
  0xd6   :  { %4040 = sst [smem:[#allocation57_spill]] %s2360_s6  ;;  %s3969_s23 = scvt.s32.f32 %s2360_s6 }
  0xd7   :  { %s2370_s27 = sld [smem:[#allocation13 + $0x182]] }
  0xd8   :  { %s683_s3 = sadd.f32 %s682_s13, %s3959_s20 }
  0xd9   :  { %s2375_s11 = sld [smem:[#allocation13 + $0x183]] }
  0xda   :  { %4041 = sst [smem:[#allocation58_spill]] %s2365_s26  ;;  %s3968_s28 = scvt.s32.f32 %s2365_s26 }
  0xdb   :  { %s684_s4 = sadd.f32 %s683_s3, %s3961_s1  ;;  %v1904_v10 = vpop.eup %1903 }
  0xdc   :  { %s2380_s30 = sld [smem:[#allocation13 + $0x184]]  ;;  %1872 = vpush %v1904_v10 }
  0xdd   :  { %4042 = sst [smem:[#allocation59_spill]] %s2370_s27  ;;  %s3970_s20 = scvt.s32.f32 %s2370_s27 }
  0xde   :  { %s685_s8 = sadd.f32 %s684_s4, %s3962_s12 }
  0xdf   :  { %4043 = sst [smem:[#allocation60_spill]] %s2375_s11  ;;  %s3973_s4 = scvt.s32.f32 %s2375_s11 }
  0xe0   :  { %s2386_s7 = sld [smem:[#allocation13 + $0x185]] }
  0xe1   :  { %s686_s13 = sadd.f32 %s685_s8, %s3963_s16 }
  0xe2   :  { %4044 = sst [smem:[#allocation61_spill]] %s2380_s30  ;;  %s3974_s16 = scvt.s32.f32 %s2380_s30 }
  0xe3   :  { %s2391_s18 = sld [smem:[#allocation13 + $0x186]]  ;;  %s687_s3 = smax.f32 %s4022_s25, %s686_s13 }
  0xe4   :  { %s2394_s1 = sld [smem:[#allocation13 + $0x187]]  ;;  %v688_v11 = vstv %s687_s3 }
  0xe5   :  { %s812_s12 = sadd.f32 %s3968_s28, %s3969_s23  ;;  %1905 = vrcp.f32 %v688_v11  ;;  %s2416_s23 = spop %1866 }
  0xe6   :  { %4045 = sst [smem:[#allocation62_spill]] %s2386_s7  ;;  %s3978_s24 = scvt.s32.f32 %s2386_s7 }
  0xe7   :  { %s2401_s8 = sld [smem:[#allocation13 + $0x200]] }
  0xe8   :  { %s813_s29 = sadd.f32 %s812_s12, %s3970_s20  ;;  %s4056_s12 = scvt.s32.f32 %s2170_s14 }
  0xe9   :  { %4046 = sst [smem:[#allocation63_spill]] %s2391_s18 }
  0xea   :  { %4047 = sst [smem:[#allocation64_spill]] %s2394_s1  ;;  %s2439_s5 = smul.f32 %s2416_s23, %s4056_s12 }
  0xeb   :  { %s2406_s13 = sld [smem:[#allocation13 + $0x201]] }
  0xec   :  { %s814_s3 = sadd.f32 %s813_s29, %s3973_s4  ;;  %s4053_s4 = scvt.s32.f32 %s2168_s9  ;;  %v186_v28 = vstv %s2439_s5 }
  0xed   :  { %4048 = sst [smem:[#allocation65_spill]] %s2401_s8  ;;  %s4062_s12 = scvt.s32.f32 %s2401_s8 }
  0xee   :  { %s2412_s26 = sld [smem:[#allocation13 + $0x202]]  ;;  %s2429_s6 = smul.f32 %s2416_s23, %s4053_s4 }
  0xef   :  { %s815_s28 = sadd.f32 %s814_s3, %s3974_s16  ;;  %s4054_s3 = scvt.s32.f32 %s2391_s18 }
  0xf0   :  { %s2419_s20 = sld [smem:[#allocation13 + $0x203]]  ;;  %s4059_s4 = scvt.s32.f32 %s2172_s10  ;;  %v173_v23 = vstv %s2429_s6 }
  0xf1   :  { %4049 = sst [smem:[#allocation66_spill]] %s2406_s13  ;;  %s3982_s30 = scvt.s32.f32 %s2406_s13 }
  0xf2   :  { %s816_s27 = sadd.f32 %s815_s28, %s3978_s24  ;;  %s4057_s28 = scvt.s32.f32 %s2394_s1  ;;  %v1906_v12 = vpop.eup %1905 }
  0xf3   :  { %s2424_s29 = sld [smem:[#allocation13 + $0x204]]  ;;  %s2449_s18 = smul.f32 %s2416_s23, %s4059_s4  ;;  %1874 = vpush %v1906_v12 }
  0xf4   :  { %4050 = sst [smem:[#allocation67_spill]] %s2412_s26  ;;  %s3985_s9 = scvt.s32.f32 %s2412_s26 }
  0xf5   :  { %s817_s16 = sadd.f32 %s816_s27, %s4054_s3  ;;  %s4064_s4 = scvt.s32.f32 %s2174_s0 }
  0xf6   :  { %4051 = sst [smem:[#allocation68_spill]] %s2419_s20  ;;  %s4067_s13 = scvt.s32.f32 %s2419_s20 }
  0xf7   :  { %s2434_s22 = sld [smem:[#allocation13 + $0x205]]  ;;  %s2467_s1 = smul.f32 %s2416_s23, %s4064_s4 }
  0xf8   :  { %s818_s24 = sadd.f32 %s817_s16, %s4057_s28 }
  0xf9   :  { %4052 = sst [smem:[#allocation69_spill]] %s2424_s29 }
  0xfa   :  { %s2444_s11 = sld [smem:[#allocation13 + $0x206]]  ;;  %s819_s14 = smax.f32 %s4022_s25, %s818_s24 }
  0xfb   :  { %4060 = sst [smem:[#allocation72_spill]] %s2449_s18  ;;  %v820_v13 = vstv %s819_s14  ;;  %s4073_s14 = scvt.s32.f32 %s2178_s15 }
  0xfc   :  { %s2452_s27 = sld [smem:[#allocation13 + $0x207]]  ;;  %1907 = vrcp.f32 %v820_v13  ;;  %s4080_s15 = scvt.s32.f32 %s2184_s19 }
  0xfd   :  { %4055 = sst [smem:[#allocation70_spill]] %s2434_s22  ;;  %s2490_s7 = smul.f32 %s2416_s23, %s4073_s14 }
  0xfe   :  { %s944_s10 = sadd.f32 %s3982_s30, %s4062_s12  ;;  %s4068_s30 = scvt.s32.f32 %s2176_s2 }
  0xff   :  { %s2460_s28 = sld [smem:[#allocation13 + $0x280]]  ;;  %s4075_s20 = scvt.s32.f32 %s2434_s22 }
 0x100   :  { %4058 = sst [smem:[#allocation71_spill]] %s2444_s11  ;;  %s2477_s3 = smul.f32 %s2416_s23, %s4068_s30 }
 0x101   :  { %s945_s24 = sadd.f32 %s944_s10, %s3985_s9  ;;  %s3988_s26 = scvt.s32.f32 %s2444_s11 }
 0x102   :  { %4061 = sst [smem:[#allocation73_spill]] %s2452_s27  ;;  %s3989_s0 = scvt.s32.f32 %s2452_s27 }
 0x103   :  { %4065 = sst [smem:[#allocation75_spill]] %s2467_s1  ;;  %s4071_s10 = scvt.s32.f32 %s2424_s29 }
 0x104   :  { %s2470_s16 = sld [smem:[#allocation13 + $0x281]]  ;;  %s4077_s30 = scvt.s32.f32 %s2181_s17 }
 0x105   :  { %4063 = sst [smem:[#allocation74_spill]] %s2460_s28  ;;  %s3996_s18 = scvt.s32.f32 %s2460_s28 }
 0x106   :  { %s946_s12 = sadd.f32 %s945_s24, %s4067_s13  ;;  %s2500_s13 = smul.f32 %s2416_s23, %s4077_s30 }
 0x107   :  { %4069 = sst [smem:[#allocation77_spill]] %s2477_s3  ;;  %s2510_s14 = smul.f32 %s2416_s23, %s4080_s15 }
 0x108   :  { %s2480_s8 = sld [smem:[#allocation13 + $0x282]]  ;;  %s2517_s30 = spop %1868 }
 0x109   :  { %s947_s4 = sadd.f32 %s946_s12, %s4071_s10  ;;  %v1908_v14 = vpop.eup %1907  ;;  %s4085_s22 = scvt.s32.f32 %s2187_s21 }
 0x10a   :  { %4066 = sst [smem:[#allocation76_spill]] %s2470_s16  ;;  %s3995_s12 = scvt.s32.f32 %s2470_s16  ;;  %1876 = vpush %v1908_v14 }
 0x10b   :  { %s2485_s9 = sld [smem:[#allocation13 + $0x283]] }
 0x10c   :  { %4074 = sst [smem:[#allocation80_spill]] %s2490_s7 }
 0x10d   :  { %s948_s1 = sadd.f32 %s947_s4, %s4075_s20 }
 0x10e   :  { %4070 = sst [smem:[#allocation78_spill]] %s2480_s8  ;;  %s4084_s27 = scvt.s32.f32 %s2480_s8 }
 0x10f   :  { %s2495_s2 = sld [smem:[#allocation13 + $0x284]] }
 0x110   :  { %4078 = sst [smem:[#allocation82_spill]] %s2500_s13 }
 0x111   :  { %4072 = sst [smem:[#allocation79_spill]] %s2485_s9  ;;  %s4000_s23 = scvt.s32.f32 %s2485_s9 }
 0x112   :  { %s949_s24 = sadd.f32 %s948_s1, %s3988_s26 }
 0x113   :  { %s2505_s10 = sld [smem:[#allocation13 + $0x285]] }
 0x114   :  { %4081 = sst [smem:[#allocation84_spill]] %s2510_s14 }
 0x115   :  { %4076 = sst [smem:[#allocation81_spill]] %s2495_s2  ;;  %s4090_s7 = scvt.s32.f32 %s2495_s2 }
 0x116   :  { %s950_s20 = sadd.f32 %s949_s24, %s3989_s0 }
 0x117   :  { %s2515_s17 = sld [smem:[#allocation13 + $0x286]] }
 0x118   :  { %s4082_s1 = sld [smem:[#allocation26_spill]]  ;;  %s951_s19 = smax.f32 %s4022_s25, %s950_s20 }
 0x119   :  { %4079 = sst [smem:[#allocation83_spill]] %s2505_s10  ;;  %v952_v15 = vstv %s951_s19  ;;  %s2533_s20 = smul.f32 %s2517_s30, %s4085_s22 }
 0x11a   :  { %s2520_s26 = sld [smem:[#allocation13 + $0x287]]  ;;  %1909 = vrcp.f32 %v952_v15  ;;  %s4093_s9 = scvt.s32.f32 %s2505_s10 }
 0x11b   :  { %s1076_s24 = sadd.f32 %s3995_s12, %s3996_s18 }
 0x11c   :  { %s4083_s0 = sld [smem:[#allocation27_spill]] }
 0x11d   :  { %s163_s4 = sld [smem:[#allocation3]]  ;;  %s4096_s3 = scvt.s32.f32 %s2515_s17 }
 0x11e   :  { %s1077_s11 = sadd.f32 %s1076_s24, %s4084_s27  ;;  %s4087_s13 = scvt.s32.f32 %s4082_s1 }
 0x11f   :  { %4086 = sst [smem:[#allocation26_spill]] %s2533_s20 }
 0x120   :  { %s166_s14 = sld [smem:[#allocation7]]  ;;  %s2541_s12 = smul.f32 %s2517_s30, %s4087_s13 }
 0x121   :  { %s1078_s19 = sadd.f32 %s1077_s11, %s4000_s23  ;;  %s4099_s18 = scvt.s32.f32 %s2520_s26 }
 0x122   :  { %s4088_s28 = sld [smem:[#allocation28_spill]]  ;;  %s4094_s1 = scvt.s32.f32 %s4083_s0 }
 0x123   :  { %4089 = sst [smem:[#allocation27_spill]] %s2541_s12 }
 0x124   :  { %s1627_s15 = sld [smem:[#allocation3 + $0x1]]  ;;  %s2555_s23 = smul.f32 %s2517_s30, %s4094_s1 }
 0x125   :  { %s1079_s8 = sadd.f32 %s1078_s19, %s4090_s7 }
 0x126   :  { %s4091_s22 = sld [smem:[#allocation85_spill]] }
 0x127   :  { %s4092_s20 = sld [smem:[#allocation29_spill]]  ;;  %v1910_v22 = vpop.eup %1909 }
 0x128   :  { %s1628_s29 = sld [smem:[#allocation7 + $0x1]]  ;;  %s4098_s21 = scvt.s32.f32 %s4088_s28  ;;  %1878 = vpush %v1910_v22 }
 0x129   :  { %s1080_s11 = sadd.f32 %s1079_s8, %s4093_s9 }
 0x12a   :  { %s4095_s12 = sld [smem:[#allocation86_spill]]  ;;  %s2568_s10 = smul.f32 %s2517_s30, %s4098_s21 }
 0x12b   :  { %s1629_s2 = sld [smem:[#allocation3 + $0x2]] }
 0x12c   :  { %s164_s24 = scalar_lea.vmem %s4091_s22, %s163_s4  ;;  %s1081_s7 = sadd.f32 %s1080_s11, %s4096_s3 }
 0x12d   :  { %v165_v16 = vld [vmem:[%s164_s24] sm:$0x1]  ;;  %s4097_s27 = sld [smem:[#allocation87_spill]]  ;;  %s177_s0 = scalar_lea.vmem %s4091_s22, %s1627_s15 }
 0x12e   :  { %s1630_s24 = sld [smem:[#allocation7 + $0x2]]  ;;  %v178_v20 = vld [vmem:[%s177_s0] sm:$0x1]  ;;  %s4100_s1 = scvt.s32.f32 %s4092_s20 }
 0x12f   :  { %s2583_s11 = sld [smem:[#allocation3 + $0x3]] }
 0x130   :  { %s167_s16 = scalar_lea.vmem %s4095_s12, %s166_s14  ;;  %s1082_s14 = sadd.f32 %s1081_s7, %s4099_s18 }
 0x131   :  { %v168_v17 = vld [vmem:[%s167_s16] sm:$0x1]  ;;  %s2578_s13 = smul.f32 %s2517_s30, %s4100_s1  ;;  %s180_s28 = scalar_lea.vmem %s4095_s12, %s1628_s29 }
 0x132   :  { %v169_v19 = vadd.f32 %v168_v17, %v165_v16  ;;  %s4101_s19 = sld [smem:[#allocation30_spill]]  ;;  %s1083_s15 = smax.f32 %s4022_s25, %s1082_s14  ;;  %v181_v24 = vld [vmem:[%s180_s28] sm:$0x1] }
 0x133   :  { %v170_v18 = vld [vmem:[%s4097_s27] sm:$0x1]  ;;  %v183_v25 = vld [vmem:[%s4097_s27 + $0x1] sm:$0x1]  ;;  %s2590_s20 = sld [smem:[#allocation7 + $0x3]]  ;;  %v1084_v26 = vstv %s1083_s15  ;;  %v182_v27 = vadd.f32 %v181_v24, %v178_v20  ;;  %s190_s9 = scalar_lea.vmem %s4091_s22, %s1629_s2 }
 0x134   :  { %v171_v21 = vadd.f32 %v170_v18, %v169_v19  ;;  %s4102_s21 = sld [smem:[#allocation31_spill]]  ;;  %1911 = vrcp.f32 %v1084_v26  ;;  %v191_v29 = vld [vmem:[%s190_s9] sm:$0x1]  ;;  %s193_s3 = scalar_lea.vmem %s4095_s12, %s1630_s24  ;;  %v196_v33 = vld [vmem:[%s4097_s27 + $0x2] sm:$0x1] }
 0x135   :  { %s2595_s0 = sld [smem:[#allocation3 + $0x4]]  ;;  %v184_v31 = vadd.f32 %v183_v25, %v182_v27  ;;  %v194_v32 = vld [vmem:[%s193_s3] sm:$0x1]  ;;  %s203_s24 = scalar_lea.vmem %s4091_s22, %s2583_s11  ;;  %v209_v41 = vld [vmem:[%s4097_s27 + $0x3] sm:$0x1] }
 0x136   :  { %s4103_s25 = sld [smem:[#allocation72_spill]]  ;;  %v174_v30 = vmul.f32 %v173_v23, %v171_v21  ;;  %v195_v35 = vadd.f32 %v194_v32, %v191_v29  ;;  %v204_v37 = vld [vmem:[%s203_s24] sm:$0x1]  ;;  %v222_v47 = vld [vmem:[%s4097_s27 + $0x4] sm:$0x1] }
 0x137   :  { %s2598_s6 = sld [smem:[#allocation7 + $0x4]]  ;;  %v187_v34 = vmul.f32 %v186_v28, %v184_v31  ;;  %v235_v54 = vld [vmem:[%s4097_s27 + $0x5] sm:$0x1]  ;;  %v248_v61 = vld [vmem:[%s4097_s27 + $0x6] sm:$0x1] }
 0x138   :  { %s4104_s18 = scvt.s32.f32 %s4101_s19  ;;  %s2608_s2 = sld [smem:[#allocation3 + $0x5]]  ;;  %v197_v39 = vadd.f32 %v196_v33, %v195_v35  ;;  %v261_v7 = vld [vmem:[%s4097_s27 + $0x7] sm:$0x1]  ;;  %v302_v15 = vld [vmem:[%s4097_s27] sm:$0x1] }
 0x139   :  { %s2613_s5 = sld [smem:[#allocation7 + $0x5]]  ;;  %s206_s16 = scalar_lea.vmem %s4095_s12, %s2590_s20  ;;  %v188_v38 = vadd.f32 %v187_v34, %v174_v30  ;;  %v315_v23 = vld [vmem:[%s4097_s27 + $0x1] sm:$0x1]  ;;  %v328_v31 = vld [vmem:[%s4097_s27 + $0x2] sm:$0x1] }
 0x13a   :  { %s2603_s14 = smul.f32 %s2517_s30, %s4104_s18  ;;  %s4105_s19 = scvt.s32.f32 %s4102_s21  ;;  %v207_v40 = vld [vmem:[%s206_s16] sm:$0x1] }
 0x13b   :  { %s2624_s8 = sld [smem:[#allocation3 + $0x6]]  ;;  %v208_v42 = vadd.f32 %v207_v40, %v204_v37  ;;  %v331_v37 = vstv %s2555_s23 }
 0x13c   :  { %s2618_s7 = smul.f32 %s2517_s30, %s4105_s19  ;;  %s4106_s9 = sld [smem:[#allocation75_spill]]  ;;  %v199_v36 = vstv %s4103_s25 }
 0x13d   :  { %s2631_s21 = sld [smem:[#allocation7 + $0x6]]  ;;  %s216_s25 = scalar_lea.vmem %s4091_s22, %s2595_s0  ;;  %v200_v44 = vmul.f32 %v199_v36, %v197_v39  ;;  %v210_v48 = vadd.f32 %v209_v41, %v208_v42  ;;  %v341_v39 = vld [vmem:[%s4097_s27 + $0x3] sm:$0x1] }
 0x13e   :  { %s2640_s19 = sld [smem:[#allocation3 + $0x7]]  ;;  %v217_v43 = vld [vmem:[%s216_s25] sm:$0x1]  ;;  %s219_s24 = scalar_lea.vmem %s4095_s12, %s2598_s6 }
 0x13f   :  { %s4107_s4 = sld [smem:[#allocation77_spill]]  ;;  %v220_v46 = vld [vmem:[%s219_s24] sm:$0x1]  ;;  %s229_s28 = scalar_lea.vmem %s4091_s22, %s2608_s2  ;;  %v201_v51 = vadd.f32 %v200_v44, %v188_v38  ;;  %v344_v44 = vstv %s2568_s10 }
 0x140   :  { %s2646_s18 = sld [smem:[#allocation7 + $0x7]]  ;;  %v221_v49 = vadd.f32 %v220_v46, %v217_v43  ;;  %v230_v50 = vld [vmem:[%s229_s28] sm:$0x1]  ;;  %v354_v46 = vld [vmem:[%s4097_s27 + $0x4] sm:$0x1] }
 0x141   :  { %s2656_s11 = sld [smem:[#allocation3 + $0x80]]  ;;  %s242_s16 = scalar_lea.vmem %s4091_s22, %s2624_s8  ;;  %v1912_v4 = vpop.eup %1911 }
 0x142   :  { %v212_v45 = vstv %s4106_s9  ;;  %s4108_s6 = sld [smem:[#allocation80_spill]]  ;;  %s232_s9 = scalar_lea.vmem %s4095_s12, %s2613_s5  ;;  %v223_v56 = vadd.f32 %v222_v47, %v221_v49  ;;  %v243_v58 = vld [vmem:[%s242_s16] sm:$0x1]  ;;  %1880 = vpush %v1912_v4 }
 0x143   :  { %s2662_s20 = sld [smem:[#allocation7 + $0x80]]  ;;  %v233_v53 = vld [vmem:[%s232_s9] sm:$0x1]  ;;  %v213_v55 = vmul.f32 %v212_v45, %v210_v48  ;;  %s245_s28 = scalar_lea.vmem %s4095_s12, %s2631_s21 }
 0x144   :  { %s2672_s0 = sld [smem:[#allocation3 + $0x81]]  ;;  %v234_v57 = vadd.f32 %v233_v53, %v230_v50  ;;  %v246_v60 = vld [vmem:[%s245_s28] sm:$0x1]  ;;  %s255_s24 = scalar_lea.vmem %s4091_s22, %s2640_s19  ;;  %v357_v53 = vstv %s2578_s13 }
 0x145   :  { %v225_v52 = vstv %s4107_s4  ;;  %s4109_s4 = sld [smem:[#allocation82_spill]]  ;;  %v214_v62 = vadd.f32 %v213_v55, %v201_v51  ;;  %v247_v2 = vadd.f32 %v246_v60, %v243_v58  ;;  %v256_v3 = vld [vmem:[%s255_s24] sm:$0x1]  ;;  %v1206_v55 = vld [vmem:[#allocation15 + $0x68] sm:$0xff] }
 0x146   :  { %s2678_s15 = sld [smem:[#allocation7 + $0x81]]  ;;  %v226_v63 = vmul.f32 %v225_v52, %v223_v56  ;;  %v236_v0 = vadd.f32 %v235_v54, %v234_v57  ;;  %s258_s1 = scalar_lea.vmem %s4095_s12, %s2646_s18  ;;  %v367_v52 = vld [vmem:[%s4097_s27 + $0x5] sm:$0x1]  ;;  %1831 = vmatpush3.msra.mxu0 %v1206_v55 }
 0x147   :  { %s2688_s2 = sld [smem:[#allocation3 + $0x82]]  ;;  %v259_v6 = vld [vmem:[%s258_s1] sm:$0x1]  ;;  %s296_s9 = scalar_lea.vmem %s4091_s22, %s2656_s11  ;;  %v249_v10 = vadd.f32 %v248_v61, %v247_v2  ;;  %v380_v61 = vld [vmem:[%s4097_s27 + $0x6] sm:$0x1]  ;;  %1832 = vmatprep.subr.mxu0 %v2079_v1 }
 0x148   :  { %v238_v59 = vstv %s4108_s6  ;;  %s4110_s16 = sld [smem:[#allocation84_spill]]  ;;  %v227_v8 = vadd.f32 %v226_v63, %v214_v62  ;;  %v260_v11 = vadd.f32 %v259_v6, %v256_v3  ;;  %v297_v12 = vld [vmem:[%s296_s9] sm:$0x1]  ;;  %v370_v62 = vstv %s2603_s14 }
 0x149   :  { %s2694_s5 = sld [smem:[#allocation7 + $0x82]]  ;;  %v239_v9 = vmul.f32 %v238_v59, %v236_v0  ;;  %s299_s24 = scalar_lea.vmem %s4095_s12, %s2662_s20  ;;  %v1205_v0 = vld [vmem:[#allocation15 + $0x60] sm:$0xff] }
 0x14a   :  { %s2704_s8 = sld [smem:[#allocation3 + $0x83]]  ;;  %v300_v14 = vld [vmem:[%s299_s24] sm:$0x1]  ;;  %s309_s3 = scalar_lea.vmem %s4091_s22, %s2672_s0  ;;  %v262_v18 = vadd.f32 %v261_v7, %v260_v11  ;;  %v393_v7 = vld [vmem:[%s4097_s27 + $0x7] sm:$0x1]  ;;  %1833 = vmatpush3.msra.mxu0 %v1205_v0 }
 0x14b   :  { %v251_v5 = vstv %s4109_s4  ;;  %s4111_s18 = sld [smem:[#allocation26_spill]]  ;;  %v240_v16 = vadd.f32 %v239_v9, %v227_v8  ;;  %v301_v19 = vadd.f32 %v300_v14, %v297_v12  ;;  %v310_v20 = vld [vmem:[%s309_s3] sm:$0x1]  ;;  %v383_v8 = vstv %s2618_s7  ;;  %1834 = vmatprep.subr.mxu0 %v2079_v1 }
 0x14c   :  { %s2710_s21 = sld [smem:[#allocation7 + $0x83]]  ;;  %v252_v17 = vmul.f32 %v251_v5, %v249_v10  ;;  %s312_s9 = scalar_lea.vmem %s4095_s12, %s2678_s15  ;;  %v1204_v10 = vld [vmem:[#allocation15 + $0x58] sm:$0xff] }
 0x14d   :  { %s2720_s28 = sld [smem:[#allocation3 + $0x84]]  ;;  %v313_v22 = vld [vmem:[%s312_s9] sm:$0x1]  ;;  %s322_s6 = scalar_lea.vmem %s4091_s22, %s2688_s2  ;;  %v303_v26 = vadd.f32 %v302_v15, %v301_v19  ;;  %1835 = vmatpush3.msra.mxu0 %v1204_v10 }
 0x14e   :  { %v264_v13 = vstv %s4110_s16  ;;  %s4112_s20 = sld [smem:[#allocation27_spill]]  ;;  %v253_v24 = vadd.f32 %v252_v17, %v240_v16  ;;  %v314_v27 = vadd.f32 %v313_v22, %v310_v20  ;;  %v323_v28 = vld [vmem:[%s322_s6] sm:$0x1]  ;;  %1836 = vmatprep.subr.mxu0 %v2079_v1  ;;  %v1203_v17 = vld [vmem:[#allocation15 + $0x50] sm:$0xff] }
 0x14f   :  { %s2726_s4 = sld [smem:[#allocation7 + $0x84]]  ;;  %v265_v25 = vmul.f32 %v264_v13, %v262_v18  ;;  %s325_s19 = scalar_lea.vmem %s4095_s12, %s2694_s5  ;;  %v434_v22 = vld [vmem:[%s4097_s27] sm:$0x1]  ;;  %1837 = vmatpush3.msra.mxu0 %v1203_v17 }
 0x150   :  { %s2736_s1 = sld [smem:[#allocation3 + $0x85]]  ;;  %v326_v30 = vld [vmem:[%s325_s19] sm:$0x1]  ;;  %s335_s29 = scalar_lea.vmem %s4091_s22, %s2704_s8  ;;  %v316_v34 = vadd.f32 %v315_v23, %v314_v27  ;;  %1838 = vmatprep.subr.mxu0 %v2079_v1 }
 0x151   :  { %v305_v21 = vstv %s4111_s18  ;;  %s2742_s3 = sld [smem:[#allocation7 + $0x85]]  ;;  %v266_v32 = vadd.f32 %v265_v25, %v253_v24  ;;  %v327_v35 = vadd.f32 %v326_v30, %v323_v28  ;;  %v336_v36 = vld [vmem:[%s335_s29] sm:$0x1]  ;;  %s2812_s5 = spop %1870  ;;  %v1202_v24 = vld [vmem:[#allocation15 + $0x48] sm:$0xff]  ;;  %v1201_v25 = vld [vmem:[#allocation15 + $0x40] sm:$0xff] }
 0x152   :  { %s2752_s0 = sld [smem:[#allocation3 + $0x86]]  ;;  %v306_v33 = vmul.f32 %v305_v21, %v303_v26  ;;  %s338_s24 = scalar_lea.vmem %s4095_s12, %s2710_s21  ;;  %1839 = vmatpush3.msra.mxu0 %v1202_v24  ;;  %v525_v24 = vld [vmem:[%s4097_s27 + $0x7] sm:$0x1] }
 0x153   :  { %s2758_s11 = sld [smem:[#allocation7 + $0x86]]  ;;  %v339_v38 = vld [vmem:[%s338_s24] sm:$0x1]  ;;  %s348_s25 = scalar_lea.vmem %s4091_s22, %s2720_s28  ;;  %267 = vst [vmem:[#allocation2] sm:$0x1] %v266_v32  ;;  %v329_v41 = vadd.f32 %v328_v31, %v327_v35  ;;  %1840 = vmatprep.subr.mxu0 %v2079_v1 }
 0x154   :  { %v318_v29 = vstv %s4112_s20  ;;  %s4113_s6 = sld [smem:[#allocation32_spill]]  ;;  %v340_v42 = vadd.f32 %v339_v38, %v336_v36  ;;  %v349_v43 = vld [vmem:[%s348_s25] sm:$0x1]  ;;  %1841 = vmatpush3.msra.mxu0 %v1201_v25 }
 0x155   :  { %s2768_s2 = sld [smem:[#allocation3 + $0x87]]  ;;  %v319_v40 = vmul.f32 %v318_v29, %v316_v34  ;;  %s351_s16 = scalar_lea.vmem %s4095_s12, %s2726_s4  ;;  %v332_v48 = vmul.f32 %v331_v37, %v329_v41  ;;  %v447_v29 = vld [vmem:[%s4097_s27 + $0x1] sm:$0x1]  ;;  %v460_v37 = vld [vmem:[%s4097_s27 + $0x2] sm:$0x1]  ;;  %1842 = vmatprep.subr.mxu0 %v2079_v1 }
 0x156   :  { %s2774_s9 = sld [smem:[#allocation7 + $0x87]]  ;;  %v352_v45 = vld [vmem:[%s351_s16] sm:$0x1]  ;;  %s361_s24 = scalar_lea.vmem %s4091_s22, %s2736_s1  ;;  %v342_v49 = vadd.f32 %v341_v39, %v340_v42 }
 0x157   :  { %v320_v47 = vadd.f32 %v319_v40, %v306_v33  ;;  %v353_v50 = vadd.f32 %v352_v45, %v349_v43  ;;  %v362_v51 = vld [vmem:[%s361_s24] sm:$0x1]  ;;  %s364_s18 = scalar_lea.vmem %s4095_s12, %s2742_s3  ;;  %s2796_s23 = sld [smem:[#allocation10]]  ;;  %v1199_v40 = vld [vmem:[#allocation15 + $0x30] sm:$0xff] }
 0x158   :  { %v365_v54 = vld [vmem:[%s364_s18] sm:$0x1]  ;;  %s2803_s21 = sld [smem:[#allocation12]]  ;;  %v345_v57 = vmul.f32 %v344_v44, %v342_v49 }
 0x159   :  { %v333_v56 = vadd.f32 %v332_v48, %v320_v47  ;;  %v355_v58 = vadd.f32 %v354_v46, %v353_v50  ;;  %v366_v59 = vadd.f32 %v365_v54, %v362_v51  ;;  %s377_s29 = scalar_lea.vmem %s4095_s12, %s2758_s11  ;;  %s4115_s24 = sld [smem:[#allocation33_spill]]  ;;  %v1200_v33 = vld [vmem:[#allocation15 + $0x38] sm:$0xff]  ;;  %v1198_v46 = vld [vmem:[#allocation15 + $0x28] sm:$0xff] }
 0x15a   :  { %s4114_s8 = scvt.s32.f32 %s4113_s6  ;;  %s374_s6 = scalar_lea.vmem %s4091_s22, %s2752_s0  ;;  %v378_v63 = vld [vmem:[%s377_s29] sm:$0x1]  ;;  %1843 = vmatpush3.msra.mxu0 %v1200_v33  ;;  %v473_v50 = vld [vmem:[%s4097_s27 + $0x3] sm:$0x1] }
 0x15b   :  { %v375_v60 = vld [vmem:[%s374_s6] sm:$0x1]  ;;  %s2819_s4 = sld [smem:[#allocation10 + $0x1]]  ;;  %v346_v2 = vadd.f32 %v345_v57, %v333_v56  ;;  %v358_v3 = vmul.f32 %v357_v53, %v355_v58  ;;  %v368_v4 = vadd.f32 %v367_v52, %v366_v59  ;;  %1844 = vmatprep.subr.mxu0 %v2079_v1  ;;  %v1197_v53 = vld [vmem:[#allocation15 + $0x20] sm:$0xff]  ;;  %v486_v58 = vld [vmem:[%s4097_s27 + $0x4] sm:$0x1] }
 0x15c   :  { %s2787_s15 = smul.f32 %s2517_s30, %s4114_s8  ;;  %s387_s8 = scalar_lea.vmem %s4091_s22, %s2768_s2  ;;  %v379_v5 = vadd.f32 %v378_v63, %v375_v60  ;;  %1845 = vmatpush3.msra.mxu0 %v1199_v40 }
 0x15d   :  { %v388_v6 = vld [vmem:[%s387_s8] sm:$0x1]  ;;  %s390_s10 = scalar_lea.vmem %s4095_s12, %s2774_s9  ;;  %s2829_s2 = sld [smem:[#allocation12 + $0x1]]  ;;  %v359_v11 = vadd.f32 %v358_v3, %v346_v2  ;;  %v371_v12 = vmul.f32 %v370_v62, %v368_v4  ;;  %1846 = vmatprep.subr.mxu0 %v2079_v1  ;;  %v499_v2 = vld [vmem:[%s4097_s27 + $0x5] sm:$0x1] }
 0x15e   :  { %s4116_s25 = sld [smem:[#allocation34_spill]]  ;;  %v391_v9 = vld [vmem:[%s390_s10] sm:$0x1]  ;;  %v381_v13 = vadd.f32 %v380_v61, %v379_v5  ;;  %s428_s7 = scalar_lea.vmem %s4091_s22, %s2796_s23  ;;  %v396_v15 = vstv %s2787_s15  ;;  %1847 = vmatpush3.msra.mxu0 %v1198_v46 }
 0x15f   :  { %s4117_s30 = scvt.s32.f32 %s4115_s24  ;;  %s2837_s6 = sld [smem:[#allocation10 + $0x2]]  ;;  %v392_v14 = vadd.f32 %v391_v9, %v388_v6  ;;  %v429_v16 = vld [vmem:[%s428_s7] sm:$0x1]  ;;  %v372_v18 = vadd.f32 %v371_v12, %v359_v11  ;;  %1848 = vmatprep.subr.mxu0 %v2079_v1  ;;  %v1195_v6 = vld [vmem:[#allocation15 + $0x10] sm:$0xff]  ;;  %v512_v9 = vld [vmem:[%s4097_s27 + $0x6] sm:$0x1] }
 0x160   :  { %s4118_s9 = sld [smem:[#allocation35_spill]]  ;;  %s431_s0 = scalar_lea.vmem %s4095_s12, %s2803_s21  ;;  %v384_v19 = vmul.f32 %v383_v8, %v381_v13  ;;  %v1196_v61 = vld [vmem:[#allocation15 + $0x18] sm:$0xff]  ;;  %1849 = vmatpush3.msra.mxu0 %v1197_v53 }
 0x161   :  { %s2835_s1 = smul.f32 %s2812_s5, %s4117_s30  ;;  %s2844_s29 = sld [smem:[#allocation12 + $0x2]]  ;;  %v394_v20 = vadd.f32 %v393_v7, %v392_v14  ;;  %v432_v21 = vld [vmem:[%s431_s0] sm:$0x1]  ;;  %1850 = vmatprep.subr.mxu0 %v2079_v1  ;;  %v1194_v14 = vld [vmem:[#allocation15 + $0x8] sm:$0xff]  ;;  %v605_v53 = vld [vmem:[%s4097_s27 + $0x3] sm:$0x1] }
 0x162   :  { %s2865_s14 = sld [smem:[#allocation10 + $0x3]]  ;;  %v433_v23 = vadd.f32 %v432_v21, %v429_v16  ;;  %s441_s18 = scalar_lea.vmem %s4091_s22, %s2819_s4  ;;  %v385_v26 = vadd.f32 %v384_v19, %v372_v18  ;;  %1851 = vmatpush3.msra.mxu0 %v1196_v61 }
 0x163   :  { %s2871_s19 = sld [smem:[#allocation12 + $0x3]]  ;;  %v397_v27 = vmul.f32 %v396_v15, %v394_v20  ;;  %v442_v28 = vld [vmem:[%s441_s18] sm:$0x1]  ;;  %v437_v31 = vstv %s2835_s1  ;;  %1852 = vmatprep.subr.mxu0 %v2079_v1  ;;  %v1193_v20 = vld [vmem:[#allocation15] sm:$0xff] }
 0x164   :  { %s4119_s20 = scvt.s32.f32 %s4116_s25  ;;  %s2881_s4 = sld [smem:[#allocation10 + $0x4]]  ;;  %v435_v30 = vadd.f32 %v434_v22, %v433_v23  ;;  %1853 = vmatpush3.msra.mxu0 %v1195_v6  ;;  %v631_v6 = vld [vmem:[%s4097_s27 + $0x5] sm:$0x1] }
 0x165   :  { %s4121_s7 = sld [smem:[#allocation36_spill]]  ;;  %s454_s0 = scalar_lea.vmem %s4091_s22, %s2837_s6  ;;  %v398_v34 = vadd.f32 %v397_v27, %v385_v26  ;;  %1854 = vmatprep.subr.mxu0 %v2079_v1 }
 0x166   :  { %s2854_s24 = smul.f32 %s2812_s5, %s4119_s20  ;;  %s4120_s15 = scvt.s32.f32 %s4118_s9  ;;  %v455_v36 = vld [vmem:[%s454_s0] sm:$0x1]  ;;  %v438_v41 = vmul.f32 %v437_v31, %v435_v30  ;;  %1855 = vmatpush3.msra.mxu0 %v1194_v14 }
 0x167   :  { %s444_s9 = scalar_lea.vmem %s4095_s12, %s2829_s2  ;;  %s4122_s13 = sld [smem:[#allocation37_spill]]  ;;  %399 = vst [vmem:[#allocation2 + $0x1] sm:$0x1] %v398_v34  ;;  %1856 = vmatprep.subr.mxu0 %v2079_v1  ;;  %v566_v1 = vld [vmem:[%s4097_s27] sm:$0x1] }
 0x168   :  { %s2863_s11 = smul.f32 %s2812_s5, %s4120_s15  ;;  %v445_v32 = vld [vmem:[%s444_s9] sm:$0x1]  ;;  %s2889_s20 = sld [smem:[#allocation12 + $0x4]]  ;;  %v450_v38 = vstv %s2854_s24  ;;  %1857 = vmatpush3.msra.mxu0 %v1193_v20 }
 0x169   :  { %v446_v35 = vadd.f32 %v445_v32, %v442_v28  ;;  %s457_s8 = scalar_lea.vmem %s4095_s12, %s2844_s29  ;;  %s2911_s30 = sld [smem:[#allocation10 + $0x5]] }
 0x16a   :  { %v458_v39 = vld [vmem:[%s457_s8] sm:$0x1]  ;;  %s467_s3 = scalar_lea.vmem %s4091_s22, %s2865_s14  ;;  %s2918_s16 = sld [smem:[#allocation12 + $0x5]]  ;;  %v463_v44 = vstv %s2863_s11 }
 0x16b   :  { %s4123_s6 = scvt.s32.f32 %s4121_s7  ;;  %v448_v42 = vadd.f32 %v447_v29, %v446_v35  ;;  %v459_v43 = vadd.f32 %v458_v39, %v455_v36  ;;  %s4125_s24 = sld [smem:[#allocation38_spill]]  ;;  %v468_v45 = vld [vmem:[%s467_s3] sm:$0x1] }
 0x16c   :  { %s470_s2 = scalar_lea.vmem %s4095_s12, %s2871_s19  ;;  %s2925_s28 = sld [smem:[#allocation10 + $0x6]] }
 0x16d   :  { %s2903_s10 = smul.f32 %s2812_s5, %s4123_s6  ;;  %s4124_s18 = scvt.s32.f32 %s4122_s13  ;;  %v451_v47 = vmul.f32 %v450_v38, %v448_v42  ;;  %v461_v48 = vadd.f32 %v460_v37, %v459_v43  ;;  %v471_v49 = vld [vmem:[%s470_s2] sm:$0x1]  ;;  %v579_v38 = vld [vmem:[%s4097_s27 + $0x1] sm:$0x1] }
 0x16e   :  { %s4126_s11 = sld [smem:[#allocation39_spill]]  ;;  %s480_s8 = scalar_lea.vmem %s4091_s22, %s2881_s4  ;;  %v472_v51 = vadd.f32 %v471_v49, %v468_v45 }
 0x16f   :  { %s2909_s25 = smul.f32 %s2812_s5, %s4124_s18  ;;  %s2935_s19 = sld [smem:[#allocation12 + $0x6]]  ;;  %v481_v52 = vld [vmem:[%s480_s8] sm:$0x1]  ;;  %v452_v54 = vadd.f32 %v451_v47, %v438_v41  ;;  %v464_v55 = vmul.f32 %v463_v44, %v461_v48  ;;  %v476_v56 = vstv %s2903_s10  ;;  %v592_v47 = vld [vmem:[%s4097_s27 + $0x2] sm:$0x1] }
 0x170   :  { %s483_s6 = scalar_lea.vmem %s4095_s12, %s2889_s20  ;;  %s2956_s20 = sld [smem:[#allocation10 + $0x7]]  ;;  %v474_v59 = vadd.f32 %v473_v50, %v472_v51 }
 0x171   :  { %s4127_s18 = scvt.s32.f32 %s4125_s24  ;;  %v484_v57 = vld [vmem:[%s483_s6] sm:$0x1]  ;;  %s493_s2 = scalar_lea.vmem %s4091_s22, %s2911_s30  ;;  %v465_v62 = vadd.f32 %v464_v55, %v452_v54  ;;  %v489_v63 = vstv %s2909_s25 }
 0x172   :  { %v485_v60 = vadd.f32 %v484_v57, %v481_v52  ;;  %s2962_s14 = sld [smem:[#allocation12 + $0x7]]  ;;  %v494_v0 = vld [vmem:[%s493_s2] sm:$0x1]  ;;  %s2973_s8 = spop %1872  ;;  %v477_v3 = vmul.f32 %v476_v56, %v474_v59 }
 0x173   :  { %s2944_s29 = smul.f32 %s2812_s5, %s4127_s18  ;;  %s4129_s30 = sld [smem:[#allocation40_spill]] }
 0x174   :  { %s4128_s3 = scvt.s32.f32 %s4126_s11  ;;  %s496_s11 = scalar_lea.vmem %s4095_s12, %s2918_s16  ;;  %v487_v4 = vadd.f32 %v486_v58, %v485_v60  ;;  %v478_v10 = vadd.f32 %v477_v3, %v465_v62  ;;  %v618_v62 = vld [vmem:[%s4097_s27 + $0x4] sm:$0x1] }
 0x175   :  { %v497_v5 = vld [vmem:[%s496_s11] sm:$0x1]  ;;  %s506_s21 = scalar_lea.vmem %s4091_s22, %s2925_s28  ;;  %s2979_s6 = sld [smem:[#allocation10 + $0x80]]  ;;  %v502_v12 = vstv %s2944_s29 }
 0x176   :  { %s2954_s7 = smul.f32 %s2812_s5, %s4128_s3  ;;  %v498_v7 = vadd.f32 %v497_v5, %v494_v0  ;;  %v507_v8 = vld [vmem:[%s506_s21] sm:$0x1]  ;;  %s509_s4 = scalar_lea.vmem %s4095_s12, %s2935_s19  ;;  %v490_v11 = vmul.f32 %v489_v63, %v487_v4 }
 0x177   :  { %s2989_s24 = sld [smem:[#allocation12 + $0x80]]  ;;  %v510_v13 = vld [vmem:[%s509_s4] sm:$0x1]  ;;  %s519_s23 = scalar_lea.vmem %s4091_s22, %s2956_s20 }
 0x178   :  { %s4130_s28 = sld [smem:[#allocation41_spill]]  ;;  %v500_v15 = vadd.f32 %v499_v2, %v498_v7  ;;  %v511_v16 = vadd.f32 %v510_v13, %v507_v8  ;;  %v491_v17 = vadd.f32 %v490_v11, %v478_v10  ;;  %v515_v18 = vstv %s2954_s7  ;;  %v520_v19 = vld [vmem:[%s519_s23] sm:$0x1] }
 0x179   :  { %s4131_s13 = scvt.s32.f32 %s4129_s30  ;;  %s2997_s10 = sld [smem:[#allocation10 + $0x81]] }
 0x17a   :  { %s4132_s19 = sld [smem:[#allocation42_spill]]  ;;  %s522_s30 = scalar_lea.vmem %s4095_s12, %s2962_s14  ;;  %v503_v21 = vmul.f32 %v502_v12, %v500_v15  ;;  %v513_v22 = vadd.f32 %v512_v9, %v511_v16  ;;  %v644_v15 = vld [vmem:[%s4097_s27 + $0x6] sm:$0x1] }
 0x17b   :  { %s2995_s2 = smul.f32 %s2812_s5, %s4131_s13  ;;  %s3004_s1 = sld [smem:[#allocation12 + $0x81]]  ;;  %v523_v23 = vld [vmem:[%s522_s30] sm:$0x1] }
 0x17c   :  { %s3025_s18 = sld [smem:[#allocation10 + $0x82]]  ;;  %v524_v25 = vadd.f32 %v523_v23, %v520_v19  ;;  %s560_s9 = scalar_lea.vmem %s4091_s22, %s2979_s6  ;;  %v504_v26 = vadd.f32 %v503_v21, %v491_v17  ;;  %v516_v27 = vmul.f32 %v515_v18, %v513_v22  ;;  %v657_v22 = vld [vmem:[%s4097_s27 + $0x7] sm:$0x1] }
 0x17d   :  { %s3031_s3 = sld [smem:[#allocation12 + $0x82]]  ;;  %v528_v28 = vstv %s2995_s2  ;;  %v561_v29 = vld [vmem:[%s560_s9] sm:$0x1]  ;;  %s563_s0 = scalar_lea.vmem %s4095_s12, %s2989_s24 }
 0x17e   :  { %s4133_s15 = scvt.s32.f32 %s4130_s28  ;;  %s4135_s28 = sld [smem:[#allocation43_spill]]  ;;  %v526_v30 = vadd.f32 %v525_v24, %v524_v25  ;;  %v564_v31 = vld [vmem:[%s563_s0] sm:$0x1]  ;;  %v517_v32 = vadd.f32 %v516_v27, %v504_v26 }
 0x17f   :  { %s3039_s11 = sld [smem:[#allocation10 + $0x83]]  ;;  %s573_s2 = scalar_lea.vmem %s4091_s22, %s2997_s10  ;;  %v565_v33 = vadd.f32 %v564_v31, %v561_v29  ;;  %v698_v31 = vld [vmem:[%s4097_s27] sm:$0x1] }
 0x180   :  { %s3014_s25 = smul.f32 %s2973_s8, %s4133_s15  ;;  %s4134_s7 = scvt.s32.f32 %s4132_s19  ;;  %v574_v34 = vld [vmem:[%s573_s2] sm:$0x1]  ;;  %v529_v35 = vmul.f32 %v528_v28, %v526_v30 }
 0x181   :  { %s4136_s23 = sld [smem:[#allocation44_spill]]  ;;  %s576_s21 = scalar_lea.vmem %s4095_s12, %s3004_s1  ;;  %v567_v39 = vadd.f32 %v566_v1, %v565_v33 }
 0x182   :  { %s3023_s16 = smul.f32 %s2973_s8, %s4134_s7  ;;  %s3048_s15 = sld [smem:[#allocation12 + $0x83]]  ;;  %v569_v36 = vstv %s3014_s25  ;;  %v577_v37 = vld [vmem:[%s576_s21] sm:$0x1]  ;;  %v530_v41 = vadd.f32 %v529_v35, %v517_v32 }
 0x183   :  { %s3068_s19 = sld [smem:[#allocation10 + $0x84]]  ;;  %v578_v40 = vadd.f32 %v577_v37, %v574_v34  ;;  %s589_s29 = scalar_lea.vmem %s4095_s12, %s3031_s3  ;;  %v570_v44 = vmul.f32 %v569_v36, %v567_v39 }
 0x184   :  { %s4137_s7 = scvt.s32.f32 %s4135_s28  ;;  %s586_s28 = scalar_lea.vmem %s4091_s22, %s3025_s18  ;;  %v582_v42 = vstv %s3023_s16  ;;  %v590_v46 = vld [vmem:[%s589_s29] sm:$0x1]  ;;  %531 = vst [vmem:[#allocation2 + $0x2] sm:$0x1] %v530_v41 }
 0x185   :  { %s3074_s6 = sld [smem:[#allocation12 + $0x84]]  ;;  %v587_v43 = vld [vmem:[%s586_s28] sm:$0x1]  ;;  %v580_v45 = vadd.f32 %v579_v38, %v578_v40  ;;  %s599_s16 = scalar_lea.vmem %s4091_s22, %s3039_s11  ;;  %v711_v38 = vld [vmem:[%s4097_s27 + $0x1] sm:$0x1] }
 0x186   :  { %s3057_s14 = smul.f32 %s2973_s8, %s4137_s7  ;;  %s4139_s25 = sld [smem:[#allocation45_spill]]  ;;  %v591_v48 = vadd.f32 %v590_v46, %v587_v43  ;;  %v600_v49 = vld [vmem:[%s599_s16] sm:$0x1] }
 0x187   :  { %s4138_s10 = scvt.s32.f32 %s4136_s23  ;;  %s3081_s30 = sld [smem:[#allocation10 + $0x85]]  ;;  %v583_v50 = vmul.f32 %v582_v42, %v580_v45 }
 0x188   :  { %s4140_s2 = sld [smem:[#allocation46_spill]]  ;;  %s602_s9 = scalar_lea.vmem %s4095_s12, %s3048_s15  ;;  %v595_v51 = vstv %s3057_s14  ;;  %v593_v54 = vadd.f32 %v592_v47, %v591_v48 }
 0x189   :  { %s3066_s13 = smul.f32 %s2973_s8, %s4138_s10  ;;  %s3090_s7 = sld [smem:[#allocation12 + $0x85]]  ;;  %v603_v52 = vld [vmem:[%s602_s9] sm:$0x1]  ;;  %v584_v56 = vadd.f32 %v583_v50, %v570_v44  ;;  %v724_v44 = vld [vmem:[%s4097_s27 + $0x2] sm:$0x1] }
 0x18a   :  { %s3110_s5 = sld [smem:[#allocation10 + $0x86]]  ;;  %v604_v55 = vadd.f32 %v603_v52, %v600_v49  ;;  %v596_v59 = vmul.f32 %v595_v51, %v593_v54  ;;  %s3165_s3 = spop %1874 }
 0x18b   :  { %s4143_s18 = sld [smem:[#allocation47_spill]]  ;;  %v608_v57 = vstv %s3066_s13  ;;  %s615_s20 = scalar_lea.vmem %s4095_s12, %s3074_s6 }
 0x18c   :  { %s4141_s10 = scvt.s32.f32 %s4139_s25  ;;  %s612_s25 = scalar_lea.vmem %s4091_s22, %s3068_s19  ;;  %v606_v60 = vadd.f32 %v605_v53, %v604_v55  ;;  %v616_v61 = vld [vmem:[%s615_s20] sm:$0x1]  ;;  %v597_v2 = vadd.f32 %v596_v59, %v584_v56  ;;  %v737_v53 = vld [vmem:[%s4097_s27 + $0x3] sm:$0x1] }
 0x18d   :  { %s3116_s14 = sld [smem:[#allocation12 + $0x86]]  ;;  %v613_v58 = vld [vmem:[%s612_s25] sm:$0x1]  ;;  %s625_s13 = scalar_lea.vmem %s4091_s22, %s3081_s30 }
 0x18e   :  { %s3099_s0 = smul.f32 %s2973_s8, %s4141_s10  ;;  %s4142_s11 = scvt.s32.f32 %s4140_s2  ;;  %v617_v63 = vadd.f32 %v616_v61, %v613_v58  ;;  %v626_v0 = vld [vmem:[%s625_s13] sm:$0x1]  ;;  %v609_v3 = vmul.f32 %v608_v57, %v606_v60  ;;  %v750_v60 = vld [vmem:[%s4097_s27 + $0x4] sm:$0x1] }
 0x18f   :  { %s3123_s21 = sld [smem:[#allocation10 + $0x87]]  ;;  %s628_s28 = scalar_lea.vmem %s4095_s12, %s3090_s7 }
 0x190   :  { %s3108_s23 = smul.f32 %s2973_s8, %s4142_s11  ;;  %s4144_s16 = sld [smem:[#allocation48_spill]]  ;;  %v621_v4 = vstv %s3099_s0  ;;  %v629_v5 = vld [vmem:[%s628_s28] sm:$0x1]  ;;  %v619_v7 = vadd.f32 %v618_v62, %v617_v63  ;;  %v610_v9 = vadd.f32 %v609_v3, %v597_v2 }
 0x191   :  { %s3132_s10 = sld [smem:[#allocation12 + $0x87]]  ;;  %s4145_s11 = scvt.s32.f32 %s4143_s18  ;;  %v630_v8 = vadd.f32 %v629_v5, %v626_v0 }
 0x192   :  { %s3152_s24 = sld [smem:[#allocation10 + $0x100]]  ;;  %s638_s20 = scalar_lea.vmem %s4091_s22, %s3110_s5  ;;  %v634_v10 = vstv %s3108_s23  ;;  %v622_v12 = vmul.f32 %v621_v4, %v619_v7 }
 0x193   :  { %s3141_s29 = smul.f32 %s2973_s8, %s4145_s11  ;;  %s3158_s19 = sld [smem:[#allocation12 + $0x100]]  ;;  %v639_v11 = vld [vmem:[%s638_s20] sm:$0x1]  ;;  %v632_v13 = vadd.f32 %v631_v6, %v630_v8  ;;  %v763_v6 = vld [vmem:[%s4097_s27 + $0x5] sm:$0x1] }
 0x194   :  { %s4147_s4 = sld [smem:[#allocation49_spill]]  ;;  %v623_v18 = vadd.f32 %v622_v12, %v610_v9 }
 0x195   :  { %s651_s23 = scalar_lea.vmem %s4091_s22, %s3123_s21  ;;  %s3174_s1 = sld [smem:[#allocation10 + $0x101]]  ;;  %v635_v19 = vmul.f32 %v634_v10, %v632_v13  ;;  %v647_v20 = vstv %s3141_s29  ;;  %v776_v13 = vld [vmem:[%s4097_s27 + $0x6] sm:$0x1] }
 0x196   :  { %s4146_s30 = scvt.s32.f32 %s4144_s16  ;;  %v652_v17 = vld [vmem:[%s651_s23] sm:$0x1]  ;;  %s3180_s15 = sld [smem:[#allocation12 + $0x101]] }
 0x197   :  { %s654_s11 = scalar_lea.vmem %s4095_s12, %s3132_s10  ;;  %s4148_s25 = sld [smem:[#allocation50_spill]]  ;;  %v636_v25 = vadd.f32 %v635_v19, %v623_v18 }
 0x198   :  { %s3150_s2 = smul.f32 %s2973_s8, %s4146_s30  ;;  %s641_s8 = scalar_lea.vmem %s4095_s12, %s3116_s14  ;;  %v655_v21 = vld [vmem:[%s654_s11] sm:$0x1] }
 0x199   :  { %v642_v14 = vld [vmem:[%s641_s8] sm:$0x1]  ;;  %s4150_s18 = sld [smem:[#allocation51_spill]]  ;;  %v656_v24 = vadd.f32 %v655_v21, %v652_v17  ;;  %s692_s8 = scalar_lea.vmem %s4091_s22, %s3152_s24 }
 0x19a   :  { %v643_v16 = vadd.f32 %v642_v14, %v639_v11  ;;  %s4149_s7 = scvt.s32.f32 %s4147_s4  ;;  %s3191_s0 = sld [smem:[#allocation10 + $0x102]]  ;;  %v660_v26 = vstv %s3150_s2  ;;  %v693_v27 = vld [vmem:[%s692_s8] sm:$0x1] }
 0x19b   :  { %s3197_s29 = sld [smem:[#allocation12 + $0x102]]  ;;  %s695_s13 = scalar_lea.vmem %s4095_s12, %s3158_s19  ;;  %v658_v29 = vadd.f32 %v657_v22, %v656_v24  ;;  %v789_v22 = vld [vmem:[%s4097_s27 + $0x7] sm:$0x1] }
 0x19c   :  { %s3189_s20 = smul.f32 %s3165_s3, %s4149_s7  ;;  %v645_v23 = vadd.f32 %v644_v15, %v643_v16  ;;  %v696_v30 = vld [vmem:[%s695_s13] sm:$0x1]  ;;  %s3217_s28 = sld [smem:[#allocation10 + $0x103]] }
 0x19d   :  { %s4151_s5 = scvt.s32.f32 %s4148_s25  ;;  %v697_v1 = vadd.f32 %v696_v30, %v693_v27  ;;  %s705_s25 = scalar_lea.vmem %s4091_s22, %s3174_s1  ;;  %v661_v33 = vmul.f32 %v660_v26, %v658_v29  ;;  %v830_v30 = vld [vmem:[%s4097_s27] sm:$0x1] }
 0x19e   :  { %v648_v28 = vmul.f32 %v647_v20, %v645_v23  ;;  %s3223_s30 = sld [smem:[#allocation12 + $0x103]]  ;;  %v706_v34 = vld [vmem:[%s705_s25] sm:$0x1]  ;;  %s708_s10 = scalar_lea.vmem %s4095_s12, %s3180_s15  ;;  %v701_v36 = vstv %s3189_s20 }
 0x19f   :  { %s3207_s6 = smul.f32 %s3165_s3, %s4151_s5  ;;  %s4152_s24 = scvt.s32.f32 %s4150_s18  ;;  %v699_v35 = vadd.f32 %v698_v31, %v697_v1  ;;  %v709_v37 = vld [vmem:[%s708_s10] sm:$0x1] }
 0x1a0   :  { %s4153_s21 = sld [smem:[#allocation52_spill]]  ;;  %v649_v32 = vadd.f32 %v648_v28, %v636_v25  ;;  %s718_s5 = scalar_lea.vmem %s4091_s22, %s3191_s0  ;;  %v710_v40 = vadd.f32 %v709_v37, %v706_v34 }
 0x1a1   :  { %s3215_s2 = smul.f32 %s3165_s3, %s4152_s24  ;;  %s4154_s16 = sld [smem:[#allocation53_spill]]  ;;  %v719_v41 = vld [vmem:[%s718_s5] sm:$0x1]  ;;  %v714_v42 = vstv %s3207_s6  ;;  %v702_v45 = vmul.f32 %v701_v36, %v699_v35  ;;  %v843_v36 = vld [vmem:[%s4097_s27 + $0x1] sm:$0x1] }
 0x1a2   :  { %s3229_s8 = sld [smem:[#allocation10 + $0x104]]  ;;  %v662_v39 = vadd.f32 %v661_v33, %v649_v32  ;;  %s721_s20 = scalar_lea.vmem %s4095_s12, %s3197_s29  ;;  %v712_v46 = vadd.f32 %v711_v38, %v710_v40 }
 0x1a3   :  { %s3239_s23 = sld [smem:[#allocation12 + $0x104]]  ;;  %v722_v43 = vld [vmem:[%s721_s20] sm:$0x1]  ;;  %s731_s10 = scalar_lea.vmem %s4091_s22, %s3217_s28  ;;  %v727_v48 = vstv %s3215_s2 }
 0x1a4   :  { %s3259_s18 = sld [smem:[#allocation10 + $0x105]]  ;;  %663 = vst [vmem:[#allocation2 + $0x3] sm:$0x1] %v662_v39  ;;  %v723_v47 = vadd.f32 %v722_v43, %v719_v41  ;;  %v732_v49 = vld [vmem:[%s731_s10] sm:$0x1]  ;;  %s734_s9 = scalar_lea.vmem %s4095_s12, %s3223_s30  ;;  %v715_v50 = vmul.f32 %v714_v42, %v712_v46 }
 0x1a5   :  { %s4157_s6 = sld [smem:[#allocation54_spill]]  ;;  %v735_v52 = vld [vmem:[%s734_s9] sm:$0x1]  ;;  %s3314_s28 = spop %1876 }
 0x1a6   :  { %s4155_s24 = scvt.s32.f32 %s4153_s21  ;;  %s3265_s1 = sld [smem:[#allocation12 + $0x105]]  ;;  %v725_v51 = vadd.f32 %v724_v44, %v723_v47  ;;  %v736_v54 = vadd.f32 %v735_v52, %v732_v49  ;;  %v716_v56 = vadd.f32 %v715_v50, %v702_v45  ;;  %v856_v45 = vld [vmem:[%s4097_s27 + $0x2] sm:$0x1] }
 0x1a7   :  { %s4156_s0 = scvt.s32.f32 %s4154_s16  ;;  %s3272_s13 = sld [smem:[#allocation10 + $0x106]] }
 0x1a8   :  { %s3248_s11 = smul.f32 %s3165_s3, %s4155_s24  ;;  %s4158_s5 = sld [smem:[#allocation55_spill]]  ;;  %v728_v57 = vmul.f32 %v727_v48, %v725_v51  ;;  %v738_v61 = vadd.f32 %v737_v53, %v736_v54  ;;  %v869_v51 = vld [vmem:[%s4097_s27 + $0x3] sm:$0x1] }
 0x1a9   :  { %s3257_s7 = smul.f32 %s3165_s3, %s4156_s0  ;;  %s744_s2 = scalar_lea.vmem %s4091_s22, %s3229_s8 }
 0x1aa   :  { %s3281_s24 = sld [smem:[#allocation12 + $0x106]]  ;;  %v745_v55 = vld [vmem:[%s744_s2] sm:$0x1]  ;;  %s747_s25 = scalar_lea.vmem %s4095_s12, %s3239_s23  ;;  %v740_v58 = vstv %s3248_s11  ;;  %v729_v63 = vadd.f32 %v728_v57, %v716_v56 }
 0x1ab   :  { %s4159_s0 = scvt.s32.f32 %s4157_s6  ;;  %v748_v59 = vld [vmem:[%s747_s25] sm:$0x1]  ;;  %s3301_s4 = sld [smem:[#allocation10 + $0x107]]  ;;  %v753_v0 = vstv %s3257_s7  ;;  %v741_v3 = vmul.f32 %v740_v58, %v738_v61 }
 0x1ac   :  { %v749_v62 = vadd.f32 %v748_v59, %v745_v55  ;;  %s757_s9 = scalar_lea.vmem %s4091_s22, %s3259_s18  ;;  %s3307_s15 = sld [smem:[#allocation12 + $0x107]] }
 0x1ad   :  { %s3290_s29 = smul.f32 %s3165_s3, %s4159_s0  ;;  %v758_v2 = vld [vmem:[%s757_s9] sm:$0x1]  ;;  %s760_s14 = scalar_lea.vmem %s4095_s12, %s3265_s1  ;;  %v742_v9 = vadd.f32 %v741_v3, %v729_v63 }
 0x1ae   :  { %s4160_s8 = scvt.s32.f32 %s4158_s5  ;;  %s4161_s20 = sld [smem:[#allocation56_spill]]  ;;  %v751_v4 = vadd.f32 %v750_v60, %v749_v62  ;;  %v761_v5 = vld [vmem:[%s760_s14] sm:$0x1]  ;;  %v882_v60 = vld [vmem:[%s4097_s27 + $0x4] sm:$0x1] }
 0x1af   :  { %s770_s7 = scalar_lea.vmem %s4091_s22, %s3272_s13  ;;  %s3323_s25 = sld [smem:[#allocation10 + $0x180]]  ;;  %v762_v7 = vadd.f32 %v761_v5, %v758_v2  ;;  %v766_v11 = vstv %s3290_s29 }
 0x1b0   :  { %s3299_s16 = smul.f32 %s3165_s3, %s4160_s8  ;;  %v771_v8 = vld [vmem:[%s770_s7] sm:$0x1]  ;;  %s773_s21 = scalar_lea.vmem %s4095_s12, %s3281_s24  ;;  %v754_v10 = vmul.f32 %v753_v0, %v751_v4  ;;  %v895_v4 = vld [vmem:[%s4097_s27 + $0x5] sm:$0x1] }
 0x1b1   :  { %s3329_s10 = sld [smem:[#allocation12 + $0x180]]  ;;  %v774_v12 = vld [vmem:[%s773_s21] sm:$0x1]  ;;  %v764_v14 = vadd.f32 %v763_v6, %v762_v7  ;;  %s783_s2 = scalar_lea.vmem %s4091_s22, %s3301_s4 }
 0x1b2   :  { %s4162_s8 = sld [smem:[#allocation57_spill]]  ;;  %v775_v15 = vadd.f32 %v774_v12, %v771_v8  ;;  %v755_v16 = vadd.f32 %v754_v10, %v742_v9  ;;  %v779_v17 = vstv %s3299_s16  ;;  %v784_v18 = vld [vmem:[%s783_s2] sm:$0x1] }
 0x1b3   :  { %s4164_s9 = sld [smem:[#allocation58_spill]]  ;;  %v767_v19 = vmul.f32 %v766_v11, %v764_v14 }
 0x1b4   :  { %s4163_s6 = scvt.s32.f32 %s4161_s20  ;;  %s3340_s5 = sld [smem:[#allocation10 + $0x181]]  ;;  %v777_v20 = vadd.f32 %v776_v13, %v775_v15  ;;  %v908_v13 = vld [vmem:[%s4097_s27 + $0x6] sm:$0x1] }
 0x1b5   :  { %s3346_s29 = sld [smem:[#allocation12 + $0x181]]  ;;  %v768_v24 = vadd.f32 %v767_v19, %v755_v16 }
 0x1b6   :  { %s3338_s11 = smul.f32 %s3165_s3, %s4163_s6  ;;  %s786_s3 = scalar_lea.vmem %s4095_s12, %s3307_s15  ;;  %v780_v25 = vmul.f32 %v779_v17, %v777_v20  ;;  %v921_v20 = vld [vmem:[%s4097_s27 + $0x7] sm:$0x1] }
 0x1b7   :  { %v787_v21 = vld [vmem:[%s786_s3] sm:$0x1]  ;;  %s3366_s16 = sld [smem:[#allocation10 + $0x182]]  ;;  %s824_s15 = scalar_lea.vmem %s4091_s22, %s3323_s25 }
 0x1b8   :  { %s4165_s18 = scvt.s32.f32 %s4162_s8  ;;  %v788_v23 = vadd.f32 %v787_v21, %v784_v18  ;;  %s3372_s8 = sld [smem:[#allocation12 + $0x182]]  ;;  %v792_v26 = vstv %s3338_s11  ;;  %v825_v27 = vld [vmem:[%s824_s15] sm:$0x1]  ;;  %v781_v31 = vadd.f32 %v780_v25, %v768_v24 }
 0x1b9   :  { %s4166_s4 = scvt.s32.f32 %s4164_s9  ;;  %s4167_s13 = sld [smem:[#allocation59_spill]] }
 0x1ba   :  { %s3356_s19 = smul.f32 %s3314_s28, %s4165_s18  ;;  %s827_s24 = scalar_lea.vmem %s4095_s12, %s3329_s10  ;;  %v790_v28 = vadd.f32 %v789_v22, %v788_v23 }
 0x1bb   :  { %s3364_s0 = smul.f32 %s3314_s28, %s4166_s4  ;;  %s4168_s14 = sld [smem:[#allocation60_spill]]  ;;  %v828_v29 = vld [vmem:[%s827_s24] sm:$0x1] }
 0x1bc   :  { %s3379_s2 = sld [smem:[#allocation10 + $0x183]]  ;;  %s837_s11 = scalar_lea.vmem %s4091_s22, %s3340_s5  ;;  %v829_v1 = vadd.f32 %v828_v29, %v825_v27  ;;  %v793_v33 = vmul.f32 %v792_v26, %v790_v28  ;;  %v833_v34 = vstv %s3356_s19  ;;  %v962_v29 = vld [vmem:[%s4097_s27] sm:$0x1] }
 0x1bd   :  { %s3388_s18 = sld [smem:[#allocation12 + $0x183]]  ;;  %v838_v32 = vld [vmem:[%s837_s11] sm:$0x1]  ;;  %s840_s1 = scalar_lea.vmem %s4095_s12, %s3346_s29  ;;  %v846_v40 = vstv %s3364_s0 }
 0x1be   :  { %v841_v35 = vld [vmem:[%s840_s1] sm:$0x1]  ;;  %s3408_s9 = sld [smem:[#allocation10 + $0x184]]  ;;  %v831_v37 = vadd.f32 %v830_v30, %v829_v1  ;;  %v794_v39 = vadd.f32 %v793_v33, %v781_v31  ;;  %s853_s30 = scalar_lea.vmem %s4095_s12, %s3372_s8 }
 0x1bf   :  { %s4169_s4 = scvt.s32.f32 %s4167_s13  ;;  %v842_v38 = vadd.f32 %v841_v35, %v838_v32  ;;  %s850_s13 = scalar_lea.vmem %s4091_s22, %s3366_s16  ;;  %v854_v44 = vld [vmem:[%s853_s30] sm:$0x1] }
 0x1c0   :  { %s3414_s25 = sld [smem:[#allocation12 + $0x184]]  ;;  %v851_v41 = vld [vmem:[%s850_s13] sm:$0x1]  ;;  %v834_v42 = vmul.f32 %v833_v34, %v831_v37  ;;  %795 = vst [vmem:[#allocation2 + $0x4] sm:$0x1] %v794_v39  ;;  %s3505_s8 = spop %1878 }
 0x1c1   :  { %s3397_s21 = smul.f32 %s3314_s28, %s4169_s4  ;;  %s4170_s5 = scvt.s32.f32 %s4168_s14  ;;  %v844_v43 = vadd.f32 %v843_v36, %v842_v38  ;;  %v855_v46 = vadd.f32 %v854_v44, %v851_v41  ;;  %v975_v36 = vld [vmem:[%s4097_s27 + $0x1] sm:$0x1] }
 0x1c2   :  { %s4171_s19 = sld [smem:[#allocation61_spill]]  ;;  %s863_s0 = scalar_lea.vmem %s4091_s22, %s3379_s2 }
 0x1c3   :  { %s3406_s6 = smul.f32 %s3314_s28, %s4170_s5  ;;  %s3421_s3 = sld [smem:[#allocation10 + $0x185]]  ;;  %v864_v47 = vld [vmem:[%s863_s0] sm:$0x1]  ;;  %v847_v48 = vmul.f32 %v846_v40, %v844_v43  ;;  %v859_v49 = vstv %s3397_s21  ;;  %v857_v52 = vadd.f32 %v856_v45, %v855_v46 }
 0x1c4   :  { %s4172_s11 = sld [smem:[#allocation62_spill]]  ;;  %s866_s15 = scalar_lea.vmem %s4095_s12, %s3388_s18 }
 0x1c5   :  { %s3430_s4 = sld [smem:[#allocation12 + $0x185]]  ;;  %v867_v50 = vld [vmem:[%s866_s15] sm:$0x1]  ;;  %v848_v54 = vadd.f32 %v847_v48, %v834_v42  ;;  %v872_v55 = vstv %s3406_s6  ;;  %v860_v57 = vmul.f32 %v859_v49, %v857_v52  ;;  %v988_v42 = vld [vmem:[%s4097_s27 + $0x2] sm:$0x1] }
 0x1c6   :  { %s3450_s20 = sld [smem:[#allocation10 + $0x186]]  ;;  %v868_v53 = vadd.f32 %v867_v50, %v864_v47  ;;  %s879_s7 = scalar_lea.vmem %s4095_s12, %s3414_s25 }
 0x1c7   :  { %s4175_s16 = sld [smem:[#allocation63_spill]]  ;;  %v880_v59 = vld [vmem:[%s879_s7] sm:$0x1]  ;;  %v861_v63 = vadd.f32 %v860_v57, %v848_v54 }
 0x1c8   :  { %s4173_s5 = scvt.s32.f32 %s4171_s19  ;;  %s876_s19 = scalar_lea.vmem %s4091_s22, %s3408_s9  ;;  %v870_v58 = vadd.f32 %v869_v51, %v868_v53  ;;  %v1001_v51 = vld [vmem:[%s4097_s27 + $0x3] sm:$0x1] }
 0x1c9   :  { %s3456_s21 = sld [smem:[#allocation12 + $0x186]]  ;;  %v877_v56 = vld [vmem:[%s876_s19] sm:$0x1]  ;;  %s889_s6 = scalar_lea.vmem %s4091_s22, %s3421_s3 }
 0x1ca   :  { %s3439_s24 = smul.f32 %s3314_s28, %s4173_s5  ;;  %s4174_s2 = scvt.s32.f32 %s4172_s11  ;;  %v881_v61 = vadd.f32 %v880_v59, %v877_v56  ;;  %v890_v62 = vld [vmem:[%s889_s6] sm:$0x1]  ;;  %v873_v0 = vmul.f32 %v872_v55, %v870_v58  ;;  %v1014_v58 = vld [vmem:[%s4097_s27 + $0x4] sm:$0x1] }
 0x1cb   :  { %s3463_s1 = sld [smem:[#allocation10 + $0x187]]  ;;  %s892_s13 = scalar_lea.vmem %s4095_s12, %s3430_s4 }
 0x1cc   :  { %s3448_s14 = smul.f32 %s3314_s28, %s4174_s2  ;;  %s4176_s0 = sld [smem:[#allocation64_spill]]  ;;  %v885_v2 = vstv %s3439_s24  ;;  %v893_v3 = vld [vmem:[%s892_s13] sm:$0x1]  ;;  %v883_v5 = vadd.f32 %v882_v60, %v881_v61  ;;  %v874_v7 = vadd.f32 %v873_v0, %v861_v63 }
 0x1cd   :  { %s3472_s5 = sld [smem:[#allocation12 + $0x187]]  ;;  %s4177_s2 = scvt.s32.f32 %s4175_s16  ;;  %v894_v6 = vadd.f32 %v893_v3, %v890_v62 }
 0x1ce   :  { %s3492_s10 = sld [smem:[#allocation10 + $0x200]]  ;;  %s902_s7 = scalar_lea.vmem %s4091_s22, %s3450_s20  ;;  %v898_v8 = vstv %s3448_s14  ;;  %v886_v10 = vmul.f32 %v885_v2, %v883_v5 }
 0x1cf   :  { %s3481_s30 = smul.f32 %s3314_s28, %s4177_s2  ;;  %s3498_s9 = sld [smem:[#allocation12 + $0x200]]  ;;  %v903_v9 = vld [vmem:[%s902_s7] sm:$0x1]  ;;  %v896_v11 = vadd.f32 %v895_v4, %v894_v6  ;;  %v1027_v4 = vld [vmem:[%s4097_s27 + $0x5] sm:$0x1] }
 0x1d0   :  { %s4179_s23 = sld [smem:[#allocation65_spill]]  ;;  %v887_v16 = vadd.f32 %v886_v10, %v874_v7 }
 0x1d1   :  { %s915_s14 = scalar_lea.vmem %s4091_s22, %s3463_s1  ;;  %s3514_s29 = sld [smem:[#allocation10 + $0x201]]  ;;  %v899_v17 = vmul.f32 %v898_v8, %v896_v11  ;;  %v911_v18 = vstv %s3481_s30  ;;  %v1040_v11 = vld [vmem:[%s4097_s27 + $0x6] sm:$0x1] }
 0x1d2   :  { %s4178_s3 = scvt.s32.f32 %s4176_s0  ;;  %v916_v15 = vld [vmem:[%s915_s14] sm:$0x1]  ;;  %s3520_s18 = sld [smem:[#allocation12 + $0x201]] }
 0x1d3   :  { %s918_s2 = scalar_lea.vmem %s4095_s12, %s3472_s5  ;;  %s4180_s19 = sld [smem:[#allocation66_spill]]  ;;  %v900_v23 = vadd.f32 %v899_v17, %v887_v16 }
 0x1d4   :  { %s3490_s11 = smul.f32 %s3314_s28, %s4178_s3  ;;  %s905_s28 = scalar_lea.vmem %s4095_s12, %s3456_s21  ;;  %v919_v19 = vld [vmem:[%s918_s2] sm:$0x1] }
 0x1d5   :  { %v906_v12 = vld [vmem:[%s905_s28] sm:$0x1]  ;;  %s4182_s16 = sld [smem:[#allocation67_spill]]  ;;  %v920_v22 = vadd.f32 %v919_v19, %v916_v15  ;;  %s956_s28 = scalar_lea.vmem %s4091_s22, %s3492_s10 }
 0x1d6   :  { %v907_v14 = vadd.f32 %v906_v12, %v903_v9  ;;  %s4181_s4 = scvt.s32.f32 %s4179_s23  ;;  %s3531_s24 = sld [smem:[#allocation10 + $0x202]]  ;;  %v924_v24 = vstv %s3490_s11  ;;  %v957_v25 = vld [vmem:[%s956_s28] sm:$0x1] }
 0x1d7   :  { %s3537_s30 = sld [smem:[#allocation12 + $0x202]]  ;;  %s959_s6 = scalar_lea.vmem %s4095_s12, %s3498_s9  ;;  %v922_v27 = vadd.f32 %v921_v20, %v920_v22  ;;  %v1053_v20 = vld [vmem:[%s4097_s27 + $0x7] sm:$0x1] }
 0x1d8   :  { %s3529_s7 = smul.f32 %s3505_s8, %s4181_s4  ;;  %v909_v21 = vadd.f32 %v908_v13, %v907_v14  ;;  %v960_v28 = vld [vmem:[%s959_s6] sm:$0x1]  ;;  %s3557_s13 = sld [smem:[#allocation10 + $0x203]] }
 0x1d9   :  { %s4183_s20 = scvt.s32.f32 %s4180_s19  ;;  %v961_v30 = vadd.f32 %v960_v28, %v957_v25  ;;  %s969_s19 = scalar_lea.vmem %s4091_s22, %s3514_s29  ;;  %v925_v1 = vmul.f32 %v924_v24, %v922_v27  ;;  %v1094_v28 = vld [vmem:[%s4097_s27] sm:$0x1] }
 0x1da   :  { %v912_v26 = vmul.f32 %v911_v18, %v909_v21  ;;  %s3563_s3 = sld [smem:[#allocation12 + $0x203]]  ;;  %v970_v32 = vld [vmem:[%s969_s19] sm:$0x1]  ;;  %s972_s5 = scalar_lea.vmem %s4095_s12, %s3520_s18  ;;  %v965_v34 = vstv %s3529_s7 }
 0x1db   :  { %s3547_s25 = smul.f32 %s3505_s8, %s4183_s20  ;;  %s4184_s10 = scvt.s32.f32 %s4182_s16  ;;  %v963_v33 = vadd.f32 %v962_v29, %v961_v30  ;;  %v973_v35 = vld [vmem:[%s972_s5] sm:$0x1] }
 0x1dc   :  { %s4185_s1 = sld [smem:[#allocation68_spill]]  ;;  %v913_v31 = vadd.f32 %v912_v26, %v900_v23  ;;  %s982_s20 = scalar_lea.vmem %s4091_s22, %s3531_s24  ;;  %v974_v38 = vadd.f32 %v973_v35, %v970_v32 }
 0x1dd   :  { %s3555_s11 = smul.f32 %s3505_s8, %s4184_s10  ;;  %s4186_s0 = sld [smem:[#allocation69_spill]]  ;;  %v983_v39 = vld [vmem:[%s982_s20] sm:$0x1]  ;;  %v978_v40 = vstv %s3547_s25  ;;  %v966_v43 = vmul.f32 %v965_v34, %v963_v33  ;;  %v1107_v34 = vld [vmem:[%s4097_s27 + $0x1] sm:$0x1] }
 0x1de   :  { %s3569_s28 = sld [smem:[#allocation10 + $0x204]]  ;;  %v926_v37 = vadd.f32 %v925_v1, %v913_v31  ;;  %s985_s7 = scalar_lea.vmem %s4095_s12, %s3537_s30  ;;  %v976_v44 = vadd.f32 %v975_v36, %v974_v38 }
 0x1df   :  { %s3579_s14 = sld [smem:[#allocation12 + $0x204]]  ;;  %v986_v41 = vld [vmem:[%s985_s7] sm:$0x1]  ;;  %s995_s5 = scalar_lea.vmem %s4091_s22, %s3557_s13  ;;  %v991_v46 = vstv %s3555_s11 }
 0x1e0   :  { %s3599_s16 = sld [smem:[#allocation10 + $0x205]]  ;;  %927 = vst [vmem:[#allocation2 + $0x5] sm:$0x1] %v926_v37  ;;  %v987_v45 = vadd.f32 %v986_v41, %v983_v39  ;;  %v996_v47 = vld [vmem:[%s995_s5] sm:$0x1]  ;;  %s998_s15 = scalar_lea.vmem %s4095_s12, %s3563_s3  ;;  %v979_v48 = vmul.f32 %v978_v40, %v976_v44 }
 0x1e1   :  { %s4189_s25 = sld [smem:[#allocation70_spill]]  ;;  %v999_v50 = vld [vmem:[%s998_s15] sm:$0x1]  ;;  %s3654_s13 = spop %1880 }
 0x1e2   :  { %s4187_s10 = scvt.s32.f32 %s4185_s1  ;;  %s3605_s29 = sld [smem:[#allocation12 + $0x205]]  ;;  %v989_v49 = vadd.f32 %v988_v42, %v987_v45  ;;  %v1000_v52 = vadd.f32 %v999_v50, %v996_v47  ;;  %v980_v54 = vadd.f32 %v979_v48, %v966_v43  ;;  %v1120_v43 = vld [vmem:[%s4097_s27 + $0x2] sm:$0x1] }
 0x1e3   :  { %s4188_s24 = scvt.s32.f32 %s4186_s0  ;;  %s3612_s6 = sld [smem:[#allocation10 + $0x206]] }
 0x1e4   :  { %s3588_s2 = smul.f32 %s3505_s8, %s4187_s10  ;;  %s4190_s20 = sld [smem:[#allocation71_spill]]  ;;  %v992_v55 = vmul.f32 %v991_v46, %v989_v49  ;;  %v1002_v59 = vadd.f32 %v1001_v51, %v1000_v52  ;;  %v1133_v49 = vld [vmem:[%s4097_s27 + $0x3] sm:$0x1] }
 0x1e5   :  { %s3597_s4 = smul.f32 %s3505_s8, %s4188_s24  ;;  %s1008_s11 = scalar_lea.vmem %s4091_s22, %s3569_s28 }
 0x1e6   :  { %s3621_s10 = sld [smem:[#allocation12 + $0x206]]  ;;  %v1009_v53 = vld [vmem:[%s1008_s11] sm:$0x1]  ;;  %s1011_s19 = scalar_lea.vmem %s4095_s12, %s3579_s14  ;;  %v1004_v56 = vstv %s3588_s2  ;;  %v993_v61 = vadd.f32 %v992_v55, %v980_v54 }
 0x1e7   :  { %s4191_s24 = scvt.s32.f32 %s4189_s25  ;;  %v1012_v57 = vld [vmem:[%s1011_s19] sm:$0x1]  ;;  %s3641_s23 = sld [smem:[#allocation10 + $0x207]]  ;;  %v1017_v62 = vstv %s3597_s4  ;;  %v1005_v0 = vmul.f32 %v1004_v56, %v1002_v59 }
 0x1e8   :  { %v1013_v60 = vadd.f32 %v1012_v57, %v1009_v53  ;;  %s1021_s15 = scalar_lea.vmem %s4091_s22, %s3599_s16  ;;  %s3647_s18 = sld [smem:[#allocation12 + $0x207]] }
 0x1e9   :  { %s3630_s30 = smul.f32 %s3505_s8, %s4191_s24  ;;  %v1022_v63 = vld [vmem:[%s1021_s15] sm:$0x1]  ;;  %s1024_s21 = scalar_lea.vmem %s4095_s12, %s3605_s29  ;;  %v1006_v7 = vadd.f32 %v1005_v0, %v993_v61 }
 0x1ea   :  { %s4192_s28 = scvt.s32.f32 %s4190_s20  ;;  %s4193_s7 = sld [smem:[#allocation73_spill]]  ;;  %v1015_v2 = vadd.f32 %v1014_v58, %v1013_v60  ;;  %v1025_v3 = vld [vmem:[%s1024_s21] sm:$0x1]  ;;  %v1146_v58 = vld [vmem:[%s4097_s27 + $0x4] sm:$0x1] }
 0x1eb   :  { %s1034_s4 = scalar_lea.vmem %s4091_s22, %s3612_s6  ;;  %s3663_s19 = sld [smem:[#allocation10 + $0x280]]  ;;  %v1026_v5 = vadd.f32 %v1025_v3, %v1022_v63  ;;  %v1030_v9 = vstv %s3630_s30 }
 0x1ec   :  { %s3639_s0 = smul.f32 %s3505_s8, %s4192_s28  ;;  %v1035_v6 = vld [vmem:[%s1034_s4] sm:$0x1]  ;;  %s1037_s1 = scalar_lea.vmem %s4095_s12, %s3621_s10  ;;  %v1018_v8 = vmul.f32 %v1017_v62, %v1015_v2  ;;  %v1159_v2 = vld [vmem:[%s4097_s27 + $0x5] sm:$0x1] }
 0x1ed   :  { %s3669_s5 = sld [smem:[#allocation12 + $0x280]]  ;;  %v1038_v10 = vld [vmem:[%s1037_s1] sm:$0x1]  ;;  %v1028_v12 = vadd.f32 %v1027_v4, %v1026_v5  ;;  %s1047_s11 = scalar_lea.vmem %s4091_s22, %s3641_s23 }
 0x1ee   :  { %s4194_s28 = sld [smem:[#allocation74_spill]]  ;;  %v1039_v13 = vadd.f32 %v1038_v10, %v1035_v6  ;;  %v1019_v14 = vadd.f32 %v1018_v8, %v1006_v7  ;;  %v1043_v15 = vstv %s3639_s0  ;;  %v1048_v16 = vld [vmem:[%s1047_s11] sm:$0x1] }
 0x1ef   :  { %s4196_s15 = sld [smem:[#allocation76_spill]]  ;;  %v1031_v17 = vmul.f32 %v1030_v9, %v1028_v12 }
 0x1f0   :  { %s4195_s25 = scvt.s32.f32 %s4193_s7  ;;  %s3680_s20 = sld [smem:[#allocation10 + $0x281]]  ;;  %v1041_v18 = vadd.f32 %v1040_v11, %v1039_v13  ;;  %v1172_v11 = vld [vmem:[%s4097_s27 + $0x6] sm:$0x1] }
 0x1f1   :  { %s3686_s30 = sld [smem:[#allocation12 + $0x281]]  ;;  %v1032_v22 = vadd.f32 %v1031_v17, %v1019_v14 }
 0x1f2   :  { %s3678_s2 = smul.f32 %s3505_s8, %s4195_s25  ;;  %s1050_s8 = scalar_lea.vmem %s4095_s12, %s3647_s18  ;;  %v1044_v23 = vmul.f32 %v1043_v15, %v1041_v18  ;;  %v1185_v18 = vld [vmem:[%s4097_s27 + $0x7] sm:$0x1] }
 0x1f3   :  { %v1051_v19 = vld [vmem:[%s1050_s8] sm:$0x1]  ;;  %s3706_s0 = sld [smem:[#allocation10 + $0x282]]  ;;  %s1088_s18 = scalar_lea.vmem %s4091_s22, %s3663_s19 }
 0x1f4   :  { %s4197_s16 = scvt.s32.f32 %s4194_s28  ;;  %v1052_v21 = vadd.f32 %v1051_v19, %v1048_v16  ;;  %s3712_s28 = sld [smem:[#allocation12 + $0x282]]  ;;  %v1056_v24 = vstv %s3678_s2  ;;  %v1089_v25 = vld [vmem:[%s1088_s18] sm:$0x1]  ;;  %v1045_v29 = vadd.f32 %v1044_v23, %v1032_v22 }
 0x1f5   :  { %s4198_s23 = scvt.s32.f32 %s4196_s15  ;;  %s4199_s6 = sld [smem:[#allocation78_spill]] }
 0x1f6   :  { %s3696_s9 = smul.f32 %s3654_s13, %s4197_s16  ;;  %s1091_s10 = scalar_lea.vmem %s4095_s12, %s3669_s5  ;;  %v1054_v26 = vadd.f32 %v1053_v20, %v1052_v21 }
 0x1f7   :  { %s3704_s24 = smul.f32 %s3654_s13, %s4198_s23  ;;  %s4200_s21 = sld [smem:[#allocation79_spill]]  ;;  %v1092_v27 = vld [vmem:[%s1091_s10] sm:$0x1] }
 0x1f8   :  { %s3719_s11 = sld [smem:[#allocation10 + $0x283]]  ;;  %s1101_s2 = scalar_lea.vmem %s4091_s22, %s3680_s20  ;;  %v1093_v30 = vadd.f32 %v1092_v27, %v1089_v25  ;;  %v1057_v1 = vmul.f32 %v1056_v24, %v1054_v26  ;;  %v1097_v32 = vstv %s3696_s9 }
 0x1f9   :  { %s3728_s16 = sld [smem:[#allocation12 + $0x283]]  ;;  %v1102_v31 = vld [vmem:[%s1101_s2] sm:$0x1]  ;;  %s1104_s29 = scalar_lea.vmem %s4095_s12, %s3686_s30  ;;  %v1110_v38 = vstv %s3704_s24 }
 0x1fa   :  { %v1105_v33 = vld [vmem:[%s1104_s29] sm:$0x1]  ;;  %s3748_s15 = sld [smem:[#allocation10 + $0x284]]  ;;  %v1095_v35 = vadd.f32 %v1094_v28, %v1093_v30  ;;  %v1058_v37 = vadd.f32 %v1057_v1, %v1045_v29  ;;  %s1117_s3 = scalar_lea.vmem %s4095_s12, %s3712_s28  ;;  %v1806_v29 = vld [vmem:[#allocation16] ss:$0 sm:$0xff] }
 0x1fb   :  { %s4201_s23 = scvt.s32.f32 %s4199_s6  ;;  %v1106_v36 = vadd.f32 %v1105_v33, %v1102_v31  ;;  %s1114_s6 = scalar_lea.vmem %s4091_s22, %s3706_s0  ;;  %v1118_v42 = vld [vmem:[%s1117_s3] sm:$0x1]  ;;  %v1357_v33 = vlaneseq }
 0x1fc   :  { %s3754_s19 = sld [smem:[#allocation12 + $0x284]]  ;;  %v1115_v39 = vld [vmem:[%s1114_s6] sm:$0x1]  ;;  %v1098_v40 = vmul.f32 %v1097_v32, %v1095_v35  ;;  %1059 = vst [vmem:[#allocation2 + $0x6] sm:$0x1] %v1058_v37 }
 0x1fd   :  { %s3737_s1 = smul.f32 %s3654_s13, %s4201_s23  ;;  %s4202_s20 = scvt.s32.f32 %s4200_s21  ;;  %v1108_v41 = vadd.f32 %v1107_v34, %v1106_v36  ;;  %v1119_v44 = vadd.f32 %v1118_v42, %v1115_v39  ;;  %v2082_v34 = vmov 1966171168   ;;  %v3851_v36 = vshrl.u32 %v1357_v33, 7 }
 0x1fe   :  { %s4203_s9 = sld [smem:[#allocation81_spill]]  ;;  %s1127_s24 = scalar_lea.vmem %s4091_s22, %s3719_s11  ;;  %v1379_v35 = vunpack.c.l.s4 %v2082_v34  ;;  %v3853_v37 = vand.u32 127, %v1357_v33 }
 0x1ff   :  { %s3746_s25 = smul.f32 %s3654_s13, %s4202_s20  ;;  %s3761_s8 = sld [smem:[#allocation10 + $0x285]]  ;;  %v1128_v45 = vld [vmem:[%s1127_s24] sm:$0x1]  ;;  %v1111_v46 = vmul.f32 %v1110_v38, %v1108_v41  ;;  %v1123_v47 = vstv %s3737_s1  ;;  %v1121_v50 = vadd.f32 %v1120_v43, %v1119_v44 }
 0x200   :  { %s4204_s2 = sld [smem:[#allocation83_spill]]  ;;  %s1130_s18 = scalar_lea.vmem %s4095_s12, %s3728_s16  ;;  %v1380_v38 = vunpack.c.0.s8 %v1379_v35  ;;  %vm1361_vm1 = vcmp.eq.s32.totalorder %v3851_v36, %v3853_v37  ;;  %vm1375_vm3 = vcmp.eq.s32.totalorder %v3853_v37, 0  ;;  %vm1376_vm5 = vcmp.eq.s32.totalorder %v3853_v37, 1 }
 0x201   :  { %s3770_s23 = sld [smem:[#allocation12 + $0x285]]  ;;  %v1131_v48 = vld [vmem:[%s1130_s18] sm:$0x1]  ;;  %v1112_v52 = vadd.f32 %v1111_v46, %v1098_v40  ;;  %v1136_v53 = vstv %s3746_s25  ;;  %v1124_v55 = vmul.f32 %v1123_v47, %v1121_v50  ;;  %s4207_s16 = scvt.s32.f32 %s2515_s17  ;;  %v1371_v50 = vadd.s32 2, %v3851_v36 }
 0x202   :  { %s3790_s7 = sld [smem:[#allocation10 + $0x286]]  ;;  %v1132_v51 = vadd.f32 %v1131_v48, %v1128_v45  ;;  %s1143_s5 = scalar_lea.vmem %s4095_s12, %s3754_s19  ;;  %v1383_v41 = vsub.s32 %v1380_v38, %v3851_v36 }
 0x203   :  { %s3796_s0 = sld [smem:[#allocation12 + $0x286]]  ;;  %v1144_v57 = vld [vmem:[%s1143_s5] sm:$0x1]  ;;  %v1125_v61 = vadd.f32 %v1124_v55, %v1112_v52  ;;  %s4208_s17 = scvt.s32.f32 %s2520_s26  ;;  %v1372_v52 = vadd.s32 5, %v3851_v36  ;;  %vm1373_vm4 = vcmp.eq.s32.totalorder %v3853_v37, %v1371_v50 }
 0x204   :  { %s4205_s20 = scvt.s32.f32 %s4203_s9  ;;  %s1140_s9 = scalar_lea.vmem %s4091_s22, %s3748_s15  ;;  %v1134_v56 = vadd.f32 %v1133_v49, %v1132_v51 }
 0x205   :  { %v1141_v54 = vld [vmem:[%s1140_s9] sm:$0x1]  ;;  %s3803_s4 = sld [smem:[#allocation10 + $0x287]]  ;;  %s1153_s25 = scalar_lea.vmem %s4091_s22, %s3761_s8  ;;  %vm1374_vm7 = vcmp.eq.s32.totalorder %v3853_v37, %v1372_v52 }
 0x206   :  { %s3779_s10 = smul.f32 %s3654_s13, %s4205_s20  ;;  %s4206_s11 = scvt.s32.f32 %s4204_s2  ;;  %v1145_v59 = vadd.f32 %v1144_v57, %v1141_v54  ;;  %v1154_v60 = vld [vmem:[%s1153_s25] sm:$0x1]  ;;  %v1137_v62 = vmul.f32 %v1136_v53, %v1134_v56  ;;  %v1402_v56 = vsub.s32 0, %v3851_v36 }
 0x207   :  { %s3812_s14 = sld [smem:[#allocation12 + $0x287]]  ;;  %s1156_s20 = scalar_lea.vmem %s4095_s12, %s3770_s23 }
 0x208   :  { %s3788_s21 = smul.f32 %s3654_s13, %s4206_s11  ;;  %v1149_v63 = vstv %s3779_s10  ;;  %v1157_v0 = vld [vmem:[%s1156_s20] sm:$0x1]  ;;  %v1147_v3 = vadd.f32 %v1146_v58, %v1145_v59  ;;  %s1166_s3 = scalar_lea.vmem %s4091_s22, %s3790_s7  ;;  %v1138_v5 = vadd.f32 %v1137_v62, %v1125_v61 }
 0x209   :  { %v1158_v4 = vadd.f32 %v1157_v0, %v1154_v60  ;;  %s1174_s23 = smul.f32 %s3654_s13, %s4207_s16  ;;  %v1167_v7 = vld [vmem:[%s1166_s3] sm:$0x1]  ;;  %s1169_s1 = scalar_lea.vmem %s4095_s12, %s3796_s0 }
 0x20a   :  { %v1162_v6 = vstv %s3788_s21  ;;  %v1150_v8 = vmul.f32 %v1149_v63, %v1147_v3  ;;  %v1170_v10 = vld [vmem:[%s1169_s1] sm:$0x1]  ;;  %s1187_s24 = smul.f32 %s3654_s13, %s4208_s17  ;;  %s2083_s26 = smov [#allocation18]  }
 0x20b   :  { %v1160_v9 = vadd.f32 %v1159_v2, %v1158_v4  ;;  %s1179_s7 = scalar_lea.vmem %s4091_s22, %s3803_s4  ;;  %v1171_v12 = vadd.f32 %v1170_v10, %v1167_v7  ;;  %v1175_v16 = vstv %s1174_s23 }
 0x20c   :  { %v1180_v13 = vld [vmem:[%s1179_s7] sm:$0x1]  ;;  %v1151_v14 = vadd.f32 %v1150_v8, %v1138_v5  ;;  %v1188_v22 = vstv %s1187_s24 }
 0x20d   :  { %s1182_s25 = scalar_lea.vmem %s4095_s12, %s3812_s14  ;;  %v1163_v15 = vmul.f32 %v1162_v6, %v1160_v9  ;;  %v1173_v19 = vadd.f32 %v1172_v11, %v1171_v12  ;;  %s1478_s12 = sshll.u32 %s2083_s26, 4  ;;  %s1479_s12 = int_to_ptr.vmem [resolvable:$true] %s1478_s12 }
 0x20e   :  { %v1183_v17 = vld [vmem:[%s1182_s25] sm:$0x1]  ;;  %s2035_s22 = scalar_lea.vmem %s1479_s12, 32  ;;  %p2040_p13 = scmp.lt.s32.totalorder %s1479_s12, %s1479_s12 }
 0x20f   :  { %v1184_v20 = vadd.f32 %v1183_v17, %v1180_v13  ;;  %v1164_v21 = vadd.f32 %v1163_v15, %v1151_v14  ;;  %v1176_v23 = vmul.f32 %v1175_v16, %v1173_v19  ;;  %p2036_p12 = scmp.ne.s32.totalorder %s1479_s12, %s2035_s22  ;;  %p2041_p0 = scmp.lt.s32.totalorder %s2035_s22, %s2035_s22 }
 0x211   :  { %v1186_v24 = vadd.f32 %v1185_v18, %v1184_v20  ;;  %v1177_v25 = vadd.f32 %v1176_v23, %v1164_v21  ;;  %p2042_p1 = por %p2041_p0, %p2040_p13 }
 0x213   :  { %v1189_v26 = vmul.f32 %v1188_v22, %v1186_v24  ;;  %p2043_p2 = pnand %p2042_p1, %p2036_p12 }
 0x215   :  { %v1190_v27 = vadd.f32 %v1189_v26, %v1177_v25 }
 0x217   :  { %1191 = vst [vmem:[#allocation2 + $0x7] sm:$0x1] %v1190_v27 }
 0x21e   :  { %v1192_v28 = vld [vmem:[#allocation2] sm:$0xff] }
 0x21f   :  { %1859 = vmatmul.mubr.f32.vlgmr.msra.gmra.mxu0 %v1192_v28  ;;  %v1461_v28 = vsub.s32 %v3853_v37, %v3851_v36 }
 0x2df   :  { %v1282_v30 = vpop.f32.mrf.mxu0 }
 0x2e0   :  { %v1283_v31 = vadd.f32 %v1806_v29, %v1282_v30 }
 0x2e1   :  { %v1860_v1 = vpop.f32.mrf.mxu0 }
 0x2e2   :  { %1913 = vtanh.f32 %v1283_v31 }
 0x2ef   :  { %v1914_v32 = vpop.eup %1913 }
 0x2f0   :  { %1862 = vmatpush3.xpose.msra.mxu1 %v1914_v32 }
 0x2f3   :  { %1864 = vmatmul.mubr.f32.vlgmr.msra.gmra.mxu1 %v1914_v32 }
 0x3b3   :  { %v1353_v39 = vpop.f32.mrf.mxu1 }
 0x3b4   :  { %v1362_v40 = vsel %vm1361_vm1, %v1353_v39, 0.0  ;;  %v1384_v45 = vrot.slane %v1353_v39, %v1383_v41 }
 0x3b5   :  { %v1865_v42 = vpop.f32.mrf.mxu1  ;;  %v1364_v43 = vsel %vm1363_vm2, %v1362_v40, 0.0 }
 0x3b6   :  { %v1365_v44 = vrot.slane %v1364_v43, 4  ;;  %v1385_v48 = vcombine.high %v1384_v45, %v1384_v45  ;;  %v1392_v53 = vrot.slane %v1384_v45, %v1383_v41 }
 0x3b8   :  { %v1366_v46 = vadd.f32 %v1365_v44, %v1364_v43  ;;  %v1399_v55 = vrot.slane %v1385_v48, %v1383_v41  ;;  %v1403_v0 = vrot.slane %v1392_v53, %v1402_v56 }
 0x3ba   :  { %v1367_v47 = vrot.slane %v1366_v46, 2  ;;  %v1407_v63 = vrot.slane %v1399_v55, %v1402_v56  ;;  %v1410_v5 = vsel %vm1373_vm4, %v1403_v0, 0.0 }
 0x3bb   :  { %v1413_v7 = vsel %vm1412_vm6, %v1410_v5, 0.0 }
 0x3bc   :  { %v1368_v49 = vadd.f32 %v1367_v47, %v1366_v46  ;;  %v1411_v4 = vsel %vm1374_vm7, %v1407_v63, 0.0 }
 0x3bd   :  { %v1416_v6 = vsel %vm1412_vm6, %v1411_v4, 0.0 }
 0x3be   :  { %v1369_v51 = vrot.slane %v1368_v49, 1 }
 0x3c0   :  { %v1370_v54 = vadd.f32 %v1369_v51, %v1368_v49 }
 0x3c2   :  { %v1427_v57 = vsel %vm1375_vm3, %v1370_v54, 0.0  ;;  %v1419_v58 = vsel %vm1373_vm4, %v1370_v54, 0.0  ;;  %v1428_v61 = vsel %vm1376_vm5, %v1370_v54, 0.0  ;;  %v1420_v62 = vsel %vm1374_vm7, %v1370_v54, 0.0 }
 0x3c3   :  { %v1429_v59 = vsel %vm1363_vm2, %v1427_v57, 0.0  ;;  %v1421_v60 = vsel %vm1412_vm6, %v1419_v58, 0.0  ;;  %v1432_v2 = vsel %vm1363_vm2, %v1428_v61, 0.0  ;;  %v1424_v3 = vsel %vm1412_vm6, %v1420_v62, 0.0 }
 0x3c4   :  { %1430 = vadd.xlane.f32.xlu1 %v1429_v59  ;;  %1422 = vadd.xlane.f32.xlu0 %v1421_v60 }
 0x3c8   :  { %1433 = vadd.xlane.f32.xlu1 %v1432_v2  ;;  %1425 = vadd.xlane.f32.xlu0 %v1424_v3 }
 0x3cc   :  { %1417 = vadd.xlane.f32.xlu1 %v1416_v6  ;;  %1414 = vadd.xlane.f32.xlu0 %v1413_v7 }
 0x44d   :  { %v1431_v8 = vpop.xlane.xlu1 %1430  ;;  %v1423_v9 = vpop.xlane.xlu0 %1422 }
 0x44e   :  { %v1435_v10 = vmul.f32 %v1431_v8, %v1423_v9 }
 0x450   :  { %1915 = vrsqrt.f32 %v1435_v10  ;;  %vm1439_vm8 = vcmp.eq.f32.partialorder %v1435_v10, inf  ;;  %v1442_v16 = vand.u32 2147483648, %v1435_v10  ;;  %vm1441_vm9 = vcmp.eq.f32.partialorder %v1435_v10, 0.0 }
 0x451   :  { %v1434_v11 = vpop.xlane.xlu1 %1433  ;;  %v1426_v12 = vpop.xlane.xlu0 %1425 }
 0x452   :  { %v1436_v13 = vmul.f32 %v1434_v11, %v1426_v12 }
 0x454   :  { %1917 = vrsqrt.f32 %v1436_v13  ;;  %vm1446_vm10 = vcmp.eq.f32.partialorder %v1436_v13, inf  ;;  %v1449_v22 = vand.u32 2147483648, %v1436_v13  ;;  %vm1448_vm11 = vcmp.eq.f32.partialorder %v1436_v13, 0.0 }
 0x455   :  { %v1415_v27 = vpop.xlane.xlu0 %1414  ;;  %v1418_v31 = vpop.xlane.xlu1 %1417 }
 0x45d   :  { %v1916_v14 = vpop.eup %1915 }
 0x45e   :  { %v1438_v15 = vmul.f32 %v1916_v14, %v1435_v10 }
 0x460   :  { %v1440_v17 = vsel %vm1439_vm8, %v1435_v10, %v1438_v15 }
 0x461   :  { %v1918_v18 = vpop.eup %1917  ;;  %v1443_v19 = vsel %vm1441_vm9, %v1442_v16, %v1440_v17 }
 0x462   :  { %v1445_v20 = vmul.f32 %v1918_v18, %v1436_v13  ;;  %v1451_v21 = vmax.f32 %v1443_v19, 1e-08 }
 0x464   :  { %v1447_v23 = vsel %vm1446_vm10, %v1436_v13, %v1445_v20  ;;  %1919 = vrcp.f32 %v1451_v21 }
 0x465   :  { %v1450_v24 = vsel %vm1448_vm11, %v1449_v22, %v1447_v23 }
 0x466   :  { %v1452_v25 = vmax.f32 %v1450_v24, 1e-08 }
 0x468   :  { %1921 = vrcp.f32 %v1452_v25 }
 0x471   :  { %v1920_v26 = vpop.eup %1919 }
 0x472   :  { %v1454_v29 = vmul.f32 %v1920_v26, %v1415_v27 }
 0x474   :  { %v1462_v33 = vrot.slane %v1454_v29, %v1461_v28 }
 0x475   :  { %v1922_v30 = vpop.eup %1921 }
 0x476   :  { %v1456_v1 = vmul.f32 %v1922_v30, %v1418_v31 }
 0x478   :  { %v1466_v32 = vrot.slane %v1456_v1, %v1461_v28 }
 0x47a   :  { %v1468_v34 = vsel %vm1467_vm12, %v1466_v32, %v1462_v33 }
 0x47b   :  { %1471 = vst.msk [vmem:[#allocation18] sm:$0x3] %vm1470_vm13, %v1468_v34 }
 0x47c   :  { %2046 = shalt.err (!%p2043_p2)
}
 0x47d   :  { %s4209_s4 = sld [smem:[#allocation88_spill]] }
 0x483   :  { %1481 = dma.vmem_to_hbm [thread:$0]  %s1479_s12, 32, %s4209_s4, [#allocation5]  }
 0x484   :  { %2067 = dma.done.wait [#allocation5], 32  }
 0x485   :  { %2068 = vsyncadd [#allocation5], 4294967264 }
 0x486   :  { %1485 = vsyncpa [#allocation4], 1 }
 0x487   :  { %1486 = vsyncpa [#allocation17], 1 }
 0x488   :  { %1487 = vsyncpa [#allocation5], 1 }
 0x489   :  { %1488 = vsyncpa [#allocation6], 1 }
 0x48a   :  { %1489 = vsyncpa [#allocation8], 1 }
 0x48b   :  { %1490 = vsyncpa [#allocation11], 1 }
 0x48c   :  { %1491 = vsyncpa [#allocation14], 1 }

</bundles_post_ra>
